<compile_context>
chip_gen: v7x
topology: tpu7x:2x2x1
jax: 0.10.0
libtpu: 0.0.40
codegen_flags: <defaults>
</compile_context>

<pallas_src>
import jax
import jax.numpy as jnp
from jax import lax
from jax.experimental import pallas as pl
from jax.experimental.pallas import tpu as pltpu

_EPS = 1e-5
_LANE = 128


# ---------------------------------------------------------------------------
# small helpers (wrapper-side glue)
# ---------------------------------------------------------------------------
def _round_up(n, m):
    return ((n + m - 1) // m) * m


def _pad_to(a, shape):
    return jnp.pad(a, [(0, t - s) for s, t in zip(a.shape, shape)])


def _pick_row_tile(rows, min_steps=4, max_tile=2048):
    """Largest multiple-of-8 divisor of `rows` <= max_tile giving >= min_steps
    grid steps (so DMA/compute overlap and megacore sharding actually engage)."""
    best = None
    t = 8
    while t <= min(rows, max_tile):
        if rows % t == 0 and rows // t >= min_steps:
            best = t
        t += 8
    if best is not None:
        return best
    start = (min(rows, max_tile) // 8) * 8
    for t in range(start, 7, -8):
        if rows % t == 0:
            return t
    return rows


def _nbytes(shape, dtype):
    n = 1
    for d in shape:
        n *= d
    return n * jnp.dtype(dtype).itemsize


def _cparams(io_blocks, scratch=()):
    """CompilerParams with explicit vmem budget: 2x (double-buffered) IO blocks
    + scratch + margin, clamped to [16 MiB, 64 MiB] (v7x physical ceiling)."""
    io = sum(_nbytes(s, d) for s, d in io_blocks)
    sc = sum(_nbytes(s, d) for s, d in scratch)
    limit = int(min(max(2 * io + sc + (4 << 20), 16 << 20), 64 << 20))
    return pltpu.CompilerParams(dimension_semantics=("parallel",),
                                vmem_limit_bytes=limit)


def _bn_coeffs(s_sum, s_sumsq, count, gamma, beta):
    """Fold training-mode BatchNorm into per-channel affine: y*scale + shift.
    NOTE: padded channel lanes rely on gamma/beta being zero-padded so
    scale = shift = 0 there (harmless to the sliced output)."""
    mean = s_sum / count
    var = jnp.maximum(s_sumsq / count - mean * mean, 0.0)
    scale = gamma * lax.rsqrt(var + _EPS)
    shift = beta - mean * scale
    return scale, shift


# ---------------------------------------------------------------------------
# kernel 1: conv1 (1x1) + partial bn1 statistics            grid = (R // TR,)
# ---------------------------------------------------------------------------
def _conv1_kernel(x_ref, w1_ref, y_ref, st_ref):
    # x_ref: (TR, CinP) bf16   w1_ref: (CinP, MidP) bf16
    # y_ref: (TR, MidP) bf16   st_ref: (1, 8, MidP) f32, rows [sum, sum^2, ...]
    y = jnp.dot(x_ref[...], w1_ref[...], preferred_element_type=jnp.float32)
    y_ref[...] = y.astype(y_ref.dtype)
    st_ref[0:1, 0:1, :] = jnp.sum(y, axis=0, keepdims=True)[None]
    st_ref[0:1, 1:2, :] = jnp.sum(y * y, axis=0, keepdims=True)[None]


# ---------------------------------------------------------------------------
# kernel 2: bn1-apply + relu + conv2 (3x3, pad=1) + partial bn2 statistics
#           grid = (N,): one image per step, single K=9*C matmul via im2col
# ---------------------------------------------------------------------------
def _conv2_kernel(y1_ref, w2_ref, sc1_ref, sh1_ref, y2_ref, st_ref,
                  pad_ref, col_ref):
    # y1_ref: (1, H, W, MidP) bf16   w2_ref: (9*MidP, MidP) bf16
    # sc1/sh1: (1, MidP) f32         y2_ref: (1, H, W, MidP) bf16
    # st_ref: (1, 8, MidP) f32
    # pad_ref: VMEM (H+2, W+2, MidP) f32 scratch (zero halo)
    # col_ref: VMEM (H*W, 9*MidP) bf16 scratch (im2col slab)
    _, h, w, c = y1_ref.shape

    # bn1 (f32) + relu on the bf16-stored conv1 output
    a = jnp.maximum(
        y1_ref[0].astype(jnp.float32) * sc1_ref[...] + sh1_ref[...], 0.0)

    # zero only the 1-pixel halo border; the interior is fully overwritten.
    zrow = jnp.zeros((1, w + 2, c), pad_ref.dtype)
    zcol = jnp.zeros((h, 1, c), pad_ref.dtype)
    pad_ref[0:1, :, :] = zrow
    pad_ref[h + 1:h + 2, :, :] = zrow
    pad_ref[1:h + 1, 0:1, :] = zcol
    pad_ref[1:h + 1, w + 1:w + 2, :] = zcol
    pad_ref[1:h + 1, 1:w + 1, :] = a

    # build the im2col slab (bf16, lane-aligned 128-wide column writes)
    for t in range(9):
        ky, kx = t // 3, t % 3
        tap = pad_ref[ky:ky + h, kx:kx + w, :].reshape(h * w, c)
        col_ref[:, t * c:(t + 1) * c] = tap.astype(col_ref.dtype)

    # single (H*W, 9C) x (9C, C) matmul -- accumulation stays inside the MXU
    y2 = jnp.dot(col_ref[...], w2_ref[...], preferred_element_type=jnp.float32)
    y2_ref[...] = y2.reshape(1, h, w, c).astype(y2_ref.dtype)
    st_ref[0:1, 0:1, :] = jnp.sum(y2, axis=0, keepdims=True)[None]
    st_ref[0:1, 1:2, :] = jnp.sum(y2 * y2, axis=0, keepdims=True)[None]


# ---------------------------------------------------------------------------
# kernel 3: bn2-apply + conv3 (1x1) + downsample conv (1x1) + joint moments
#           for both bn3 applications                        grid = (R // TR,)
# ---------------------------------------------------------------------------
def _conv3_kernel(y2_ref, x_ref, w3_ref, wd_ref, sc2_ref, sh2_ref,
                  u_ref, r_ref, st_ref):
    # st rows: [sum u, sum u^2, sum r, sum r^2, sum u*r, ...]
    h2 = y2_ref[...].astype(jnp.float32) * sc2_ref[...] + sh2_ref[...]   # bn2
    u = jnp.dot(h2.astype(jnp.bfloat16), w3_ref[...],
                preferred_element_type=jnp.float32)
    r = jnp.dot(x_ref[...], wd_ref[...], preferred_element_type=jnp.float32)
    u_ref[...] = u.astype(u_ref.dtype)
    r_ref[...] = r.astype(r_ref.dtype)
    st_ref[0:1, 0:1, :] = jnp.sum(u, axis=0, keepdims=True)[None]
    st_ref[0:1, 1:2, :] = jnp.sum(u * u, axis=0, keepdims=True)[None]
    st_ref[0:1, 2:3, :] = jnp.sum(r, axis=0, keepdims=True)[None]
    st_ref[0:1, 3:4, :] = jnp.sum(r * r, axis=0, keepdims=True)[None]
    st_ref[0:1, 4:5, :] = jnp.sum(u * r, axis=0, keepdims=True)[None]


# ---------------------------------------------------------------------------
# kernel 4: fused relu( bn3( bn3(u) + r ) ) == relu(u*A + r*B + C)
#                                                            grid = (R // TR,)
# ---------------------------------------------------------------------------
def _final_kernel(u_ref, r_ref, a_ref, b_ref, c_ref, o_ref):
    o_ref[...] = jnp.maximum(
        u_ref[...].astype(jnp.float32) * a_ref[...]
        + r_ref[...].astype(jnp.float32) * b_ref[...] + c_ref[...], 0.0)


# ---------------------------------------------------------------------------
# parameters (PyTorch layouts / default BN init)
# ---------------------------------------------------------------------------
def make_params(key, in_channels, out_channels):
    mid = out_channels // 4
    ks = jax.random.split(key, 4)
    return {
        # PyTorch conv weight shapes: (Cout, Cin, kh, kw), bias=False
        "w1": jax.random.normal(ks[0], (mid, in_channels, 1, 1), jnp.float32) * 0.1,
        "w2": jax.random.normal(ks[1], (mid, mid, 3, 3), jnp.float32) * 0.1,
        "w3": jax.random.normal(ks[2], (out_channels, mid, 1, 1), jnp.float32) * 0.1,
        "wd": jax.random.normal(ks[3], (out_channels, in_channels, 1, 1), jnp.float32) * 0.1,
        "g1": jnp.ones((mid,), jnp.float32), "b1": jnp.zeros((mid,), jnp.float32),
        "g2": jnp.ones((mid,), jnp.float32), "b2": jnp.zeros((mid,), jnp.float32),
        "g3": jnp.ones((out_channels,), jnp.float32), "b3": jnp.zeros((out_channels,), jnp.float32),
    }


# ---------------------------------------------------------------------------
# forward
# ---------------------------------------------------------------------------
@jax.jit
def residual_block_forward(x_nchw, params):
    n, cin, h, w = x_nchw.shape
    mid = params["w1"].shape[0]
    cout = params["w3"].shape[0]
    rows = n * h * w
    cin_p = _round_up(max(cin, _LANE), _LANE)
    mid_p = _round_up(max(mid, _LANE), _LANE)
    cout_p = _round_up(max(cout, _LANE), _LANE)
    tr = _pick_row_tile(rows)
    nt = rows // tr

    # ---- layout: NCHW -> (R, C), channels zero-padded to lane width, bf16 ----
    x2d = jnp.transpose(x_nchw, (0, 2, 3, 1)).reshape(rows, cin)
    x2d_p = _pad_to(x2d, (rows, cin_p)).astype(jnp.bfloat16)

    w1 = _pad_to(params["w1"].reshape(mid, cin).T, (cin_p, mid_p)).astype(jnp.bfloat16)
    # conv2 weights as a single (9*MidP, MidP) K-stacked slab (tap-major, same
    # ordering as the in-kernel im2col slab columns)
    w2 = jnp.transpose(params["w2"], (2, 3, 1, 0)).reshape(9, mid, mid)
    w2 = _pad_to(w2, (9, mid_p, mid_p)).reshape(9 * mid_p, mid_p).astype(jnp.bfloat16)
    w3 = _pad_to(params["w3"].reshape(cout, mid).T, (mid_p, cout_p)).astype(jnp.bfloat16)
    wd = _pad_to(params["wd"].reshape(cout, cin).T, (cin_p, cout_p)).astype(jnp.bfloat16)
    # TODO(synk): optionally merge conv1 + downsample into one matmul against
    #             [w1 | wd] to fill the 256-wide MXU N dim; only a net win when
    #             cout_p*2B <= the saved cin_p read (here cin_p == cout_p).

    g1 = _pad_to(params["g1"].reshape(1, -1), (1, mid_p))
    b1 = _pad_to(params["b1"].reshape(1, -1), (1, mid_p))
    g2 = _pad_to(params["g2"].reshape(1, -1), (1, mid_p))
    b2 = _pad_to(params["b2"].reshape(1, -1), (1, mid_p))
    g3 = _pad_to(params["g3"].reshape(1, -1), (1, cout_p))
    b3 = _pad_to(params["b3"].reshape(1, -1), (1, cout_p))

    # ---- stage 1: conv1 + partial bn1 stats ----------------------------------
    cp1 = _cparams([((tr, cin_p), jnp.bfloat16), ((cin_p, mid_p), jnp.bfloat16),
                    ((tr, mid_p), jnp.bfloat16), ((1, 8, mid_p), jnp.float32)])
    y1, st1 = pl.pallas_call(
        _conv1_kernel,
        out_shape=(jax.ShapeDtypeStruct((rows, mid_p), jnp.bfloat16),
                   jax.ShapeDtypeStruct((nt, 8, mid_p), jnp.float32)),
        grid_spec=pltpu.PrefetchScalarGridSpec(
            num_scalar_prefetch=0, grid=(nt,),
            in_specs=[pl.BlockSpec((tr, cin_p), lambda i: (i, 0)),
                      pl.BlockSpec((cin_p, mid_p), lambda i: (0, 0))],
            out_specs=(pl.BlockSpec((tr, mid_p), lambda i: (i, 0)),
                       pl.BlockSpec((1, 8, mid_p), lambda i: (i, 0, 0)))),
        compiler_params=cp1,
    )(x2d_p, w1)
    s1 = jnp.sum(st1, axis=0)
    scale1, shift1 = _bn_coeffs(s1[0:1], s1[1:2], rows, g1, b1)

    # ---- stage 2: bn1+relu -> conv2 (single K=9*C matmul) + partial bn2 stats
    cp2 = _cparams(
        [((1, h, w, mid_p), jnp.bfloat16), ((9 * mid_p, mid_p), jnp.bfloat16),
         ((1, mid_p), jnp.float32), ((1, mid_p), jnp.float32),
         ((1, h, w, mid_p), jnp.bfloat16), ((1, 8, mid_p), jnp.float32)],
        scratch=[((h + 2, w + 2, mid_p), jnp.float32),
                 ((h * w, 9 * mid_p), jnp.bfloat16)])
    y2, st2 = pl.pallas_call(
        _conv2_kernel,
        out_shape=(jax.ShapeDtypeStruct((n, h, w, mid_p), jnp.bfloat16),
                   jax.ShapeDtypeStruct((n, 8, mid_p), jnp.float32)),
        grid_spec=pltpu.PrefetchScalarGridSpec(
            num_scalar_prefetch=0, grid=(n,),
            in_specs=[pl.BlockSpec((1, h, w, mid_p), lambda i: (i, 0, 0, 0)),
                      pl.BlockSpec((9 * mid_p, mid_p), lambda i: (0, 0)),
                      pl.BlockSpec((1, mid_p), lambda i: (0, 0)),
                      pl.BlockSpec((1, mid_p), lambda i: (0, 0))],
            out_specs=(pl.BlockSpec((1, h, w, mid_p), lambda i: (i, 0, 0, 0)),
                       pl.BlockSpec((1, 8, mid_p), lambda i: (i, 0, 0))),
            scratch_shapes=[pltpu.VMEM((h + 2, w + 2, mid_p), jnp.float32),
                            pltpu.VMEM((h * w, 9 * mid_p), jnp.bfloat16)]),
        compiler_params=cp2,
    )(y1.reshape(n, h, w, mid_p), w2, scale1, shift1)
    s2 = jnp.sum(st2, axis=0)
    scale2, shift2 = _bn_coeffs(s2[0:1], s2[1:2], rows, g2, b2)

    # ---- stage 3: bn2-apply -> conv3 + downsample conv + joint moments -------
    cp3 = _cparams([((tr, mid_p), jnp.bfloat16), ((tr, cin_p), jnp.bfloat16),
                    ((mid_p, cout_p), jnp.bfloat16), ((cin_p, cout_p), jnp.bfloat16),
                    ((1, mid_p), jnp.float32), ((1, mid_p), jnp.float32),
                    ((tr, cout_p), jnp.bfloat16), ((tr, cout_p), jnp.bfloat16),
                    ((1, 8, cout_p), jnp.float32)])
    u, r, st3 = pl.pallas_call(
        _conv3_kernel,
        out_shape=(jax.ShapeDtypeStruct((rows, cout_p), jnp.bfloat16),
                   jax.ShapeDtypeStruct((rows, cout_p), jnp.bfloat16),
                   jax.ShapeDtypeStruct((nt, 8, cout_p), jnp.float32)),
        grid_spec=pltpu.PrefetchScalarGridSpec(
            num_scalar_prefetch=0, grid=(nt,),
            in_specs=[pl.BlockSpec((tr, mid_p), lambda i: (i, 0)),
                      pl.BlockSpec((tr, cin_p), lambda i: (i, 0)),
                      pl.BlockSpec((mid_p, cout_p), lambda i: (0, 0)),
                      pl.BlockSpec((cin_p, cout_p), lambda i: (0, 0)),
                      pl.BlockSpec((1, mid_p), lambda i: (0, 0)),
                      pl.BlockSpec((1, mid_p), lambda i: (0, 0))],
            out_specs=(pl.BlockSpec((tr, cout_p), lambda i: (i, 0)),
                       pl.BlockSpec((tr, cout_p), lambda i: (i, 0)),
                       pl.BlockSpec((1, 8, cout_p), lambda i: (i, 0, 0)))),
        compiler_params=cp3,
    )(y2.reshape(rows, mid_p), x2d_p, w3, wd, scale2, shift2)

    s3 = jnp.sum(st3, axis=0)
    su, suu, sr, srr, sur = s3[0:1], s3[1:2], s3[2:3], s3[3:4], s3[4:5]
    # bn3 applied to u = conv3 output
    scale_u, shift_u = _bn_coeffs(su, suu, rows, g3, b3)
    # bn3 applied again to v = bn3(u) + r; moments of v derived analytically.
    mu_u, e_uu = su / rows, suu / rows
    mu_r, e_rr, e_ur = sr / rows, srr / rows, sur / rows
    mean_v = scale_u * mu_u + shift_u + mu_r
    e_vv = (scale_u * scale_u * e_uu + shift_u * shift_u + e_rr
            + 2.0 * scale_u * shift_u * mu_u + 2.0 * scale_u * e_ur
            + 2.0 * shift_u * mu_r)
    var_v = jnp.maximum(e_vv - mean_v * mean_v, 0.0)
    scale_v = g3 * lax.rsqrt(var_v + _EPS)
    shift_v = b3 - mean_v * scale_v
    # relu(scale_v*(scale_u*u + shift_u + r) + shift_v) == relu(u*A + r*B + C)
    coef_a = scale_v * scale_u
    coef_b = scale_v
    coef_c = scale_v * shift_u + shift_v

    # ---- stage 4: fused double-bn3 + residual add + relu ---------------------
    cp4 = _cparams([((tr, cout_p), jnp.bfloat16), ((tr, cout_p), jnp.bfloat16),
                    ((1, cout_p), jnp.float32), ((1, cout_p), jnp.float32),
                    ((1, cout_p), jnp.float32), ((tr, cout_p), jnp.float32)])
    out2d = pl.pallas_call(
        _final_kernel,
        out_shape=jax.ShapeDtypeStruct((rows, cout_p), jnp.float32),
        grid_spec=pltpu.PrefetchScalarGridSpec(
            num_scalar_prefetch=0, grid=(nt,),
            in_specs=[pl.BlockSpec((tr, cout_p), lambda i: (i, 0)),
                      pl.BlockSpec((tr, cout_p), lambda i: (i, 0)),
                      pl.BlockSpec((1, cout_p), lambda i: (0, 0)),
                      pl.BlockSpec((1, cout_p), lambda i: (0, 0)),
                      pl.BlockSpec((1, cout_p), lambda i: (0, 0))],
            out_specs=pl.BlockSpec((tr, cout_p), lambda i: (i, 0))),
        compiler_params=cp4,
    )(u, r, coef_a, coef_b, coef_c)

    # strip channel padding; transpose only to match the PyTorch NCHW interface
    # (an extra HBM pass -- skip if the caller accepts NHWC).
    return jnp.transpose(out2d[:, :cout].reshape(n, h, w, cout), (0, 3, 1, 2))


# ---------------------------------------------------------------------------
# pure-JAX reference mirroring the kernel's precision choices:
# bf16 MXU operands, f32 accumulation, BN stats on pre-cast f32 values,
# bf16 HBM round-trip of y1/y2/u/r.
# ---------------------------------------------------------------------------
def _im2col_3x3(a_nhwc):
    n, h, w, c = a_nhwc.shape
    pad = jnp.pad(a_nhwc, ((0, 0), (1, 1), (1, 1), (0, 0)))
    cols = jnp.stack(
        [pad[:, ky:ky + h, kx:kx + w, :] for ky in range(3) for kx in range(3)],
        axis=3)
    return cols.reshape(n * h * w, 9 * c)


def _reference_forward(x_nchw, params):
    def bn_stats(y, g, b):
        m = jnp.mean(y, axis=0, keepdims=True)
        v = jnp.maximum(jnp.mean(y * y, axis=0, keepdims=True) - m * m, 0.0)
        scale = g * lax.rsqrt(v + _EPS)
        return scale, b - m * scale

    def mm(a, w):
        return jnp.dot(a.astype(jnp.bfloat16), w.astype(jnp.bfloat16),
                       preferred_element_type=jnp.float32)

    def q(a):  # bf16 storage round-trip (mirrors inter-stage HBM dtype)
        return a.astype(jnp.bfloat16).astype(jnp.float32)

    n, cin, h, w = x_nchw.shape
    mid = params["w1"].shape[0]
    cout = params["w3"].shape[0]
    x2d = jnp.transpose(x_nchw, (0, 2, 3, 1)).reshape(n * h * w, cin)
    w1 = params["w1"].reshape(mid, cin).T
    w2 = jnp.transpose(params["w2"], (2, 3, 1, 0)).reshape(9 * mid, mid)
    w3 = params["w3"].reshape(cout, mid).T
    wd = params["wd"].reshape(cout, cin).T

    y1 = mm(x2d, w1)
    sc1, sh1 = bn_stats(y1, params["g1"], params["b1"])
    a1 = jnp.maximum(q(y1) * sc1 + sh1, 0.0)
    y2 = mm(_im2col_3x3(a1.reshape(n, h, w, mid)), w2)
    sc2, sh2 = bn_stats(y2, params["g2"], params["b2"])
    h2 = q(y2) * sc2 + sh2
    u = mm(h2, w3)
    r = mm(x2d, wd)
    scu, shu = bn_stats(u, params["g3"], params["b3"])
    v_stats = u * scu + shu + r                      # f32 moments (as in kernel)
    scv, shv = bn_stats(v_stats, params["g3"], params["b3"])
    out = jnp.maximum((q(u) * scu + shu + q(r)) * scv + shv, 0.0)
    return jnp.transpose(out.reshape(n, h, w, cout), (0, 3, 1, 2))


if __name__ == "__main__":
    key = jax.random.PRNGKey(0)
    kx, kp = jax.random.split(key)

    N, C_IN, C_OUT, HW = 2, 4, 16, 16
    x = jax.random.normal(kx, (N, C_IN, HW, HW), jnp.float32)
    params = make_params(kp, C_IN, C_OUT)

    out = jax.block_until_ready(residual_block_forward(x, params))
    ref = jax.block_until_ready(_reference_forward(x, params))

    assert out.shape == (N, C_OUT, HW, HW), out.shape
    err = float(jnp.max(jnp.abs(out - ref)))
    assert jnp.allclose(out, ref, atol=1e-2, rtol=1e-2), err
    print("KERNEL_OK")
</pallas_src>

<mosaic_0001>
module attributes {stable_mosaic.version = 11 : i64} {
  func.func @_conv1_kernel(%arg0: i32, %arg1: memref<128x128xbf16, #tpu.memory_space<vmem>>, %arg2: memref<128x128xbf16, #tpu.memory_space<vmem>>, %arg3: memref<128x128xbf16, #tpu.memory_space<vmem>>, %arg4: memref<1x8x128xf32, #tpu.memory_space<vmem>>) attributes {dimension_semantics = [#tpu.dimension_semantics<parallel>], iteration_bounds = array<i64: 4>, scalar_prefetch = 0 : i64, scratch_operands = 0 : i64, tpu.core_type = #tpu.core_type<tc>, window_params = [{transform_indices = @transform_0, window_bounds = array<i64: 128, 128>}, {pipeline_mode = #tpu.pipeline_mode<synchronous>, transform_indices = @transform_1, window_bounds = array<i64: 128, 128>}, {transform_indices = @transform_2, window_bounds = array<i64: 128, 128>}, {transform_indices = @transform_3, window_bounds = array<i64: 1, 8, 128>}]} {
    %c0 = arith.constant 0 : index
    %c0_0 = arith.constant 0 : index
    %0 = vector.load %arg1[%c0, %c0_0] : memref<128x128xbf16, #tpu.memory_space<vmem>>, vector<128x128xbf16>
    %c0_1 = arith.constant 0 : index
    %c0_2 = arith.constant 0 : index
    %1 = vector.load %arg2[%c0_1, %c0_2] : memref<128x128xbf16, #tpu.memory_space<vmem>>, vector<128x128xbf16>
    %cst = arith.constant dense<0.000000e+00> : vector<128x128xf32>
    %2 = tpu.matmul %0, %1, %cst {dimension_numbers = #tpu.dot_dimension_numbers<[1], [0], [0], [1], [0, 0, 1, 1], [], []>} : vector<128x128xbf16>, vector<128x128xbf16>, vector<128x128xf32> -> vector<128x128xf32>
    %3 = arith.truncf %2 : vector<128x128xf32> to vector<128x128xbf16>
    %c0_3 = arith.constant 0 : index
    %c0_4 = arith.constant 0 : index
    %4 = vector.load %arg3[%c0_3, %c0_4] : memref<128x128xbf16, #tpu.memory_space<vmem>>, vector<128x128xbf16>
    tpu.vector_store %arg3[%c0_3, %c0_4], %3 {strides = array<i32>} : memref<128x128xbf16, #tpu.memory_space<vmem>>, vector<128x128xbf16>,
    %cst_5 = arith.constant dense<0.000000e+00> : vector<128xf32>
    %5 = vector.multi_reduction <add>, %2, %cst_5 [0] : vector<128x128xf32> to vector<128xf32>
    %6 = vector.shape_cast %5 : vector<128xf32> to vector<1x128xf32>
    %7 = vector.shape_cast %6 : vector<1x128xf32> to vector<1x1x128xf32>
    %c0_6 = arith.constant 0 : index
    %c0_7 = arith.constant 0 : index
    %c0_8 = arith.constant 0 : index
    %8 = vector.load %arg4[%c0_6, %c0_7, %c0_8] : memref<1x8x128xf32, #tpu.memory_space<vmem>>, vector<1x1x128xf32>
    tpu.vector_store %arg4[%c0_6, %c0_7, %c0_8], %7 {strides = array<i32>} : memref<1x8x128xf32, #tpu.memory_space<vmem>>, vector<1x1x128xf32>,
    %9 = arith.mulf %2, %2 : vector<128x128xf32>
    %cst_9 = arith.constant dense<0.000000e+00> : vector<128xf32>
    %10 = vector.multi_reduction <add>, %9, %cst_9 [0] : vector<128x128xf32> to vector<128xf32>
    %11 = vector.shape_cast %10 : vector<128xf32> to vector<1x128xf32>
    %12 = vector.shape_cast %11 : vector<1x128xf32> to vector<1x1x128xf32>
    %c0_10 = arith.constant 0 : index
    %c1 = arith.constant 1 : index
    %c0_11 = arith.constant 0 : index
    %13 = vector.load %arg4[%c0_10, %c1, %c0_11] : memref<1x8x128xf32, #tpu.memory_space<vmem>>, vector<1x1x128xf32>
    tpu.vector_store %arg4[%c0_10, %c1, %c0_11], %12 {strides = array<i32>} : memref<1x8x128xf32, #tpu.memory_space<vmem>>, vector<1x1x128xf32>,
    return
  }
  func.func @transform_0(%arg0: i32) -> (i32, i32) {
    %c0_i32 = arith.constant 0 : i32
    %c0_i32_0 = arith.constant 0 : i32
    return %arg0, %c0_i32 : i32, i32
  }
  func.func @transform_1(%arg0: i32) -> (i32, i32) {
    %c0_i32 = arith.constant 0 : i32
    %c0_i32_0 = arith.constant 0 : i32
    %c0_i32_1 = arith.constant 0 : i32
    return %c0_i32, %c0_i32_0 : i32, i32
  }
  func.func @transform_2(%arg0: i32) -> (i32, i32) {
    %c0_i32 = arith.constant 0 : i32
    %c0_i32_0 = arith.constant 0 : i32
    return %arg0, %c0_i32 : i32, i32
  }
  func.func @transform_3(%arg0: i32) -> (i32, i32, i32) {
    %c0_i32 = arith.constant 0 : i32
    %c0_i32_0 = arith.constant 0 : i32
    %c0_i32_1 = arith.constant 0 : i32
    return %arg0, %c0_i32, %c0_i32_0 : i32, i32, i32
  }
}

module attributes {stable_mosaic.version = 11 : i64} {
  func.func @_conv2_kernel(%arg0: i32, %arg1: memref<1x16x16x128xbf16, #tpu.memory_space<vmem>>, %arg2: memref<1152x128xbf16, #tpu.memory_space<vmem>>, %arg3: memref<1x128xf32, #tpu.memory_space<vmem>>, %arg4: memref<1x128xf32, #tpu.memory_space<vmem>>, %arg5: memref<1x16x16x128xbf16, #tpu.memory_space<vmem>>, %arg6: memref<1x8x128xf32, #tpu.memory_space<vmem>>, %arg7: memref<18x18x128xf32, #tpu.memory_space<vmem>>, %arg8: memref<256x1152xbf16, #tpu.memory_space<vmem>>) attributes {dimension_semantics = [#tpu.dimension_semantics<parallel>], iteration_bounds = array<i64: 2>, scalar_prefetch = 0 : i64, scratch_operands = 2 : i64, tpu.core_type = #tpu.core_type<tc>, window_params = [{transform_indices = @transform_0, window_bounds = array<i64: 1, 16, 16, 128>}, {pipeline_mode = #tpu.pipeline_mode<synchronous>, transform_indices = @transform_1, window_bounds = array<i64: 1152, 128>}, {pipeline_mode = #tpu.pipeline_mode<synchronous>, transform_indices = @transform_2, window_bounds = array<i64: 1, 128>}, {pipeline_mode = #tpu.pipeline_mode<synchronous>, transform_indices = @transform_3, window_bounds = array<i64: 1, 128>}, {transform_indices = @transform_4, window_bounds = array<i64: 1, 16, 16, 128>}, {transform_indices = @transform_5, window_bounds = array<i64: 1, 8, 128>}]} {
    %c0 = arith.constant 0 : index
    %c0_0 = arith.constant 0 : index
    %c0_1 = arith.constant 0 : index
    %c0_2 = arith.constant 0 : index
    %0 = vector.load %arg1[%c0, %c0_0, %c0_1, %c0_2] : memref<1x16x16x128xbf16, #tpu.memory_space<vmem>>, vector<1x16x16x128xbf16>
    %1 = vector.shape_cast %0 : vector<1x16x16x128xbf16> to vector<16x16x128xbf16>
    %2 = arith.extf %1 : vector<16x16x128xbf16> to vector<16x16x128xf32>
    %c0_3 = arith.constant 0 : index
    %c0_4 = arith.constant 0 : index
    %3 = vector.load %arg3[%c0_3, %c0_4] : memref<1x128xf32, #tpu.memory_space<vmem>>, vector<1x128xf32>
    %4 = vector.shape_cast %3 : vector<1x128xf32> to vector<1x1x128xf32>
    %5 = vector.broadcast %4 : vector<1x1x128xf32> to vector<16x16x128xf32>
    %6 = arith.mulf %2, %5 : vector<16x16x128xf32>
    %c0_5 = arith.constant 0 : index
    %c0_6 = arith.constant 0 : index
    %7 = vector.load %arg4[%c0_5, %c0_6] : memref<1x128xf32, #tpu.memory_space<vmem>>, vector<1x128xf32>
    %8 = vector.shape_cast %7 : vector<1x128xf32> to vector<1x1x128xf32>
    %9 = vector.broadcast %8 : vector<1x1x128xf32> to vector<16x16x128xf32>
    %10 = arith.addf %6, %9 : vector<16x16x128xf32>
    %cst = arith.constant 0.000000e+00 : f32
    %11 = vector.broadcast %cst : f32 to vector<16x16x128xf32>
    %12 = arith.maximumf %10, %11 : vector<16x16x128xf32>
    %cst_7 = arith.constant 0.000000e+00 : f32
    %13 = vector.broadcast %cst_7 : f32 to vector<1x18x128xf32>
    %cst_8 = arith.constant 0.000000e+00 : f32
    %14 = vector.broadcast %cst_8 : f32 to vector<16x1x128xf32>
    %c0_9 = arith.constant 0 : index
    %c0_10 = arith.constant 0 : index
    %c0_11 = arith.constant 0 : index
    %15 = vector.load %arg7[%c0_9, %c0_10, %c0_11] : memref<18x18x128xf32, #tpu.memory_space<vmem>>, vector<1x18x128xf32>
    tpu.vector_store %arg7[%c0_9, %c0_10, %c0_11], %13 {strides = array<i32>} : memref<18x18x128xf32, #tpu.memory_space<vmem>>, vector<1x18x128xf32>,
    %c17 = arith.constant 17 : index
    %c0_12 = arith.constant 0 : index
    %c0_13 = arith.constant 0 : index
    %16 = vector.load %arg7[%c17, %c0_12, %c0_13] : memref<18x18x128xf32, #tpu.memory_space<vmem>>, vector<1x18x128xf32>
    tpu.vector_store %arg7[%c17, %c0_12, %c0_13], %13 {strides = array<i32>} : memref<18x18x128xf32, #tpu.memory_space<vmem>>, vector<1x18x128xf32>,
    %c1 = arith.constant 1 : index
    %c0_14 = arith.constant 0 : index
    %c0_15 = arith.constant 0 : index
    %17 = vector.load %arg7[%c1, %c0_14, %c0_15] : memref<18x18x128xf32, #tpu.memory_space<vmem>>, vector<16x1x128xf32>
    tpu.vector_store %arg7[%c1, %c0_14, %c0_15], %14 {strides = array<i32>} : memref<18x18x128xf32, #tpu.memory_space<vmem>>, vector<16x1x128xf32>,
    %c1_16 = arith.constant 1 : index
    %c17_17 = arith.constant 17 : index
    %c0_18 = arith.constant 0 : index
    %18 = vector.load %arg7[%c1_16, %c17_17, %c0_18] : memref<18x18x128xf32, #tpu.memory_space<vmem>>, vector<16x1x128xf32>
    tpu.vector_store %arg7[%c1_16, %c17_17, %c0_18], %14 {strides = array<i32>} : memref<18x18x128xf32, #tpu.memory_space<vmem>>, vector<16x1x128xf32>,
    %c1_19 = arith.constant 1 : index
    %c1_20 = arith.constant 1 : index
    %c0_21 = arith.constant 0 : index
    %19 = vector.load %arg7[%c1_19, %c1_20, %c0_21] : memref<18x18x128xf32, #tpu.memory_space<vmem>>, vector<16x16x128xf32>
    tpu.vector_store %arg7[%c1_19, %c1_20, %c0_21], %12 {strides = array<i32>} : memref<18x18x128xf32, #tpu.memory_space<vmem>>, vector<16x16x128xf32>,
    %c0_22 = arith.constant 0 : index
    %c0_23 = arith.constant 0 : index
    %c0_24 = arith.constant 0 : index
    %20 = vector.load %arg7[%c0_22, %c0_23, %c0_24] : memref<18x18x128xf32, #tpu.memory_space<vmem>>, vector<16x16x128xf32>
    %21 = vector.shape_cast %20 : vector<16x16x128xf32> to vector<256x128xf32>
    %22 = arith.truncf %21 : vector<256x128xf32> to vector<256x128xbf16>
    %c0_25 = arith.constant 0 : index
    %c0_26 = arith.constant 0 : index
    %23 = vector.load %arg8[%c0_25, %c0_26] : memref<256x1152xbf16, #tpu.memory_space<vmem>>, vector<256x128xbf16>
    tpu.vector_store %arg8[%c0_25, %c0_26], %22 {strides = array<i32>} : memref<256x1152xbf16, #tpu.memory_space<vmem>>, vector<256x128xbf16>,
    %c0_27 = arith.constant 0 : index
    %c1_28 = arith.constant 1 : index
    %c0_29 = arith.constant 0 : index
    %24 = vector.load %arg7[%c0_27, %c1_28, %c0_29] : memref<18x18x128xf32, #tpu.memory_space<vmem>>, vector<16x16x128xf32>
    %25 = vector.shape_cast %24 : vector<16x16x128xf32> to vector<256x128xf32>
    %26 = arith.truncf %25 : vector<256x128xf32> to vector<256x128xbf16>
    %c0_30 = arith.constant 0 : index
    %c128 = arith.constant 128 : index
    %27 = vector.load %arg8[%c0_30, %c128] : memref<256x1152xbf16, #tpu.memory_space<vmem>>, vector<256x128xbf16>
    tpu.vector_store %arg8[%c0_30, %c128], %26 {strides = array<i32>} : memref<256x1152xbf16, #tpu.memory_space<vmem>>, vector<256x128xbf16>,
    %c0_31 = arith.constant 0 : index
    %c2 = arith.constant 2 : index
    %c0_32 = arith.constant 0 : index
    %28 = vector.load %arg7[%c0_31, %c2, %c0_32] : memref<18x18x128xf32, #tpu.memory_space<vmem>>, vector<16x16x128xf32>
    %29 = vector.shape_cast %28 : vector<16x16x128xf32> to vector<256x128xf32>
    %30 = arith.truncf %29 : vector<256x128xf32> to vector<256x128xbf16>
    %c0_33 = arith.constant 0 : index
    %c256 = arith.constant 256 : index
    %31 = vector.load %arg8[%c0_33, %c256] : memref<256x1152xbf16, #tpu.memory_space<vmem>>, vector<256x128xbf16>
    tpu.vector_store %arg8[%c0_33, %c256], %30 {strides = array<i32>} : memref<256x1152xbf16, #tpu.memory_space<vmem>>, vector<256x128xbf16>,
    %c1_34 = arith.constant 1 : index
    %c0_35 = arith.constant 0 : index
    %c0_36 = arith.constant 0 : index
    %32 = vector.load %arg7[%c1_34, %c0_35, %c0_36] : memref<18x18x128xf32, #tpu.memory_space<vmem>>, vector<16x16x128xf32>
    %33 = vector.shape_cast %32 : vector<16x16x128xf32> to vector<256x128xf32>
    %34 = arith.truncf %33 : vector<256x128xf32> to vector<256x128xbf16>
    %c0_37 = arith.constant 0 : index
    %c384 = arith.constant 384 : index
    %35 = vector.load %arg8[%c0_37, %c384] : memref<256x1152xbf16, #tpu.memory_space<vmem>>, vector<256x128xbf16>
    tpu.vector_store %arg8[%c0_37, %c384], %34 {strides = array<i32>} : memref<256x1152xbf16, #tpu.memory_space<vmem>>, vector<256x128xbf16>,
    %c1_38 = arith.constant 1 : index
    %c1_39 = arith.constant 1 : index
    %c0_40 = arith.constant 0 : index
    %36 = vector.load %arg7[%c1_38, %c1_39, %c0_40] : memref<18x18x128xf32, #tpu.memory_space<vmem>>, vector<16x16x128xf32>
    %37 = vector.shape_cast %36 : vector<16x16x128xf32> to vector<256x128xf32>
    %38 = arith.truncf %37 : vector<256x128xf32> to vector<256x128xbf16>
    %c0_41 = arith.constant 0 : index
    %c512 = arith.constant 512 : index
    %39 = vector.load %arg8[%c0_41, %c512] : memref<256x1152xbf16, #tpu.memory_space<vmem>>, vector<256x128xbf16>
    tpu.vector_store %arg8[%c0_41, %c512], %38 {strides = array<i32>} : memref<256x1152xbf16, #tpu.memory_space<vmem>>, vector<256x128xbf16>,
    %c1_42 = arith.constant 1 : index
    %c2_43 = arith.constant 2 : index
    %c0_44 = arith.constant 0 : index
    %40 = vector.load %arg7[%c1_42, %c2_43, %c0_44] : memref<18x18x128xf32, #tpu.memory_space<vmem>>, vector<16x16x128xf32>
    %41 = vector.shape_cast %40 : vector<16x16x128xf32> to vector<256x128xf32>
    %42 = arith.truncf %41 : vector<256x128xf32> to vector<256x128xbf16>
    %c0_45 = arith.constant 0 : index
    %c640 = arith.constant 640 : index
    %43 = vector.load %arg8[%c0_45, %c640] : memref<256x1152xbf16, #tpu.memory_space<vmem>>, vector<256x128xbf16>
    tpu.vector_store %arg8[%c0_45, %c640], %42 {strides = array<i32>} : memref<256x1152xbf16, #tpu.memory_space<vmem>>, vector<256x128xbf16>,
    %c2_46 = arith.constant 2 : index
    %c0_47 = arith.constant 0 : index
    %c0_48 = arith.constant 0 : index
    %44 = vector.load %arg7[%c2_46, %c0_47, %c0_48] : memref<18x18x128xf32, #tpu.memory_space<vmem>>, vector<16x16x128xf32>
    %45 = vector.shape_cast %44 : vector<16x16x128xf32> to vector<256x128xf32>
    %46 = arith.truncf %45 : vector<256x128xf32> to vector<256x128xbf16>
    %c0_49 = arith.constant 0 : index
    %c768 = arith.constant 768 : index
    %47 = vector.load %arg8[%c0_49, %c768] : memref<256x1152xbf16, #tpu.memory_space<vmem>>, vector<256x128xbf16>
    tpu.vector_store %arg8[%c0_49, %c768], %46 {strides = array<i32>} : memref<256x1152xbf16, #tpu.memory_space<vmem>>, vector<256x128xbf16>,
    %c2_50 = arith.constant 2 : index
    %c1_51 = arith.constant 1 : index
    %c0_52 = arith.constant 0 : index
    %48 = vector.load %arg7[%c2_50, %c1_51, %c0_52] : memref<18x18x128xf32, #tpu.memory_space<vmem>>, vector<16x16x128xf32>
    %49 = vector.shape_cast %48 : vector<16x16x128xf32> to vector<256x128xf32>
    %50 = arith.truncf %49 : vector<256x128xf32> to vector<256x128xbf16>
    %c0_53 = arith.constant 0 : index
    %c896 = arith.constant 896 : index
    %51 = vector.load %arg8[%c0_53, %c896] : memref<256x1152xbf16, #tpu.memory_space<vmem>>, vector<256x128xbf16>
    tpu.vector_store %arg8[%c0_53, %c896], %50 {strides = array<i32>} : memref<256x1152xbf16, #tpu.memory_space<vmem>>, vector<256x128xbf16>,
    %c2_54 = arith.constant 2 : index
    %c2_55 = arith.constant 2 : index
    %c0_56 = arith.constant 0 : index
    %52 = vector.load %arg7[%c2_54, %c2_55, %c0_56] : memref<18x18x128xf32, #tpu.memory_space<vmem>>, vector<16x16x128xf32>
    %53 = vector.shape_cast %52 : vector<16x16x128xf32> to vector<256x128xf32>
    %54 = arith.truncf %53 : vector<256x128xf32> to vector<256x128xbf16>
    %c0_57 = arith.constant 0 : index
    %c1024 = arith.constant 1024 : index
    %55 = vector.load %arg8[%c0_57, %c1024] : memref<256x1152xbf16, #tpu.memory_space<vmem>>, vector<256x128xbf16>
    tpu.vector_store %arg8[%c0_57, %c1024], %54 {strides = array<i32>} : memref<256x1152xbf16, #tpu.memory_space<vmem>>, vector<256x128xbf16>,
    %c0_58 = arith.constant 0 : index
    %c0_59 = arith.constant 0 : index
    %56 = vector.load %arg8[%c0_58, %c0_59] : memref<256x1152xbf16, #tpu.memory_space<vmem>>, vector<256x1152xbf16>
    %c0_60 = arith.constant 0 : index
    %c0_61 = arith.constant 0 : index
    %57 = vector.load %arg2[%c0_60, %c0_61] : memref<1152x128xbf16, #tpu.memory_space<vmem>>, vector<1152x128xbf16>
    %cst_62 = arith.constant dense<0.000000e+00> : vector<256x128xf32>
    %58 = tpu.matmul %56, %57, %cst_62 {dimension_numbers = #tpu.dot_dimension_numbers<[1], [0], [0], [1], [0, 0, 1, 1], [], []>} : vector<256x1152xbf16>, vector<1152x128xbf16>, vector<256x128xf32> -> vector<256x128xf32>
    %59 = vector.shape_cast %58 : vector<256x128xf32> to vector<1x16x16x128xf32>
    %60 = arith.truncf %59 : vector<1x16x16x128xf32> to vector<1x16x16x128xbf16>
    %c0_63 = arith.constant 0 : index
    %c0_64 = arith.constant 0 : index
    %c0_65 = arith.constant 0 : index
    %c0_66 = arith.constant 0 : index
    %61 = vector.load %arg5[%c0_63, %c0_64, %c0_65, %c0_66] : memref<1x16x16x128xbf16, #tpu.memory_space<vmem>>, vector<1x16x16x128xbf16>
    tpu.vector_store %arg5[%c0_63, %c0_64, %c0_65, %c0_66], %60 {strides = array<i32>} : memref<1x16x16x128xbf16, #tpu.memory_space<vmem>>, vector<1x16x16x128xbf16>,
    %cst_67 = arith.constant dense<0.000000e+00> : vector<128xf32>
    %62 = vector.multi_reduction <add>, %58, %cst_67 [0] : vector<256x128xf32> to vector<128xf32>
    %63 = vector.shape_cast %62 : vector<128xf32> to vector<1x128xf32>
    %64 = vector.shape_cast %63 : vector<1x128xf32> to vector<1x1x128xf32>
    %c0_68 = arith.constant 0 : index
    %c0_69 = arith.constant 0 : index
    %c0_70 = arith.constant 0 : index
    %65 = vector.load %arg6[%c0_68, %c0_69, %c0_70] : memref<1x8x128xf32, #tpu.memory_space<vmem>>, vector<1x1x128xf32>
    tpu.vector_store %arg6[%c0_68, %c0_69, %c0_70], %64 {strides = array<i32>} : memref<1x8x128xf32, #tpu.memory_space<vmem>>, vector<1x1x128xf32>,
    %66 = arith.mulf %58, %58 : vector<256x128xf32>
    %cst_71 = arith.constant dense<0.000000e+00> : vector<128xf32>
    %67 = vector.multi_reduction <add>, %66, %cst_71 [0] : vector<256x128xf32> to vector<128xf32>
    %68 = vector.shape_cast %67 : vector<128xf32> to vector<1x128xf32>
    %69 = vector.shape_cast %68 : vector<1x128xf32> to vector<1x1x128xf32>
    %c0_72 = arith.constant 0 : index
    %c1_73 = arith.constant 1 : index
    %c0_74 = arith.constant 0 : index
    %70 = vector.load %arg6[%c0_72, %c1_73, %c0_74] : memref<1x8x128xf32, #tpu.memory_space<vmem>>, vector<1x1x128xf32>
    tpu.vector_store %arg6[%c0_72, %c1_73, %c0_74], %69 {strides = array<i32>} : memref<1x8x128xf32, #tpu.memory_space<vmem>>, vector<1x1x128xf32>,
    return
  }
  func.func @transform_0(%arg0: i32) -> (i32, i32, i32, i32) {
    %c0_i32 = arith.constant 0 : i32
    %c0_i32_0 = arith.constant 0 : i32
    %c0_i32_1 = arith.constant 0 : i32
    %c0_i32_2 = arith.constant 0 : i32
    return %arg0, %c0_i32, %c0_i32_0, %c0_i32_1 : i32, i32, i32, i32
  }
  func.func @transform_1(%arg0: i32) -> (i32, i32) {
    %c0_i32 = arith.constant 0 : i32
    %c0_i32_0 = arith.constant 0 : i32
    %c0_i32_1 = arith.constant 0 : i32
    return %c0_i32, %c0_i32_0 : i32, i32
  }
  func.func @transform_2(%arg0: i32) -> (i32, i32) {
    %c0_i32 = arith.constant 0 : i32
    %c0_i32_0 = arith.constant 0 : i32
    %c0_i32_1 = arith.constant 0 : i32
    return %c0_i32, %c0_i32_0 : i32, i32
  }
  func.func @transform_3(%arg0: i32) -> (i32, i32) {
    %c0_i32 = arith.constant 0 : i32
    %c0_i32_0 = arith.constant 0 : i32
    %c0_i32_1 = arith.constant 0 : i32
    return %c0_i32, %c0_i32_0 : i32, i32
  }
  func.func @transform_4(%arg0: i32) -> (i32, i32, i32, i32) {
    %c0_i32 = arith.constant 0 : i32
    %c0_i32_0 = arith.constant 0 : i32
    %c0_i32_1 = arith.constant 0 : i32
    %c0_i32_2 = arith.constant 0 : i32
    return %arg0, %c0_i32, %c0_i32_0, %c0_i32_1 : i32, i32, i32, i32
  }
  func.func @transform_5(%arg0: i32) -> (i32, i32, i32) {
    %c0_i32 = arith.constant 0 : i32
    %c0_i32_0 = arith.constant 0 : i32
    %c0_i32_1 = arith.constant 0 : i32
    return %arg0, %c0_i32, %c0_i32_0 : i32, i32, i32
  }
}

module attributes {stable_mosaic.version = 11 : i64} {
  func.func @_conv3_kernel(%arg0: i32, %arg1: memref<128x128xbf16, #tpu.memory_space<vmem>>, %arg2: memref<128x128xbf16, #tpu.memory_space<vmem>>, %arg3: memref<128x128xbf16, #tpu.memory_space<vmem>>, %arg4: memref<128x128xbf16, #tpu.memory_space<vmem>>, %arg5: memref<1x128xf32, #tpu.memory_space<vmem>>, %arg6: memref<1x128xf32, #tpu.memory_space<vmem>>, %arg7: memref<128x128xbf16, #tpu.memory_space<vmem>>, %arg8: memref<128x128xbf16, #tpu.memory_space<vmem>>, %arg9: memref<1x8x128xf32, #tpu.memory_space<vmem>>) attributes {dimension_semantics = [#tpu.dimension_semantics<parallel>], iteration_bounds = array<i64: 4>, scalar_prefetch = 0 : i64, scratch_operands = 0 : i64, tpu.core_type = #tpu.core_type<tc>, window_params = [{transform_indices = @transform_0, window_bounds = array<i64: 128, 128>}, {transform_indices = @transform_1, window_bounds = array<i64: 128, 128>}, {pipeline_mode = #tpu.pipeline_mode<synchronous>, transform_indices = @transform_2, window_bounds = array<i64: 128, 128>}, {pipeline_mode = #tpu.pipeline_mode<synchronous>, transform_indices = @transform_3, window_bounds = array<i64: 128, 128>}, {pipeline_mode = #tpu.pipeline_mode<synchronous>, transform_indices = @transform_4, window_bounds = array<i64: 1, 128>}, {pipeline_mode = #tpu.pipeline_mode<synchronous>, transform_indices = @transform_5, window_bounds = array<i64: 1, 128>}, {transform_indices = @transform_6, window_bounds = array<i64: 128, 128>}, {transform_indices = @transform_7, window_bounds = array<i64: 128, 128>}, {transform_indices = @transform_8, window_bounds = array<i64: 1, 8, 128>}]} {
    %c0 = arith.constant 0 : index
    %c0_0 = arith.constant 0 : index
    %0 = vector.load %arg1[%c0, %c0_0] : memref<128x128xbf16, #tpu.memory_space<vmem>>, vector<128x128xbf16>
    %1 = arith.extf %0 : vector<128x128xbf16> to vector<128x128xf32>
    %c0_1 = arith.constant 0 : index
    %c0_2 = arith.constant 0 : index
    %2 = vector.load %arg5[%c0_1, %c0_2] : memref<1x128xf32, #tpu.memory_space<vmem>>, vector<1x128xf32>
    %3 = vector.broadcast %2 : vector<1x128xf32> to vector<128x128xf32>
    %4 = arith.mulf %1, %3 : vector<128x128xf32>
    %c0_3 = arith.constant 0 : index
    %c0_4 = arith.constant 0 : index
    %5 = vector.load %arg6[%c0_3, %c0_4] : memref<1x128xf32, #tpu.memory_space<vmem>>, vector<1x128xf32>
    %6 = vector.broadcast %5 : vector<1x128xf32> to vector<128x128xf32>
    %7 = arith.addf %4, %6 : vector<128x128xf32>
    %8 = arith.truncf %7 : vector<128x128xf32> to vector<128x128xbf16>
    %c0_5 = arith.constant 0 : index
    %c0_6 = arith.constant 0 : index
    %9 = vector.load %arg3[%c0_5, %c0_6] : memref<128x128xbf16, #tpu.memory_space<vmem>>, vector<128x128xbf16>
    %cst = arith.constant dense<0.000000e+00> : vector<128x128xf32>
    %10 = tpu.matmul %8, %9, %cst {dimension_numbers = #tpu.dot_dimension_numbers<[1], [0], [0], [1], [0, 0, 1, 1], [], []>} : vector<128x128xbf16>, vector<128x128xbf16>, vector<128x128xf32> -> vector<128x128xf32>
    %c0_7 = arith.constant 0 : index
    %c0_8 = arith.constant 0 : index
    %11 = vector.load %arg2[%c0_7, %c0_8] : memref<128x128xbf16, #tpu.memory_space<vmem>>, vector<128x128xbf16>
    %c0_9 = arith.constant 0 : index
    %c0_10 = arith.constant 0 : index
    %12 = vector.load %arg4[%c0_9, %c0_10] : memref<128x128xbf16, #tpu.memory_space<vmem>>, vector<128x128xbf16>
    %cst_11 = arith.constant dense<0.000000e+00> : vector<128x128xf32>
    %13 = tpu.matmul %11, %12, %cst_11 {dimension_numbers = #tpu.dot_dimension_numbers<[1], [0], [0], [1], [0, 0, 1, 1], [], []>} : vector<128x128xbf16>, vector<128x128xbf16>, vector<128x128xf32> -> vector<128x128xf32>
    %14 = arith.truncf %10 : vector<128x128xf32> to vector<128x128xbf16>
    %c0_12 = arith.constant 0 : index
    %c0_13 = arith.constant 0 : index
    %15 = vector.load %arg7[%c0_12, %c0_13] : memref<128x128xbf16, #tpu.memory_space<vmem>>, vector<128x128xbf16>
    tpu.vector_store %arg7[%c0_12, %c0_13], %14 {strides = array<i32>} : memref<128x128xbf16, #tpu.memory_space<vmem>>, vector<128x128xbf16>,
    %16 = arith.truncf %13 : vector<128x128xf32> to vector<128x128xbf16>
    %c0_14 = arith.constant 0 : index
    %c0_15 = arith.constant 0 : index
    %17 = vector.load %arg8[%c0_14, %c0_15] : memref<128x128xbf16, #tpu.memory_space<vmem>>, vector<128x128xbf16>
    tpu.vector_store %arg8[%c0_14, %c0_15], %16 {strides = array<i32>} : memref<128x128xbf16, #tpu.memory_space<vmem>>, vector<128x128xbf16>,
    %cst_16 = arith.constant dense<0.000000e+00> : vector<128xf32>
    %18 = vector.multi_reduction <add>, %10, %cst_16 [0] : vector<128x128xf32> to vector<128xf32>
    %19 = vector.shape_cast %18 : vector<128xf32> to vector<1x128xf32>
    %20 = vector.shape_cast %19 : vector<1x128xf32> to vector<1x1x128xf32>
    %c0_17 = arith.constant 0 : index
    %c0_18 = arith.constant 0 : index
    %c0_19 = arith.constant 0 : index
    %21 = vector.load %arg9[%c0_17, %c0_18, %c0_19] : memref<1x8x128xf32, #tpu.memory_space<vmem>>, vector<1x1x128xf32>
    tpu.vector_store %arg9[%c0_17, %c0_18, %c0_19], %20 {strides = array<i32>} : memref<1x8x128xf32, #tpu.memory_space<vmem>>, vector<1x1x128xf32>,
    %22 = arith.mulf %10, %10 : vector<128x128xf32>
    %cst_20 = arith.constant dense<0.000000e+00> : vector<128xf32>
    %23 = vector.multi_reduction <add>, %22, %cst_20 [0] : vector<128x128xf32> to vector<128xf32>
    %24 = vector.shape_cast %23 : vector<128xf32> to vector<1x128xf32>
    %25 = vector.shape_cast %24 : vector<1x128xf32> to vector<1x1x128xf32>
    %c0_21 = arith.constant 0 : index
    %c1 = arith.constant 1 : index
    %c0_22 = arith.constant 0 : index
    %26 = vector.load %arg9[%c0_21, %c1, %c0_22] : memref<1x8x128xf32, #tpu.memory_space<vmem>>, vector<1x1x128xf32>
    tpu.vector_store %arg9[%c0_21, %c1, %c0_22], %25 {strides = array<i32>} : memref<1x8x128xf32, #tpu.memory_space<vmem>>, vector<1x1x128xf32>,
    %cst_23 = arith.constant dense<0.000000e+00> : vector<128xf32>
    %27 = vector.multi_reduction <add>, %13, %cst_23 [0] : vector<128x128xf32> to vector<128xf32>
    %28 = vector.shape_cast %27 : vector<128xf32> to vector<1x128xf32>
    %29 = vector.shape_cast %28 : vector<1x128xf32> to vector<1x1x128xf32>
    %c0_24 = arith.constant 0 : index
    %c2 = arith.constant 2 : index
    %c0_25 = arith.constant 0 : index
    %30 = vector.load %arg9[%c0_24, %c2, %c0_25] : memref<1x8x128xf32, #tpu.memory_space<vmem>>, vector<1x1x128xf32>
    tpu.vector_store %arg9[%c0_24, %c2, %c0_25], %29 {strides = array<i32>} : memref<1x8x128xf32, #tpu.memory_space<vmem>>, vector<1x1x128xf32>,
    %31 = arith.mulf %13, %13 : vector<128x128xf32>
    %cst_26 = arith.constant dense<0.000000e+00> : vector<128xf32>
    %32 = vector.multi_reduction <add>, %31, %cst_26 [0] : vector<128x128xf32> to vector<128xf32>
    %33 = vector.shape_cast %32 : vector<128xf32> to vector<1x128xf32>
    %34 = vector.shape_cast %33 : vector<1x128xf32> to vector<1x1x128xf32>
    %c0_27 = arith.constant 0 : index
    %c3 = arith.constant 3 : index
    %c0_28 = arith.constant 0 : index
    %35 = vector.load %arg9[%c0_27, %c3, %c0_28] : memref<1x8x128xf32, #tpu.memory_space<vmem>>, vector<1x1x128xf32>
    tpu.vector_store %arg9[%c0_27, %c3, %c0_28], %34 {strides = array<i32>} : memref<1x8x128xf32, #tpu.memory_space<vmem>>, vector<1x1x128xf32>,
    %36 = arith.mulf %10, %13 : vector<128x128xf32>
    %cst_29 = arith.constant dense<0.000000e+00> : vector<128xf32>
    %37 = vector.multi_reduction <add>, %36, %cst_29 [0] : vector<128x128xf32> to vector<128xf32>
    %38 = vector.shape_cast %37 : vector<128xf32> to vector<1x128xf32>
    %39 = vector.shape_cast %38 : vector<1x128xf32> to vector<1x1x128xf32>
    %c0_30 = arith.constant 0 : index
    %c4 = arith.constant 4 : index
    %c0_31 = arith.constant 0 : index
    %40 = vector.load %arg9[%c0_30, %c4, %c0_31] : memref<1x8x128xf32, #tpu.memory_space<vmem>>, vector<1x1x128xf32>
    tpu.vector_store %arg9[%c0_30, %c4, %c0_31], %39 {strides = array<i32>} : memref<1x8x128xf32, #tpu.memory_space<vmem>>, vector<1x1x128xf32>,
    return
  }
  func.func @transform_0(%arg0: i32) -> (i32, i32) {
    %c0_i32 = arith.constant 0 : i32
    %c0_i32_0 = arith.constant 0 : i32
    return %arg0, %c0_i32 : i32, i32
  }
  func.func @transform_1(%arg0: i32) -> (i32, i32) {
    %c0_i32 = arith.constant 0 : i32
    %c0_i32_0 = arith.constant 0 : i32
    return %arg0, %c0_i32 : i32, i32
  }
  func.func @transform_2(%arg0: i32) -> (i32, i32) {
    %c0_i32 = arith.constant 0 : i32
    %c0_i32_0 = arith.constant 0 : i32
    %c0_i32_1 = arith.constant 0 : i32
    return %c0_i32, %c0_i32_0 : i32, i32
  }
  func.func @transform_3(%arg0: i32) -> (i32, i32) {
    %c0_i32 = arith.constant 0 : i32
    %c0_i32_0 = arith.constant 0 : i32
    %c0_i32_1 = arith.constant 0 : i32
    return %c0_i32, %c0_i32_0 : i32, i32
  }
  func.func @transform_4(%arg0: i32) -> (i32, i32) {
    %c0_i32 = arith.constant 0 : i32
    %c0_i32_0 = arith.constant 0 : i32
    %c0_i32_1 = arith.constant 0 : i32
    return %c0_i32, %c0_i32_0 : i32, i32
  }
  func.func @transform_5(%arg0: i32) -> (i32, i32) {
    %c0_i32 = arith.constant 0 : i32
    %c0_i32_0 = arith.constant 0 : i32
    %c0_i32_1 = arith.constant 0 : i32
    return %c0_i32, %c0_i32_0 : i32, i32
  }
  func.func @transform_6(%arg0: i32) -> (i32, i32) {
    %c0_i32 = arith.constant 0 : i32
    %c0_i32_0 = arith.constant 0 : i32
    return %arg0, %c0_i32 : i32, i32
  }
  func.func @transform_7(%arg0: i32) -> (i32, i32) {
    %c0_i32 = arith.constant 0 : i32
    %c0_i32_0 = arith.constant 0 : i32
    return %arg0, %c0_i32 : i32, i32
  }
  func.func @transform_8(%arg0: i32) -> (i32, i32, i32) {
    %c0_i32 = arith.constant 0 : i32
    %c0_i32_0 = arith.constant 0 : i32
    %c0_i32_1 = arith.constant 0 : i32
    return %arg0, %c0_i32, %c0_i32_0 : i32, i32, i32
  }
}

module attributes {stable_mosaic.version = 11 : i64} {
  func.func @_final_kernel(%arg0: i32, %arg1: memref<128x128xbf16, #tpu.memory_space<vmem>>, %arg2: memref<128x128xbf16, #tpu.memory_space<vmem>>, %arg3: memref<1x128xf32, #tpu.memory_space<vmem>>, %arg4: memref<1x128xf32, #tpu.memory_space<vmem>>, %arg5: memref<1x128xf32, #tpu.memory_space<vmem>>, %arg6: memref<128x128xf32, #tpu.memory_space<vmem>>) attributes {dimension_semantics = [#tpu.dimension_semantics<parallel>], iteration_bounds = array<i64: 4>, scalar_prefetch = 0 : i64, scratch_operands = 0 : i64, tpu.core_type = #tpu.core_type<tc>, window_params = [{transform_indices = @transform_0, window_bounds = array<i64: 128, 128>}, {transform_indices = @transform_1, window_bounds = array<i64: 128, 128>}, {pipeline_mode = #tpu.pipeline_mode<synchronous>, transform_indices = @transform_2, window_bounds = array<i64: 1, 128>}, {pipeline_mode = #tpu.pipeline_mode<synchronous>, transform_indices = @transform_3, window_bounds = array<i64: 1, 128>}, {pipeline_mode = #tpu.pipeline_mode<synchronous>, transform_indices = @transform_4, window_bounds = array<i64: 1, 128>}, {transform_indices = @transform_5, window_bounds = array<i64: 128, 128>}]} {
    %c0 = arith.constant 0 : index
    %c0_0 = arith.constant 0 : index
    %0 = vector.load %arg1[%c0, %c0_0] : memref<128x128xbf16, #tpu.memory_space<vmem>>, vector<128x128xbf16>
    %1 = arith.extf %0 : vector<128x128xbf16> to vector<128x128xf32>
    %c0_1 = arith.constant 0 : index
    %c0_2 = arith.constant 0 : index
    %2 = vector.load %arg3[%c0_1, %c0_2] : memref<1x128xf32, #tpu.memory_space<vmem>>, vector<1x128xf32>
    %3 = vector.broadcast %2 : vector<1x128xf32> to vector<128x128xf32>
    %4 = arith.mulf %1, %3 : vector<128x128xf32>
    %c0_3 = arith.constant 0 : index
    %c0_4 = arith.constant 0 : index
    %5 = vector.load %arg2[%c0_3, %c0_4] : memref<128x128xbf16, #tpu.memory_space<vmem>>, vector<128x128xbf16>
    %6 = arith.extf %5 : vector<128x128xbf16> to vector<128x128xf32>
    %c0_5 = arith.constant 0 : index
    %c0_6 = arith.constant 0 : index
    %7 = vector.load %arg4[%c0_5, %c0_6] : memref<1x128xf32, #tpu.memory_space<vmem>>, vector<1x128xf32>
    %8 = vector.broadcast %7 : vector<1x128xf32> to vector<128x128xf32>
    %9 = arith.mulf %6, %8 : vector<128x128xf32>
    %10 = arith.addf %4, %9 : vector<128x128xf32>
    %c0_7 = arith.constant 0 : index
    %c0_8 = arith.constant 0 : index
    %11 = vector.load %arg5[%c0_7, %c0_8] : memref<1x128xf32, #tpu.memory_space<vmem>>, vector<1x128xf32>
    %12 = vector.broadcast %11 : vector<1x128xf32> to vector<128x128xf32>
    %13 = arith.addf %10, %12 : vector<128x128xf32>
    %cst = arith.constant 0.000000e+00 : f32
    %14 = vector.broadcast %cst : f32 to vector<128x128xf32>
    %15 = arith.maximumf %13, %14 : vector<128x128xf32>
    %c0_9 = arith.constant 0 : index
    %c0_10 = arith.constant 0 : index
    %16 = vector.load %arg6[%c0_9, %c0_10] : memref<128x128xf32, #tpu.memory_space<vmem>>, vector<128x128xf32>
    tpu.vector_store %arg6[%c0_9, %c0_10], %15 {strides = array<i32>} : memref<128x128xf32, #tpu.memory_space<vmem>>, vector<128x128xf32>,
    return
  }
  func.func @transform_0(%arg0: i32) -> (i32, i32) {
    %c0_i32 = arith.constant 0 : i32
    %c0_i32_0 = arith.constant 0 : i32
    return %arg0, %c0_i32 : i32, i32
  }
  func.func @transform_1(%arg0: i32) -> (i32, i32) {
    %c0_i32 = arith.constant 0 : i32
    %c0_i32_0 = arith.constant 0 : i32
    return %arg0, %c0_i32 : i32, i32
  }
  func.func @transform_2(%arg0: i32) -> (i32, i32) {
    %c0_i32 = arith.constant 0 : i32
    %c0_i32_0 = arith.constant 0 : i32
    %c0_i32_1 = arith.constant 0 : i32
    return %c0_i32, %c0_i32_0 : i32, i32
  }
  func.func @transform_3(%arg0: i32) -> (i32, i32) {
    %c0_i32 = arith.constant 0 : i32
    %c0_i32_0 = arith.constant 0 : i32
    %c0_i32_1 = arith.constant 0 : i32
    return %c0_i32, %c0_i32_0 : i32, i32
  }
  func.func @transform_4(%arg0: i32) -> (i32, i32) {
    %c0_i32 = arith.constant 0 : i32
    %c0_i32_0 = arith.constant 0 : i32
    %c0_i32_1 = arith.constant 0 : i32
    return %c0_i32, %c0_i32_0 : i32, i32
  }
  func.func @transform_5(%arg0: i32) -> (i32, i32) {
    %c0_i32 = arith.constant 0 : i32
    %c0_i32_0 = arith.constant 0 : i32
    return %arg0, %c0_i32 : i32, i32
  }
}

</mosaic_0001>

<bundles_post_ra>
// kernel: mul.48
= control target key start
LH: loop header
LB: loop body
LE: loop exit
PB: predicated region body
PF: predicated region fallthrough
CT: control target
= control target key end

     0   :  { %s34_s0 = inlined_call_operand.vmem [shape: f32[1,128], index: 0, kind: input, shape index: {}]   ;;  %s35_s1 = inlined_call_operand.vmem [shape: f32[1,128], index: 1, kind: input, shape index: {}]   ;;  %s36_s2 = inlined_call_operand.vmem [shape: f32[1,128], index: 2, kind: output, shape index: {}]  }
   0x1   :  { %v3_v0 = vld [vmem:[%s34_s0] sm:$0x1] }
   0x2   :  { %v4_v1 = vld [vmem:[%s35_s1] sm:$0x1] }
   0x3   :  { %v7_v2 = vmul.f32 %v4_v1, %v3_v0 }
   0x5   :  { %9 = vst [vmem:[%s36_s2] sm:$0x1] %v7_v2 }

// kernel: residual_block_forward.4
= control target key start
LH: loop header
LB: loop body
LE: loop exit
PB: predicated region body
PF: predicated region fallthrough
CT: control target
= control target key end

     0   :  { %s861_s12 = smov 0   ;;  %s937_s0 = inlined_call_operand.vmem [shape: bf16[512,128], index: 0, kind: input, shape index: {}]   ;;  %s938_s1 = inlined_call_operand.vmem [shape: bf16[128,128], index: 1, kind: input, shape index: {}]   ;;  %s939_s2 = inlined_call_operand.vmem [shape: bf16[512,128], index: 2, kind: output, shape index: {0}]   ;;  %s940_s3 = inlined_call_operand.vmem [shape: f32[4,8,128], index: 3, kind: output, shape index: {1}]  }
   0x1 LB: > { %s867_s13 = sadd.s32 4294967295, %s839_s12   ;;  %p642_p0 = scmp.ge.s32.totalorder %s839_s12, 1  ;;  %s839_s12 = sphi %s861_s12, %s14_s12  }
   0x2   : > { %p141_p1 = scmp.lt.s32.totalorder %s839_s12, 5 }
   0x4   : > { %p142_p2 = pnand %p642_p0, %p141_p1 }
   0x5   : > { %v817_v0 = vld [vmem:[%s938_s1] sm:$0xff] (!%p142_p2)   ;;  %s643_s16 = sshll.u32 (!%p142_p2), %s867_s13, 4  ;;  %v818_v1 = vld [vmem:[%s938_s1 + $0x8] sm:$0xff] (!%p142_p2)   ;;  %v819_v2 = vld [vmem:[%s938_s1 + $0x10] sm:$0xff] (!%p142_p2)   ;;  %p181_p4 = scmp.lt.s32.totalorder (!%p142_p2), %s867_s13, 3 }
   0x6   : > { %145 = sbr.rel (%p142_p2) target bundleno = 298 (0x12a), region = 28  ;;  %p170_p3 = scmp.lt.s32.totalorder (!%p142_p2), %s643_s16, 63  ;;  %761 = vmatprep.subr.bf16.mxu0 (!%p142_p2), %v817_v0  ;;  %793 = vmatprep.subr.bf16.mxu1 (!%p142_p2), %v817_v0  ;;  %v820_v3 = vld [vmem:[%s938_s1 + $0x18] sm:$0xff] (!%p142_p2)   ;;  %v821_v5 = vld [vmem:[%s938_s1 + $0x20] sm:$0xff] (!%p142_p2)   ;;  %v822_v7 = vld [vmem:[%s938_s1 + $0x28] sm:$0xff] (!%p142_p2)  }
   0x7   : > { %762 = vmatpush3.bf16.msra.mxu0 (!%p142_p2), %v817_v0  ;;  %801 = vmatpush3.bf16.msra.mxu1 (!%p142_p2), %v817_v0  ;;  %v823_v8 = vld [vmem:[%s938_s1 + $0x30] sm:$0xff] (!%p142_p2)   ;;  %v824_v9 = vld [vmem:[%s938_s1 + $0x38] sm:$0xff] (!%p142_p2)  }
   0x8   : > { %763 = vmatprep.subr.bf16.mxu0 (!%p142_p2), %v818_v1  ;;  %794 = vmatprep.subr.bf16.mxu1 (!%p142_p2), %v818_v1 }
   0xb   : > { %764 = vmatpush3.bf16.msra.mxu0 (!%p142_p2), %v818_v1  ;;  %802 = vmatpush3.bf16.msra.mxu1 (!%p142_p2), %v818_v1 }
   0xc   : > { %765 = vmatprep.subr.bf16.mxu0 (!%p142_p2), %v819_v2  ;;  %795 = vmatprep.subr.bf16.mxu1 (!%p142_p2), %v819_v2 }
   0xd   : > { %s942_s16 = smov (!%p170_p3, %s643_s16), 63  ;;  %s944_s13 = smov (!%p181_p4, %s867_s13), 3 }
   0xe   : > { %s644_s21 = sshll.u32 %s942_s16, 2  ;;  %s647_s11 = sshll.u32 %s944_s13, 3 }
   0xf   : > { %s889_s24 = scalar_lea.vmem %s937_s0, %s644_s21  ;;  %766 = vmatpush3.bf16.msra.mxu0 %v819_v2  ;;  %803 = vmatpush3.bf16.msra.mxu1 %v819_v2  ;;  %s919_s10 = scalar_lea.vmem %s939_s2, %s644_s21 }
  0x10   : > { %v825_v4 = vld [vmem:[%s889_s24] sm:$0xff]   ;;  %767 = vmatprep.subr.bf16.mxu0 %v820_v3  ;;  %796 = vmatprep.subr.bf16.mxu1 %v820_v3  ;;  %v826_v10 = vld [vmem:[%s889_s24 + $0x8] sm:$0xff]   ;;  %v827_v12 = vld [vmem:[%s889_s24 + $0x10] sm:$0xff]   ;;  %s184_s16 = scalar_lea.vmem %s940_s3, %s647_s11 }
  0x11   : > { %777 = vmatprep.mubr.bf16.mxu0 %v825_v4  ;;  %v829_v6 = vld [vmem:[%s889_s24 + $0x20] sm:$0xff]   ;;  %v830_v11 = vld [vmem:[%s889_s24 + $0x28] sm:$0xff]   ;;  %v831_v13 = vld [vmem:[%s889_s24 + $0x30] sm:$0xff]  }
  0x12   : > { %785 = vmatprep.mubr.bf16.mxu1 %v829_v6  ;;  %v828_v14 = vld [vmem:[%s889_s24 + $0x18] sm:$0xff]  }
  0x13   : > { %768 = vmatpush3.bf16.msra.mxu0 %v820_v3  ;;  %804 = vmatpush3.bf16.msra.mxu1 %v820_v3  ;;  %v832_v15 = vld [vmem:[%s889_s24 + $0x38] sm:$0xff]  }
  0x14   : > { %769 = vmatprep.subr.bf16.mxu0 %v821_v5  ;;  %797 = vmatprep.subr.bf16.mxu1 %v821_v5 }
  0x17   : > { %770 = vmatpush3.bf16.msra.mxu0 %v821_v5  ;;  %805 = vmatpush3.bf16.msra.mxu1 %v821_v5 }
  0x18   : > { %771 = vmatprep.subr.bf16.mxu0 %v822_v7  ;;  %798 = vmatprep.subr.bf16.mxu1 %v822_v7 }
  0x1b   : > { %772 = vmatpush3.bf16.msra.mxu0 %v822_v7  ;;  %806 = vmatpush3.bf16.msra.mxu1 %v822_v7 }
  0x1c   : > { %773 = vmatprep.subr.bf16.mxu0 %v823_v8  ;;  %799 = vmatprep.subr.bf16.mxu1 %v823_v8 }
  0x1f   : > { %774 = vmatpush3.bf16.msra.mxu0 %v823_v8  ;;  %807 = vmatpush3.bf16.msra.mxu1 %v823_v8 }
  0x20   : > { %775 = vmatprep.subr.bf16.mxu0 %v824_v9  ;;  %800 = vmatprep.subr.bf16.mxu1 %v824_v9 }
  0x23   : > { %776 = vmatpush3.bf16.msra.mxu0 %v824_v9  ;;  %808 = vmatpush3.bf16.msra.mxu1 %v824_v9 }
  0x26   : > { %778 = vmatmul.mubr.bf16.vlgmr.msra.gmra.mrb[0].mxu0 %v826_v10  ;;  %786 = vmatmul.mubr.bf16.vlgmr.msra.gmra.mrb[0].mxu1 %v830_v11 }
  0x27   : > { %781 = vmatprep.mubr.bf16.mxu0 %v827_v12  ;;  %789 = vmatprep.mubr.bf16.mxu1 %v831_v13 }
  0x2e   : > { %782 = vmatmul.mubr.bf16.gmra.mrb[4].mxu0 %v828_v14  ;;  %790 = vmatmul.mubr.bf16.gmra.mrb[4].mxu1 %v832_v15 }
  0xf9   : > { %v779_v16 = vpop.f32.mrb[0].mxu0  ;;  %v787_v17 = vpop.f32.mrb[0].mxu1 }
  0xfa   : > { %v348_v18 = vpop.f32.mrb[1].mxu0  ;;  %v380_v19 = vpop.f32.mrb[1].mxu1  ;;  %v515_v31 = vmul.f32 %v779_v16, %v779_v16  ;;  %v523_v3 = vmul.f32 %v787_v17, %v787_v17 }
  0xfb   : > { %v780_v20 = vpop.f32.mrb[2].mxu0  ;;  %v788_v21 = vpop.f32.mrb[2].mxu1  ;;  %v513_v22 = vmul.f32 %v348_v18, %v348_v18  ;;  %v521_v61 = vmul.f32 %v380_v19, %v380_v19 }
  0xfc   : > { %v706_v23 = vpack.c.bf16 %v780_v20, %v779_v16  ;;  %v351_v24 = vpop.f32.mrb[3].mxu0  ;;  %v726_v25 = vpack.c.bf16 %v788_v21, %v787_v17  ;;  %v383_v26 = vpop.f32.mrb[3].mxu1  ;;  %v516_v34 = vmul.f32 %v780_v20, %v780_v20  ;;  %v524_v6 = vmul.f32 %v788_v21, %v788_v21 }
  0xfd   : > { %v701_v27 = vpack.c.bf16 %v351_v24, %v348_v18  ;;  %v491_v28 = vadd.f32 %v351_v24, %v348_v18  ;;  %v514_v29 = vmul.f32 %v351_v24, %v351_v24  ;;  %v721_v30 = vpack.c.bf16 %v383_v26, %v380_v19 }
  0xfe   : > { %738 = vst [vmem:[%s919_s10 + $0x8] sm:$0xff] %v706_v23   ;;  %742 = vst [vmem:[%s919_s10 + $0x28] sm:$0xff] %v726_v25   ;;  %v522_v2 = vmul.f32 %v383_v26, %v383_v26 }
  0xff   : > { %702 = vst [vmem:[%s919_s10] sm:$0xff] %v701_v27   ;;  %v492_v32 = vadd.f32 %v779_v16, %v491_v28  ;;  %v529_v33 = vadd.f32 %v514_v29, %v513_v22  ;;  %741 = vst [vmem:[%s919_s10 + $0x20] sm:$0xff] %v721_v30  }
 0x101   : > { %v530_v35 = vadd.f32 %v529_v33, %v515_v31  ;;  %v783_v36 = vpop.f32.mrb[4].mxu0  ;;  %v493_v37 = vadd.f32 %v780_v20, %v492_v32  ;;  %v791_v38 = vpop.f32.mrb[4].mxu1 }
 0x102   : > { %v364_v39 = vpop.f32.mrb[5].mxu0  ;;  %v396_v40 = vpop.f32.mrb[5].mxu1  ;;  %v519_v55 = vmul.f32 %v783_v36, %v783_v36  ;;  %v527_v15 = vmul.f32 %v791_v38, %v791_v38 }
 0x103   : > { %v494_v41 = vadd.f32 %v493_v37, %v364_v39  ;;  %v517_v42 = vmul.f32 %v364_v39, %v364_v39  ;;  %v531_v43 = vadd.f32 %v530_v35, %v516_v34  ;;  %v784_v44 = vpop.f32.mrb[6].mxu0  ;;  %v792_v45 = vpop.f32.mrb[6].mxu1  ;;  %v525_v9 = vmul.f32 %v396_v40, %v396_v40 }
 0x104   : > { %v716_v46 = vpack.c.bf16 %v784_v44, %v783_v36  ;;  %v367_v47 = vpop.f32.mrb[7].mxu0  ;;  %v736_v48 = vpack.c.bf16 %v792_v45, %v791_v38  ;;  %v399_v49 = vpop.f32.mrb[7].mxu1  ;;  %v520_v58 = vmul.f32 %v784_v44, %v784_v44 }
 0x105   : > { %v532_v50 = vadd.f32 %v531_v43, %v517_v42  ;;  %v711_v51 = vpack.c.bf16 %v367_v47, %v364_v39  ;;  %v495_v52 = vadd.f32 %v494_v41, %v367_v47  ;;  %v518_v53 = vmul.f32 %v367_v47, %v367_v47 }
 0x106   : > { %740 = vst [vmem:[%s919_s10 + $0x18] sm:$0xff] %v716_v46   ;;  %744 = vst [vmem:[%s919_s10 + $0x38] sm:$0xff] %v736_v48   ;;  %v731_v54 = vpack.c.bf16 %v399_v49, %v396_v40  ;;  %v526_v14 = vmul.f32 %v399_v49, %v399_v49 }
 0x107   : > { %739 = vst [vmem:[%s919_s10 + $0x10] sm:$0xff] %v711_v51   ;;  %v496_v56 = vadd.f32 %v783_v36, %v495_v52  ;;  %v533_v57 = vadd.f32 %v532_v50, %v518_v53 }
 0x108   : > { %743 = vst [vmem:[%s919_s10 + $0x30] sm:$0xff] %v731_v54  }
 0x109   : > { %v534_v59 = vadd.f32 %v533_v57, %v519_v55  ;;  %v497_v60 = vadd.f32 %v784_v44, %v496_v56 }
 0x10b   : > { %v498_v62 = vadd.f32 %v497_v60, %v380_v19  ;;  %v535_v63 = vadd.f32 %v534_v59, %v520_v58  ;;  %v528_v19 = vmul.f32 %v792_v45, %v792_v45 }
 0x10d   : > { %v536_v0 = vadd.f32 %v535_v63, %v521_v61  ;;  %v499_v1 = vadd.f32 %v498_v62, %v383_v26 }
 0x10f   : > { %v500_v4 = vadd.f32 %v787_v17, %v499_v1  ;;  %v537_v5 = vadd.f32 %v536_v0, %v522_v2 }
 0x111   : > { %v538_v7 = vadd.f32 %v537_v5, %v523_v3  ;;  %v501_v8 = vadd.f32 %v788_v21, %v500_v4 }
 0x113   : > { %v502_v10 = vadd.f32 %v501_v8, %v396_v40  ;;  %v539_v11 = vadd.f32 %v538_v7, %v524_v6 }
 0x115   : > { %v540_v12 = vadd.f32 %v539_v11, %v525_v9  ;;  %v503_v13 = vadd.f32 %v502_v10, %v399_v49 }
 0x117   : > { %v504_v16 = vadd.f32 %v791_v38, %v503_v13  ;;  %v541_v18 = vadd.f32 %v540_v12, %v526_v14 }
 0x119   : > { %v505_v20 = vadd.f32 %v792_v45, %v504_v16  ;;  %v542_v22 = vadd.f32 %v541_v18, %v527_v15 }
 0x11b   : > { %v506_v23 = vrot.slane %v505_v20, 4  ;;  %v543_v17 = vadd.f32 %v542_v22, %v528_v19 }
 0x11d   : > { %v507_v24 = vadd.f32 %v506_v23, %v505_v20  ;;  %v544_v25 = vrot.slane %v543_v17, 4 }
 0x11f   : > { %v508_v21 = vrot.slane %v507_v24, 2  ;;  %v545_v26 = vadd.f32 %v544_v25, %v543_v17 }
 0x121   : > { %v509_v27 = vadd.f32 %v508_v21, %v507_v24  ;;  %v546_v28 = vrot.slane %v545_v26, 2 }
 0x123   : > { %v510_v29 = vrot.slane %v509_v27, 1  ;;  %v547_v30 = vadd.f32 %v546_v28, %v545_v26 }
 0x125   : > { %v511_v31 = vadd.f32 %v510_v29, %v509_v27  ;;  %v548_v32 = vrot.slane %v547_v30, 1 }
 0x127   : > { %512 = vst [vmem:[%s184_s16] sm:$0x1] %v511_v31  ;;  %v549_v33 = vadd.f32 %v548_v32, %v547_v30 }
 0x129   : > { %550 = vst [vmem:[%s184_s16 + $0x1] sm:$0x1] %v549_v33 }
 0x12a PF: > { %s14_s12 = sadd.s32 1, %s839_s12  }
 0x12b   : > { %p11_p5 = scmp.ge.s32.totalorder %s14_s12, 6  }
 0x12d   :  { %13 = sbr.rel (!%p11_p5) target bundleno = 1 (0x1), region = 70 }

// kernel: residual_block_forward.7
= control target key start
LH: loop header
LB: loop body
LE: loop exit
PB: predicated region body
PF: predicated region fallthrough
CT: control target
= control target key end

     0   :  { %s639_s18 = smov 0   ;;  %s764_s0 = inlined_call_operand.vmem [shape: bf16[512,128], index: 0, kind: input, shape index: {}]   ;;  %s765_s1 = inlined_call_operand.vmem [shape: bf16[512,128], index: 1, kind: input, shape index: {}]   ;;  %s766_s2 = inlined_call_operand.vmem [shape: f32[1,128], index: 2, kind: input, shape index: {}]   ;;  %s767_s3 = inlined_call_operand.vmem [shape: f32[1,128], index: 3, kind: input, shape index: {}]   ;;  %s768_s4 = inlined_call_operand.vmem [shape: f32[1,128], index: 4, kind: input, shape index: {}]   ;;  %s769_s5 = inlined_call_operand.vmem [shape: f32[512,128], index: 5, kind: output, shape index: {}]  }
   0x1 LB: > { %s499_s19 = sadd.s32 4294967295, %s607_s18   ;;  %p503_p0 = scmp.ge.s32.totalorder %s607_s18, 1  ;;  %s607_s18 = sphi %s639_s18, %s15_s18  }
   0x2   : > { %p199_p1 = scmp.lt.s32.totalorder %s607_s18, 5 }
   0x4   : > { %p200_p2 = pnand %p503_p0, %p199_p1 }
   0x5   : > { %s504_s20 = sshll.u32 (!%p200_p2), %s499_s19, 4  ;;  %v663_v0 = vld [vmem:[%s766_s2] ss:$0 sm:$0xff] (!%p200_p2) }
   0x6   : > { %203 = sbr.rel (%p200_p2) target bundleno = 52 (0x34), region = 40  ;;  %p233_p3 = scmp.lt.s32.totalorder (!%p200_p2), %s504_s20, 63  ;;  %v668_v1 = vld [vmem:[%s767_s3] ss:$0 sm:$0xff] (!%p200_p2) }
   0x7   : > { %v683_v20 = vld [vmem:[%s768_s4] ss:$0 sm:$0xff] (!%p200_p2) }
   0xd   : > { %s771_s20 = smov (!%p233_p3, %s504_s20), 63 }
   0xe   : > { %s505_s21 = sshll.u32 %s771_s20, 2  ;;  %s509_s9 = sshll.u32 %s771_s20, 3 }
   0xf   : > { %s653_s24 = scalar_lea.vmem %s764_s0, %s505_s21  ;;  %s658_s27 = scalar_lea.vmem %s765_s1, %s505_s21 }
  0x10   : > { %v516_v2 = vld [vmem:[%s653_s24] sm:$0xff]   ;;  %v579_v4 = vld [vmem:[%s653_s24 + $0x8] sm:$0xff]   ;;  %v580_v14 = vld [vmem:[%s653_s24 + $0x10] sm:$0xff]   ;;  %s699_s12 = scalar_lea.vmem %s769_s5, %s509_s9 }
  0x11   : > { %v548_v3 = vld [vmem:[%s658_s27] sm:$0xff]   ;;  %v517_v5 = vunpack.c.l.bf16 %v516_v2  ;;  %v518_v7 = vunpack.c.h.bf16 %v516_v2  ;;  %v586_v9 = vld [vmem:[%s658_s27 + $0x8] sm:$0xff]   ;;  %v521_v10 = vunpack.c.l.bf16 %v579_v4  ;;  %v522_v12 = vunpack.c.h.bf16 %v579_v4  ;;  %v587_v15 = vld [vmem:[%s658_s27 + $0x10] sm:$0xff]  }
  0x12   : > { %v549_v6 = vunpack.c.l.bf16 %v548_v3  ;;  %v550_v8 = vunpack.c.h.bf16 %v548_v3  ;;  %v553_v11 = vunpack.c.l.bf16 %v586_v9  ;;  %v554_v13 = vunpack.c.h.bf16 %v586_v9  ;;  %v581_v33 = vld [vmem:[%s653_s24 + $0x18] sm:$0xff]   ;;  %v582_v47 = vld [vmem:[%s653_s24 + $0x20] sm:$0xff]   ;;  %v583_v61 = vld [vmem:[%s653_s24 + $0x28] sm:$0xff]  }
  0x13   : > { %v289_v16 = vmul.f32 %v517_v5, %v663_v0  ;;  %v290_v18 = vmul.f32 %v518_v7, %v663_v0  ;;  %v291_v21 = vmul.f32 %v521_v10, %v663_v0  ;;  %v292_v23 = vmul.f32 %v522_v12, %v663_v0  ;;  %v588_v38 = vld [vmem:[%s658_s27 + $0x18] sm:$0xff]   ;;  %v589_v48 = vld [vmem:[%s658_s27 + $0x20] sm:$0xff]   ;;  %v590_v4 = vld [vmem:[%s658_s27 + $0x28] sm:$0xff]  }
  0x14   : > { %v344_v17 = vmul.f32 %v549_v6, %v668_v1  ;;  %v345_v19 = vmul.f32 %v550_v8, %v668_v1  ;;  %v346_v22 = vmul.f32 %v553_v11, %v668_v1  ;;  %v347_v24 = vmul.f32 %v554_v13, %v668_v1 }
  0x15   : > { %v525_v27 = vunpack.c.l.bf16 %v580_v14  ;;  %v557_v28 = vunpack.c.l.bf16 %v587_v15  ;;  %v526_v31 = vunpack.c.h.bf16 %v580_v14  ;;  %v558_v32 = vunpack.c.h.bf16 %v587_v15 }
  0x16   : > { %v360_v25 = vadd.f32 %v344_v17, %v289_v16  ;;  %v361_v26 = vadd.f32 %v345_v19, %v290_v18  ;;  %v362_v29 = vadd.f32 %v346_v22, %v291_v21  ;;  %v363_v30 = vadd.f32 %v347_v24, %v292_v23  ;;  %v584_v17 = vld [vmem:[%s653_s24 + $0x30] sm:$0xff]  }
  0x17   : > { %v293_v36 = vmul.f32 %v525_v27, %v663_v0  ;;  %v348_v37 = vmul.f32 %v557_v28, %v668_v1  ;;  %v294_v41 = vmul.f32 %v526_v31, %v663_v0  ;;  %v349_v42 = vmul.f32 %v558_v32, %v668_v1  ;;  %v591_v23 = vld [vmem:[%s658_s27 + $0x30] sm:$0xff]   ;;  %v585_v32 = vld [vmem:[%s653_s24 + $0x38] sm:$0xff]  }
  0x18   : > { %v383_v34 = vadd.f32 %v683_v20, %v360_v25  ;;  %v384_v35 = vadd.f32 %v683_v20, %v361_v26  ;;  %v385_v39 = vadd.f32 %v683_v20, %v362_v29  ;;  %v386_v40 = vadd.f32 %v683_v20, %v363_v30 }
  0x19   : > { %v364_v45 = vadd.f32 %v348_v37, %v293_v36  ;;  %v529_v46 = vunpack.c.l.bf16 %v581_v33  ;;  %v365_v51 = vadd.f32 %v349_v42, %v294_v41  ;;  %v561_v52 = vunpack.c.l.bf16 %v588_v38  ;;  %v592_v37 = vld [vmem:[%s658_s27 + $0x38] sm:$0xff]  }
  0x1a   : > { %v399_v43 = vmax.f32 %v383_v34, 0.0  ;;  %v400_v44 = vmax.f32 %v384_v35, 0.0  ;;  %v401_v49 = vmax.f32 %v385_v39, 0.0  ;;  %v402_v50 = vmax.f32 %v386_v40, 0.0 }
  0x1b   : > { %v387_v53 = vadd.f32 %v683_v20, %v364_v45  ;;  %v295_v54 = vmul.f32 %v529_v46, %v663_v0  ;;  %v530_v55 = vunpack.c.h.bf16 %v581_v33  ;;  %v562_v56 = vunpack.c.h.bf16 %v588_v38 }
  0x1c   : > { %415 = vst [vmem:[%s699_s12] sm:$0xff] %v399_v43  ;;  %416 = vst [vmem:[%s699_s12 + $0x8] sm:$0xff] %v400_v44  ;;  %v388_v57 = vadd.f32 %v683_v20, %v365_v51  ;;  %v350_v58 = vmul.f32 %v561_v52, %v668_v1  ;;  %v533_v59 = vunpack.c.l.bf16 %v582_v47  ;;  %v565_v60 = vunpack.c.l.bf16 %v589_v48 }
  0x1d   : > { %417 = vst [vmem:[%s699_s12 + $0x10] sm:$0xff] %v401_v49  ;;  %418 = vst [vmem:[%s699_s12 + $0x18] sm:$0xff] %v402_v50  ;;  %v403_v62 = vmax.f32 %v387_v53, 0.0  ;;  %v296_v63 = vmul.f32 %v530_v55, %v663_v0  ;;  %v351_v2 = vmul.f32 %v562_v56, %v668_v1  ;;  %v534_v3 = vunpack.c.h.bf16 %v582_v47 }
  0x1e   : > { %v404_v5 = vmax.f32 %v388_v57, 0.0  ;;  %v366_v6 = vadd.f32 %v350_v58, %v295_v54  ;;  %v297_v7 = vmul.f32 %v533_v59, %v663_v0  ;;  %v352_v8 = vmul.f32 %v565_v60, %v668_v1 }
  0x1f   : > { %419 = vst [vmem:[%s699_s12 + $0x20] sm:$0xff] %v403_v62  ;;  %v367_v9 = vadd.f32 %v351_v2, %v296_v63  ;;  %v298_v10 = vmul.f32 %v534_v3, %v663_v0  ;;  %v566_v11 = vunpack.c.h.bf16 %v589_v48  ;;  %v537_v12 = vunpack.c.l.bf16 %v583_v61 }
  0x20   : > { %420 = vst [vmem:[%s699_s12 + $0x28] sm:$0xff] %v404_v5  ;;  %v389_v13 = vadd.f32 %v683_v20, %v366_v6  ;;  %v368_v14 = vadd.f32 %v352_v8, %v297_v7  ;;  %v569_v15 = vunpack.c.l.bf16 %v590_v4  ;;  %v538_v16 = vunpack.c.h.bf16 %v583_v61 }
  0x21   : > { %v390_v18 = vadd.f32 %v683_v20, %v367_v9  ;;  %v353_v19 = vmul.f32 %v566_v11, %v668_v1  ;;  %v299_v21 = vmul.f32 %v537_v12, %v663_v0  ;;  %v570_v22 = vunpack.c.h.bf16 %v590_v4 }
  0x22   : > { %v405_v24 = vmax.f32 %v389_v13, 0.0  ;;  %v391_v25 = vadd.f32 %v683_v20, %v368_v14  ;;  %v354_v26 = vmul.f32 %v569_v15, %v668_v1  ;;  %v300_v27 = vmul.f32 %v538_v16, %v663_v0 }
  0x23   : > { %v406_v28 = vmax.f32 %v390_v18, 0.0  ;;  %v369_v29 = vadd.f32 %v353_v19, %v298_v10  ;;  %v355_v30 = vmul.f32 %v570_v22, %v668_v1  ;;  %v541_v31 = vunpack.c.l.bf16 %v584_v17 }
  0x24   : > { %421 = vst [vmem:[%s699_s12 + $0x30] sm:$0xff] %v405_v24  ;;  %v407_v33 = vmax.f32 %v391_v25, 0.0  ;;  %v370_v34 = vadd.f32 %v354_v26, %v299_v21  ;;  %v573_v35 = vunpack.c.l.bf16 %v591_v23  ;;  %v542_v36 = vunpack.c.h.bf16 %v584_v17 }
  0x25   : > { %422 = vst [vmem:[%s699_s12 + $0x38] sm:$0xff] %v406_v28  ;;  %v392_v38 = vadd.f32 %v683_v20, %v369_v29  ;;  %v371_v39 = vadd.f32 %v355_v30, %v300_v27  ;;  %v301_v40 = vmul.f32 %v541_v31, %v663_v0  ;;  %v574_v41 = vunpack.c.h.bf16 %v591_v23 }
  0x26   : > { %423 = vst [vmem:[%s699_s12 + $0x40] sm:$0xff] %v407_v33  ;;  %v393_v42 = vadd.f32 %v683_v20, %v370_v34  ;;  %v356_v43 = vmul.f32 %v573_v35, %v668_v1  ;;  %v302_v44 = vmul.f32 %v542_v36, %v663_v0  ;;  %v545_v45 = vunpack.c.l.bf16 %v585_v32 }
  0x27   : > { %v408_v46 = vmax.f32 %v392_v38, 0.0  ;;  %v394_v47 = vadd.f32 %v683_v20, %v371_v39  ;;  %v357_v48 = vmul.f32 %v574_v41, %v668_v1  ;;  %v577_v49 = vunpack.c.l.bf16 %v592_v37 }
  0x28   : > { %v409_v50 = vmax.f32 %v393_v42, 0.0  ;;  %v372_v51 = vadd.f32 %v356_v43, %v301_v40  ;;  %v303_v52 = vmul.f32 %v545_v45, %v663_v0  ;;  %v546_v53 = vunpack.c.h.bf16 %v585_v32 }
  0x29   : > { %424 = vst [vmem:[%s699_s12 + $0x48] sm:$0xff] %v408_v46  ;;  %v410_v54 = vmax.f32 %v394_v47, 0.0  ;;  %v373_v55 = vadd.f32 %v357_v48, %v302_v44  ;;  %v358_v56 = vmul.f32 %v577_v49, %v668_v1  ;;  %v578_v57 = vunpack.c.h.bf16 %v592_v37 }
  0x2a   : > { %425 = vst [vmem:[%s699_s12 + $0x50] sm:$0xff] %v409_v50  ;;  %v395_v58 = vadd.f32 %v683_v20, %v372_v51  ;;  %v304_v59 = vmul.f32 %v546_v53, %v663_v0 }
  0x2b   : > { %426 = vst [vmem:[%s699_s12 + $0x58] sm:$0xff] %v410_v54  ;;  %v396_v60 = vadd.f32 %v683_v20, %v373_v55  ;;  %v374_v61 = vadd.f32 %v358_v56, %v303_v52  ;;  %v359_v62 = vmul.f32 %v578_v57, %v668_v1 }
  0x2c   : > { %v411_v63 = vmax.f32 %v395_v58, 0.0 }
  0x2d   : > { %v412_v2 = vmax.f32 %v396_v60, 0.0  ;;  %v397_v3 = vadd.f32 %v683_v20, %v374_v61  ;;  %v375_v4 = vadd.f32 %v359_v62, %v304_v59 }
  0x2e   : > { %427 = vst [vmem:[%s699_s12 + $0x60] sm:$0xff] %v411_v63 }
  0x2f   : > { %428 = vst [vmem:[%s699_s12 + $0x68] sm:$0xff] %v412_v2  ;;  %v413_v5 = vmax.f32 %v397_v3, 0.0  ;;  %v398_v6 = vadd.f32 %v683_v20, %v375_v4 }
  0x31   : > { %429 = vst [vmem:[%s699_s12 + $0x70] sm:$0xff] %v413_v5  ;;  %v414_v7 = vmax.f32 %v398_v6, 0.0 }
  0x33   : > { %430 = vst [vmem:[%s699_s12 + $0x78] sm:$0xff] %v414_v7 }
  0x34 PF: > { %s15_s18 = sadd.s32 1, %s607_s18  }
  0x35   : > { %p12_p4 = scmp.ge.s32.totalorder %s15_s18, 6  }
  0x37   :  { %14 = sbr.rel (!%p12_p4) target bundleno = 1 (0x1), region = 73 }

// kernel: residual_block_forward.6
= control target key start
LH: loop header
LB: loop body
LE: loop exit
PB: predicated region body
PF: predicated region fallthrough
CT: control target
= control target key end

     0   :  { %s1699_s27 = smov 0   ;;  %s1880_s0 = inlined_call_operand.vmem [shape: bf16[512,128], index: 0, kind: input, shape index: {}]   ;;  %s1881_s1 = inlined_call_operand.vmem [shape: bf16[512,128], index: 1, kind: input, shape index: {}]   ;;  %s1882_s2 = inlined_call_operand.vmem [shape: bf16[128,128], index: 2, kind: input, shape index: {}]   ;;  %s1883_s3 = inlined_call_operand.vmem [shape: bf16[128,128], index: 3, kind: input, shape index: {}]   ;;  %s1884_s4 = inlined_call_operand.vmem [shape: f32[1,128], index: 4, kind: input, shape index: {}]   ;;  %s1885_s5 = inlined_call_operand.vmem [shape: f32[1,128], index: 5, kind: input, shape index: {}]   ;;  %s1886_s6 = inlined_call_operand.vmem [shape: bf16[512,128], index: 6, kind: output, shape index: {0}]   ;;  %s1887_s7 = inlined_call_operand.vmem [shape: bf16[512,128], index: 7, kind: output, shape index: {1}]   ;;  %s1888_s8 = inlined_call_operand.vmem [shape: f32[4,8,128], index: 8, kind: output, shape index: {2}]  }
   0x1 LB: > { %s1705_s28 = sadd.s32 4294967295, %s1652_s27   ;;  %p1283_p0 = scmp.ge.s32.totalorder %s1652_s27, 1  ;;  %s1652_s27 = sphi %s1699_s27, %s19_s27  }
   0x2   : > { %p279_p1 = scmp.lt.s32.totalorder %s1652_s27, 5 }
   0x4   : > { %p280_p2 = pnand %p1283_p0, %p279_p1 }
   0x5   : > { %v1622_v0 = vld [vmem:[%s1882_s2] sm:$0xff] (!%p280_p2)   ;;  %s1284_s9 = sshll.u32 (!%p280_p2), %s1705_s28, 4  ;;  %v1624_v2 = vld [vmem:[%s1882_s2 + $0x8] sm:$0xff] (!%p280_p2)   ;;  %v1626_v4 = vld [vmem:[%s1882_s2 + $0x10] sm:$0xff] (!%p280_p2)   ;;  %p351_p4 = scmp.lt.s32.totalorder (!%p280_p2), %s1705_s28, 3 }
   0x6   : > { %283 = sbr.rel (%p280_p2) target bundleno = 304 (0x130), region = 44  ;;  %v1623_v1 = vld [vmem:[%s1883_s3] sm:$0xff] (!%p280_p2)   ;;  %1550 = vmatprep.subr.bf16.mxu0 (!%p280_p2), %v1622_v0  ;;  %p328_p3 = scmp.lt.s32.totalorder (!%p280_p2), %s1284_s9, 63  ;;  %v1625_v3 = vld [vmem:[%s1883_s3 + $0x8] sm:$0xff] (!%p280_p2)   ;;  %v1627_v5 = vld [vmem:[%s1883_s3 + $0x10] sm:$0xff] (!%p280_p2)  }
   0x7   : > { %1582 = vmatprep.subr.bf16.mxu1 (!%p280_p2), %v1623_v1  ;;  %1551 = vmatpush3.bf16.msra.mxu0 (!%p280_p2), %v1622_v0  ;;  %v1628_v6 = vld [vmem:[%s1882_s2 + $0x18] sm:$0xff] (!%p280_p2)   ;;  %v1630_v8 = vld [vmem:[%s1882_s2 + $0x20] sm:$0xff] (!%p280_p2)   ;;  %v1632_v10 = vld [vmem:[%s1882_s2 + $0x28] sm:$0xff] (!%p280_p2)  }
   0x8   : > { %1583 = vmatpush3.bf16.msra.mxu1 (!%p280_p2), %v1623_v1  ;;  %1552 = vmatprep.subr.bf16.mxu0 (!%p280_p2), %v1624_v2  ;;  %v1629_v7 = vld [vmem:[%s1883_s3 + $0x18] sm:$0xff] (!%p280_p2)   ;;  %v1631_v9 = vld [vmem:[%s1883_s3 + $0x20] sm:$0xff] (!%p280_p2)   ;;  %v1633_v11 = vld [vmem:[%s1883_s3 + $0x28] sm:$0xff] (!%p280_p2)  }
   0x9   : > { %1584 = vmatprep.subr.bf16.mxu1 (!%p280_p2), %v1625_v3  ;;  %v1764_v13 = vld [vmem:[%s1884_s4] ss:$0 sm:$0xff] (!%p280_p2)  ;;  %v1634_v24 = vld [vmem:[%s1882_s2 + $0x30] sm:$0xff] (!%p280_p2)   ;;  %v1636_v36 = vld [vmem:[%s1882_s2 + $0x38] sm:$0xff] (!%p280_p2)  }
   0xa   : > { %v1769_v14 = vld [vmem:[%s1885_s5] ss:$0 sm:$0xff] (!%p280_p2)  ;;  %v1635_v27 = vld [vmem:[%s1883_s3 + $0x30] sm:$0xff] (!%p280_p2)   ;;  %v1637_v38 = vld [vmem:[%s1883_s3 + $0x38] sm:$0xff] (!%p280_p2)  }
   0xb   : > { %1553 = vmatpush3.bf16.msra.mxu0 (!%p280_p2), %v1624_v2 }
   0xc   : > { %1585 = vmatpush3.bf16.msra.mxu1 (!%p280_p2), %v1625_v3  ;;  %1554 = vmatprep.subr.bf16.mxu0 (!%p280_p2), %v1626_v4 }
   0xd   : > { %s1890_s9 = smov (!%p328_p3, %s1284_s9), 63  ;;  %1586 = vmatprep.subr.bf16.mxu1 %v1627_v5  ;;  %s1892_s28 = smov (!%p351_p4, %s1705_s28), 3 }
   0xe   : > { %s1734_s24 = sshll.u32 %s1890_s9, 2 }
   0xf   : > { %1555 = vmatpush3.bf16.msra.mxu0 %v1626_v4  ;;  %s1746_s12 = scalar_lea.vmem %s1880_s0, %s1734_s24  ;;  %s1755_s16 = scalar_lea.vmem %s1881_s1, %s1734_s24 }
  0x10   : > { %1587 = vmatpush3.bf16.msra.mxu1 %v1627_v5  ;;  %1556 = vmatprep.subr.bf16.mxu0 %v1628_v6  ;;  %v1386_v12 = vld [vmem:[%s1746_s12] sm:$0xff]   ;;  %v1497_v18 = vld [vmem:[%s1746_s12 + $0x8] sm:$0xff]   ;;  %v1498_v23 = vld [vmem:[%s1746_s12 + $0x10] sm:$0xff]   ;;  %s1834_s14 = scalar_lea.vmem %s1886_s6, %s1734_s24 }
  0x11   : > { %1588 = vmatprep.subr.bf16.mxu1 %v1629_v7  ;;  %v1387_v15 = vunpack.c.l.bf16 %v1386_v12  ;;  %v1388_v16 = vunpack.c.h.bf16 %v1386_v12  ;;  %v1638_v17 = vld [vmem:[%s1755_s16] sm:$0xff]   ;;  %v1391_v21 = vunpack.c.l.bf16 %v1497_v18  ;;  %v1392_v22 = vunpack.c.h.bf16 %v1497_v18  ;;  %v1499_v35 = vld [vmem:[%s1746_s12 + $0x18] sm:$0xff]   ;;  %v1639_v50 = vld [vmem:[%s1755_s16 + $0x8] sm:$0xff]  }
  0x12   : > { %1598 = vmatprep.mubr.bf16.mxu1 %v1638_v17  ;;  %v1395_v25 = vunpack.c.l.bf16 %v1498_v23  ;;  %v1396_v26 = vunpack.c.h.bf16 %v1498_v23  ;;  %v1500_v37 = vld [vmem:[%s1746_s12 + $0x20] sm:$0xff]   ;;  %v1399_v41 = vunpack.c.l.bf16 %v1499_v35  ;;  %v1400_v42 = vunpack.c.h.bf16 %v1499_v35  ;;  %v1501_v54 = vld [vmem:[%s1746_s12 + $0x28] sm:$0xff]   ;;  %v1640_v55 = vld [vmem:[%s1755_s16 + $0x10] sm:$0xff]  }
  0x13   : > { %1557 = vmatpush3.bf16.msra.mxu0 %v1628_v6  ;;  %v395_v19 = vmul.f32 %v1387_v15, %v1764_v13  ;;  %v396_v20 = vmul.f32 %v1388_v16, %v1764_v13  ;;  %v397_v30 = vmul.f32 %v1391_v21, %v1764_v13  ;;  %v398_v31 = vmul.f32 %v1392_v22, %v1764_v13  ;;  %v1502_v56 = vld [vmem:[%s1746_s12 + $0x30] sm:$0xff]   ;;  %v1641_v4 = vld [vmem:[%s1755_s16 + $0x18] sm:$0xff]   ;;  %v1643_v21 = vld [vmem:[%s1755_s16 + $0x28] sm:$0xff]  }
  0x14   : > { %1589 = vmatpush3.bf16.msra.mxu1 %v1629_v7  ;;  %1558 = vmatprep.subr.bf16.mxu0 %v1630_v8  ;;  %v399_v33 = vmul.f32 %v1395_v25, %v1764_v13  ;;  %v400_v34 = vmul.f32 %v1396_v26, %v1764_v13  ;;  %v1403_v45 = vunpack.c.l.bf16 %v1500_v37  ;;  %v1404_v46 = vunpack.c.h.bf16 %v1500_v37  ;;  %v1644_v23 = vld [vmem:[%s1755_s16 + $0x30] sm:$0xff]  }
  0x15   : > { %1590 = vmatprep.subr.bf16.mxu1 %v1631_v9  ;;  %v418_v28 = vadd.f32 %v1769_v14, %v395_v19  ;;  %v419_v29 = vadd.f32 %v1769_v14, %v396_v20  ;;  %v420_v39 = vadd.f32 %v1769_v14, %v397_v30  ;;  %v421_v40 = vadd.f32 %v1769_v14, %v398_v31 }
  0x16   : > { %v422_v43 = vadd.f32 %v1769_v14, %v399_v33  ;;  %v423_v44 = vadd.f32 %v1769_v14, %v400_v34  ;;  %v401_v48 = vmul.f32 %v1399_v41, %v1764_v13  ;;  %v402_v49 = vmul.f32 %v1400_v42, %v1764_v13 }
  0x17   : > { %1559 = vmatpush3.bf16.msra.mxu0 %v1630_v8  ;;  %v434_v32 = vpack.c.bf16 %v419_v29, %v418_v28  ;;  %v435_v47 = vpack.c.bf16 %v421_v40, %v420_v39  ;;  %v403_v52 = vmul.f32 %v1403_v45, %v1764_v13  ;;  %v404_v53 = vmul.f32 %v1404_v46, %v1764_v13  ;;  %v1503_v8 = vld [vmem:[%s1746_s12 + $0x38] sm:$0xff]  }
  0x18   : > { %1591 = vmatpush3.bf16.msra.mxu1 %v1631_v9  ;;  %1560 = vmatprep.subr.bf16.mxu0 %v1632_v10  ;;  %v436_v51 = vpack.c.bf16 %v423_v44, %v422_v43  ;;  %v424_v57 = vadd.f32 %v1769_v14, %v401_v48  ;;  %v425_v58 = vadd.f32 %v1769_v14, %v402_v49  ;;  %v1407_v59 = vunpack.c.l.bf16 %v1501_v54  ;;  %v1642_v9 = vld [vmem:[%s1755_s16 + $0x20] sm:$0xff]  }
  0x19   : > { %1592 = vmatprep.subr.bf16.mxu1 %v1633_v11  ;;  %1566 = vmatprep.mubr.bf16.mxu0 %v434_v32  ;;  %v1408_v60 = vunpack.c.h.bf16 %v1501_v54  ;;  %v426_v61 = vadd.f32 %v1769_v14, %v403_v52  ;;  %v427_v62 = vadd.f32 %v1769_v14, %v404_v53  ;;  %v1411_v63 = vunpack.c.l.bf16 %v1502_v56 }
  0x1a   : > { %v1412_v0 = vunpack.c.h.bf16 %v1502_v56  ;;  %v437_v1 = vpack.c.bf16 %v425_v58, %v424_v57  ;;  %v405_v2 = vmul.f32 %v1407_v59, %v1764_v13  ;;  %v1415_v12 = vunpack.c.l.bf16 %v1503_v8 }
  0x1b   : > { %1561 = vmatpush3.bf16.msra.mxu0 %v1632_v10  ;;  %v406_v3 = vmul.f32 %v1408_v60, %v1764_v13  ;;  %v438_v5 = vpack.c.bf16 %v427_v62, %v426_v61  ;;  %v407_v6 = vmul.f32 %v1411_v63, %v1764_v13  ;;  %v1416_v15 = vunpack.c.h.bf16 %v1503_v8 }
  0x1c   : > { %1593 = vmatpush3.bf16.msra.mxu1 %v1633_v11  ;;  %1562 = vmatprep.subr.bf16.mxu0 %v1634_v24  ;;  %v408_v7 = vmul.f32 %v1412_v0, %v1764_v13  ;;  %v428_v10 = vadd.f32 %v1769_v14, %v405_v2  ;;  %v409_v19 = vmul.f32 %v1415_v12, %v1764_v13 }
  0x1d   : > { %1594 = vmatprep.subr.bf16.mxu1 %v1635_v27  ;;  %v429_v11 = vadd.f32 %v1769_v14, %v406_v3  ;;  %v430_v16 = vadd.f32 %v1769_v14, %v407_v6  ;;  %v410_v20 = vmul.f32 %v1416_v15, %v1764_v13 }
  0x1e   : > { %v431_v17 = vadd.f32 %v1769_v14, %v408_v7 }
  0x1f   : > { %1563 = vmatpush3.bf16.msra.mxu0 %v1634_v24  ;;  %v439_v18 = vpack.c.bf16 %v429_v11, %v428_v10  ;;  %v432_v24 = vadd.f32 %v1769_v14, %v409_v19  ;;  %v433_v25 = vadd.f32 %v1769_v14, %v410_v20 }
  0x20   : > { %1595 = vmatpush3.bf16.msra.mxu1 %v1635_v27  ;;  %1564 = vmatprep.subr.bf16.mxu0 %v1636_v36  ;;  %v440_v22 = vpack.c.bf16 %v431_v17, %v430_v16  ;;  %v1645_v27 = vld [vmem:[%s1755_s16 + $0x38] sm:$0xff]   ;;  %s1840_s16 = scalar_lea.vmem %s1887_s7, %s1734_s24  ;;  %s1292_s24 = sshll.u32 %s1892_s28, 3 }
  0x21   : > { %1596 = vmatprep.subr.bf16.mxu1 %v1637_v38  ;;  %v441_v26 = vpack.c.bf16 %v433_v25, %v432_v24  ;;  %s354_s20 = scalar_lea.vmem %s1888_s8, %s1292_s24 }
  0x23   : > { %1565 = vmatpush3.bf16.msra.mxu0 %v1636_v36 }
  0x24   : > { %1597 = vmatpush3.bf16.msra.mxu1 %v1637_v38 }
  0x26   : > { %1567 = vmatmul.mubr.bf16.vlgmr.msra.gmra.mrb[0].mxu0 %v435_v47 }
  0x27   : > { %1599 = vmatmul.mubr.bf16.vlgmr.msra.gmra.mrb[0].mxu1 %v1639_v50  ;;  %1570 = vmatprep.mubr.bf16.mxu0 %v436_v51 }
  0x28   : > { %1602 = vmatprep.mubr.bf16.mxu1 %v1640_v55 }
  0x2e   : > { %1571 = vmatmul.mubr.bf16.gmra.mrb[4].mxu0 %v437_v1 }
  0x2f   : > { %1603 = vmatmul.mubr.bf16.gmra.mrb[4].mxu1 %v1641_v4  ;;  %1574 = vmatprep.mubr.bf16.mxu0 %v438_v5 }
  0x30   : > { %1606 = vmatprep.mubr.bf16.mxu1 %v1642_v9 }
  0x36   : > { %1575 = vmatmul.mubr.bf16.gmra.mrb[8].mxu0 %v439_v18 }
  0x37   : > { %1607 = vmatmul.mubr.bf16.gmra.mrb[8].mxu1 %v1643_v21  ;;  %1578 = vmatprep.mubr.bf16.mxu0 %v440_v22 }
  0x38   : > { %1610 = vmatprep.mubr.bf16.mxu1 %v1644_v23 }
  0x3e   : > { %1579 = vmatmul.mubr.bf16.gmra.mrb[12].mxu0 %v441_v26 }
  0x3f   : > { %1611 = vmatmul.mubr.bf16.gmra.mrb[12].mxu1 %v1645_v27 }
  0xf9   : > { %v1568_v28 = vpop.f32.mrb[0].mxu0 }
  0xfa   : > { %v1600_v29 = vpop.f32.mrb[0].mxu1  ;;  %v540_v13 = vpop.f32.mrb[1].mxu0  ;;  %v1012_v48 = vmul.f32 %v1568_v28, %v1568_v28 }
  0xfb   : > { %v1110_v30 = vmul.f32 %v1600_v29, %v1568_v28  ;;  %v765_v31 = vpop.f32.mrb[1].mxu1  ;;  %v1569_v14 = vpop.f32.mrb[2].mxu0  ;;  %v1010_v36 = vmul.f32 %v540_v13, %v540_v13  ;;  %v1072_v52 = vmul.f32 %v1600_v29, %v1600_v29 }
  0xfc   : > { %v1108_v32 = vmul.f32 %v765_v31, %v540_v13  ;;  %v1425_v33 = vpack.c.bf16 %v1569_v14, %v1568_v28  ;;  %v1601_v34 = vpop.f32.mrb[2].mxu1  ;;  %v543_v35 = vpop.f32.mrb[3].mxu0  ;;  %v1070_v45 = vmul.f32 %v765_v31, %v765_v31  ;;  %v1013_v56 = vmul.f32 %v1569_v14, %v1569_v14 }
  0xfd   : > { %v1465_v37 = vpack.c.bf16 %v1601_v34, %v1600_v29  ;;  %v1111_v38 = vmul.f32 %v1601_v34, %v1569_v14  ;;  %v1420_v39 = vpack.c.bf16 %v543_v35, %v540_v13  ;;  %v768_v40 = vpop.f32.mrb[3].mxu1  ;;  %v988_v41 = vadd.f32 %v543_v35, %v540_v13 }
  0xfe   : > { %1504 = vst [vmem:[%s1834_s14 + $0x8] sm:$0xff] %v1425_v33   ;;  %v1011_v42 = vmul.f32 %v543_v35, %v543_v35  ;;  %v1460_v43 = vpack.c.bf16 %v768_v40, %v765_v31  ;;  %v1048_v44 = vadd.f32 %v768_v40, %v765_v31  ;;  %v1071_v46 = vmul.f32 %v768_v40, %v768_v40 }
  0xff   : > { %1511 = vst [vmem:[%s1840_s16 + $0x8] sm:$0xff] %v1465_v37   ;;  %1421 = vst [vmem:[%s1834_s14] sm:$0xff] %v1420_v39   ;;  %v1109_v47 = vmul.f32 %v768_v40, %v543_v35  ;;  %v989_v49 = vadd.f32 %v1568_v28, %v988_v41  ;;  %v1073_v62 = vmul.f32 %v1601_v34, %v1601_v34 }
 0x100   : > { %v1026_v50 = vadd.f32 %v1011_v42, %v1010_v36  ;;  %1461 = vst [vmem:[%s1840_s16] sm:$0xff] %v1460_v43   ;;  %v1049_v51 = vadd.f32 %v1600_v29, %v1048_v44  ;;  %v1086_v53 = vadd.f32 %v1071_v46, %v1070_v45 }
 0x101   : > { %v1124_v54 = vadd.f32 %v1109_v47, %v1108_v32  ;;  %v1572_v55 = vpop.f32.mrb[4].mxu0  ;;  %v990_v60 = vadd.f32 %v1569_v14, %v989_v49 }
 0x102   : > { %v1027_v57 = vadd.f32 %v1026_v50, %v1012_v48  ;;  %v1604_v58 = vpop.f32.mrb[4].mxu1  ;;  %v556_v59 = vpop.f32.mrb[5].mxu0  ;;  %v1050_v61 = vadd.f32 %v1601_v34, %v1049_v51  ;;  %v1087_v63 = vadd.f32 %v1086_v53, %v1072_v52  ;;  %v1016_v27 = vmul.f32 %v1572_v55, %v1572_v55 }
 0x103   : > { %v1125_v0 = vadd.f32 %v1124_v54, %v1110_v30  ;;  %v1114_v1 = vmul.f32 %v1604_v58, %v1572_v55  ;;  %v781_v2 = vpop.f32.mrb[5].mxu1  ;;  %v1573_v3 = vpop.f32.mrb[6].mxu0  ;;  %v991_v4 = vadd.f32 %v990_v60, %v556_v59  ;;  %v1014_v5 = vmul.f32 %v556_v59, %v556_v59 }
 0x104   : > { %v1028_v6 = vadd.f32 %v1027_v57, %v1013_v56  ;;  %v1051_v7 = vadd.f32 %v1050_v61, %v781_v2  ;;  %v1605_v8 = vpop.f32.mrb[6].mxu1  ;;  %v559_v9 = vpop.f32.mrb[7].mxu0  ;;  %v1074_v10 = vmul.f32 %v781_v2, %v781_v2  ;;  %v1088_v11 = vadd.f32 %v1087_v63, %v1073_v62 }
 0x105   : > { %v1112_v12 = vmul.f32 %v781_v2, %v556_v59  ;;  %v1126_v15 = vadd.f32 %v1125_v0, %v1111_v38  ;;  %v784_v16 = vpop.f32.mrb[7].mxu1  ;;  %v1435_v18 = vpack.c.bf16 %v1573_v3, %v1572_v55  ;;  %v1475_v19 = vpack.c.bf16 %v1605_v8, %v1604_v58 }
 0x106   : > { %v1029_v17 = vadd.f32 %v1028_v6, %v1014_v5  ;;  %v1089_v20 = vadd.f32 %v1088_v11, %v1074_v10  ;;  %v1115_v22 = vmul.f32 %v1605_v8, %v1573_v3  ;;  %v1430_v23 = vpack.c.bf16 %v559_v9, %v556_v59 }
 0x107   : > { %v1127_v21 = vadd.f32 %v1126_v15, %v1112_v12  ;;  %1506 = vst [vmem:[%s1834_s14 + $0x18] sm:$0xff] %v1435_v18   ;;  %1513 = vst [vmem:[%s1840_s16 + $0x18] sm:$0xff] %v1475_v19   ;;  %v992_v24 = vadd.f32 %v991_v4, %v559_v9  ;;  %v1015_v25 = vmul.f32 %v559_v9, %v559_v9 }
 0x108   : > { %v1470_v26 = vpack.c.bf16 %v784_v16, %v781_v2  ;;  %v1052_v28 = vadd.f32 %v1051_v7, %v784_v16  ;;  %v1075_v29 = vmul.f32 %v784_v16, %v784_v16  ;;  %v1113_v13 = vmul.f32 %v784_v16, %v559_v9  ;;  %1505 = vst [vmem:[%s1834_s14 + $0x10] sm:$0xff] %v1430_v23  }
 0x109   : > { %v1576_v30 = vpop.f32.mrb[8].mxu0  ;;  %v1076_v31 = vmul.f32 %v1604_v58, %v1604_v58  ;;  %v1017_v14 = vmul.f32 %v1573_v3, %v1573_v3  ;;  %v993_v32 = vadd.f32 %v1572_v55, %v992_v24  ;;  %v1030_v33 = vadd.f32 %v1029_v17, %v1015_v25 }
 0x10a   : > { %1512 = vst [vmem:[%s1840_s16 + $0x10] sm:$0xff] %v1470_v26   ;;  %v1608_v34 = vpop.f32.mrb[8].mxu1  ;;  %v572_v35 = vpop.f32.mrb[9].mxu0  ;;  %v1077_v36 = vmul.f32 %v1605_v8, %v1605_v8  ;;  %v1053_v37 = vadd.f32 %v1604_v58, %v1052_v28  ;;  %v1090_v38 = vadd.f32 %v1089_v20, %v1075_v29  ;;  %v1128_v39 = vadd.f32 %v1127_v21, %v1113_v13 }
 0x10b   : > { %v797_v40 = vpop.f32.mrb[9].mxu1  ;;  %v1850_v41 = vpop.f32.mrb[10].mxu0  ;;  %v1031_v42 = vadd.f32 %v1030_v33, %v1016_v27  ;;  %v1118_v43 = vmul.f32 %v1608_v34, %v1576_v30  ;;  %v994_v44 = vadd.f32 %v1573_v3, %v993_v32  ;;  %v1018_v45 = vmul.f32 %v572_v35, %v572_v35 }
 0x10c   : > { %v1852_v46 = vpop.f32.mrb[10].mxu1  ;;  %v575_v47 = vpop.f32.mrb[11].mxu0  ;;  %v1091_v48 = vadd.f32 %v1090_v38, %v1076_v31  ;;  %v1129_v49 = vadd.f32 %v1128_v39, %v1114_v1  ;;  %v1054_v50 = vadd.f32 %v1605_v8, %v1053_v37  ;;  %v1078_v51 = vmul.f32 %v797_v40, %v797_v40 }
 0x10d   : > { %v800_v52 = vpop.f32.mrb[11].mxu1  ;;  %v995_v53 = vadd.f32 %v994_v44, %v572_v35  ;;  %v1032_v54 = vadd.f32 %v1031_v42, %v1017_v14  ;;  %v1116_v55 = vmul.f32 %v797_v40, %v572_v35  ;;  %v1445_v56 = vpack.c.bf16 %v1850_v41, %v1576_v30 }
 0x10e   : > { %v1055_v57 = vadd.f32 %v1054_v50, %v797_v40  ;;  %v1092_v58 = vadd.f32 %v1091_v48, %v1077_v36  ;;  %v1130_v59 = vadd.f32 %v1129_v49, %v1115_v22  ;;  %v1485_v61 = vpack.c.bf16 %v1852_v46, %v1608_v34 }
 0x10f   : > { %v1033_v60 = vadd.f32 %v1032_v54, %v1018_v45  ;;  %1508 = vst [vmem:[%s1834_s14 + $0x28] sm:$0xff] %v1445_v56   ;;  %v1119_v62 = vmul.f32 %v1852_v46, %v1850_v41  ;;  %v1440_v1 = vpack.c.bf16 %v575_v47, %v572_v35  ;;  %v996_v2 = vadd.f32 %v995_v53, %v575_v47 }
 0x110   : > { %v1093_v63 = vadd.f32 %v1092_v58, %v1078_v51  ;;  %v1131_v0 = vadd.f32 %v1130_v59, %v1116_v55  ;;  %1515 = vst [vmem:[%s1840_s16 + $0x28] sm:$0xff] %v1485_v61   ;;  %v1019_v4 = vmul.f32 %v575_v47, %v575_v47  ;;  %v1480_v5 = vpack.c.bf16 %v800_v52, %v797_v40 }
 0x111   : > { %v1580_v3 = vpop.f32.mrb[12].mxu0  ;;  %v1056_v6 = vadd.f32 %v1055_v57, %v800_v52  ;;  %v1079_v7 = vmul.f32 %v800_v52, %v800_v52  ;;  %v1020_v10 = vmul.f32 %v1576_v30, %v1576_v30  ;;  %v1080_v11 = vmul.f32 %v1608_v34, %v1608_v34  ;;  %1507 = vst [vmem:[%s1834_s14 + $0x20] sm:$0xff] %v1440_v1  }
 0x112   : > { %v1612_v8 = vpop.f32.mrb[12].mxu1  ;;  %v588_v9 = vpop.f32.mrb[13].mxu0  ;;  %v997_v12 = vadd.f32 %v1576_v30, %v996_v2  ;;  %v1117_v15 = vmul.f32 %v800_v52, %v575_v47  ;;  %v1034_v18 = vadd.f32 %v1033_v60, %v1019_v4  ;;  %1514 = vst [vmem:[%s1840_s16 + $0x20] sm:$0xff] %v1480_v5   ;;  %v1021_v24 = vmul.f32 %v1850_v41, %v1850_v41 }
 0x113   : > { %v813_v16 = vpop.f32.mrb[13].mxu1  ;;  %v1581_v17 = vpop.f32.mrb[14].mxu0  ;;  %v1057_v19 = vadd.f32 %v1608_v34, %v1056_v6  ;;  %v1094_v20 = vadd.f32 %v1093_v63, %v1079_v7  ;;  %v1122_v21 = vmul.f32 %v1612_v8, %v1580_v3  ;;  %v1081_v25 = vmul.f32 %v1852_v46, %v1852_v46 }
 0x114   : > { %v1613_v22 = vpop.f32.mrb[14].mxu1  ;;  %v591_v23 = vpop.f32.mrb[15].mxu0  ;;  %v1132_v26 = vadd.f32 %v1131_v0, %v1117_v15  ;;  %v1120_v27 = vmul.f32 %v813_v16, %v588_v9  ;;  %v1035_v29 = vadd.f32 %v1034_v18, %v1020_v10  ;;  %v1022_v30 = vmul.f32 %v588_v9, %v588_v9 }
 0x115   : > { %v816_v28 = vpop.f32.mrb[15].mxu1  ;;  %v1095_v13 = vadd.f32 %v1094_v20, %v1080_v11  ;;  %v1455_v31 = vpack.c.bf16 %v1581_v17, %v1580_v3  ;;  %v1082_v32 = vmul.f32 %v813_v16, %v813_v16  ;;  %v1495_v33 = vpack.c.bf16 %v1613_v22, %v1612_v8 }
 0x116   : > { %v1133_v14 = vadd.f32 %v1132_v26, %v1118_v43  ;;  %v1123_v34 = vmul.f32 %v1613_v22, %v1581_v17  ;;  %v1450_v35 = vpack.c.bf16 %v591_v23, %v588_v9  ;;  %v998_v36 = vadd.f32 %v1850_v41, %v997_v12 }
 0x117   : > { %1510 = vst [vmem:[%s1834_s14 + $0x38] sm:$0xff] %v1455_v31   ;;  %v1023_v37 = vmul.f32 %v591_v23, %v591_v23  ;;  %v1036_v38 = vadd.f32 %v1035_v29, %v1021_v24  ;;  %1517 = vst [vmem:[%s1840_s16 + $0x38] sm:$0xff] %v1495_v33   ;;  %v1490_v39 = vpack.c.bf16 %v816_v28, %v813_v16 }
 0x118   : > { %v1058_v40 = vadd.f32 %v1852_v46, %v1057_v19  ;;  %v1083_v42 = vmul.f32 %v816_v28, %v816_v28  ;;  %v1096_v44 = vadd.f32 %v1095_v13, %v1081_v25  ;;  %1509 = vst [vmem:[%s1834_s14 + $0x30] sm:$0xff] %v1450_v35   ;;  %v999_v45 = vadd.f32 %v998_v36, %v588_v9 }
 0x119   : > { %v1037_v47 = vadd.f32 %v1036_v38, %v1022_v30  ;;  %v1121_v43 = vmul.f32 %v816_v28, %v591_v23  ;;  %v1134_v48 = vadd.f32 %v1133_v14, %v1119_v62  ;;  %1516 = vst [vmem:[%s1840_s16 + $0x30] sm:$0xff] %v1490_v39   ;;  %v1024_v51 = vmul.f32 %v1580_v3, %v1580_v3 }
 0x11a   : > { %v1059_v49 = vadd.f32 %v1058_v40, %v813_v16  ;;  %v1097_v50 = vadd.f32 %v1096_v44, %v1082_v32  ;;  %v1000_v52 = vadd.f32 %v999_v45, %v591_v23  ;;  %v1084_v54 = vmul.f32 %v1612_v8, %v1612_v8 }
 0x11b   : > { %v1038_v41 = vadd.f32 %v1037_v47, %v1023_v37  ;;  %v1135_v53 = vadd.f32 %v1134_v48, %v1120_v27  ;;  %v1025_v57 = vmul.f32 %v1581_v17, %v1581_v17  ;;  %v1085_v60 = vmul.f32 %v1613_v22, %v1613_v22 }
 0x11c   : > { %v1060_v55 = vadd.f32 %v1059_v49, %v816_v28  ;;  %v1098_v56 = vadd.f32 %v1097_v50, %v1083_v42  ;;  %v1001_v46 = vadd.f32 %v1580_v3, %v1000_v52 }
 0x11d   : > { %v1039_v58 = vadd.f32 %v1038_v41, %v1024_v51  ;;  %v1136_v59 = vadd.f32 %v1135_v53, %v1121_v43 }
 0x11e   : > { %v1061_v61 = vadd.f32 %v1612_v8, %v1060_v55  ;;  %v1099_v63 = vadd.f32 %v1098_v56, %v1084_v54  ;;  %v1002_v62 = vadd.f32 %v1581_v17, %v1001_v46 }
 0x11f   : > { %v1040_v0 = vadd.f32 %v1039_v58, %v1025_v57  ;;  %v1137_v1 = vadd.f32 %v1136_v59, %v1122_v21 }
 0x120   : > { %v1062_v2 = vadd.f32 %v1613_v22, %v1061_v61  ;;  %v1100_v4 = vadd.f32 %v1099_v63, %v1085_v60  ;;  %v1003_v5 = vrot.slane %v1002_v62, 4 }
 0x121   : > { %v1041_v6 = vrot.slane %v1040_v0, 4  ;;  %v1138_v7 = vadd.f32 %v1137_v1, %v1123_v34 }
 0x122   : > { %v1063_v9 = vrot.slane %v1062_v2, 4  ;;  %v1101_v10 = vrot.slane %v1100_v4, 4  ;;  %v1004_v11 = vadd.f32 %v1003_v5, %v1002_v62 }
 0x123   : > { %v1042_v3 = vadd.f32 %v1041_v6, %v1040_v0  ;;  %v1139_v12 = vrot.slane %v1138_v7, 4 }
 0x124   : > { %v1064_v15 = vadd.f32 %v1063_v9, %v1062_v2  ;;  %v1102_v16 = vadd.f32 %v1101_v10, %v1100_v4  ;;  %v1005_v18 = vrot.slane %v1004_v11, 2 }
 0x125   : > { %v1043_v8 = vrot.slane %v1042_v3, 2  ;;  %v1140_v19 = vadd.f32 %v1139_v12, %v1138_v7 }
 0x126   : > { %v1065_v20 = vrot.slane %v1064_v15, 2  ;;  %v1103_v17 = vrot.slane %v1102_v16, 2  ;;  %v1006_v21 = vadd.f32 %v1005_v18, %v1004_v11 }
 0x127   : > { %v1044_v22 = vadd.f32 %v1043_v8, %v1042_v3  ;;  %v1141_v23 = vrot.slane %v1140_v19, 2 }
 0x128   : > { %v1066_v24 = vadd.f32 %v1065_v20, %v1064_v15  ;;  %v1104_v25 = vadd.f32 %v1103_v17, %v1102_v16  ;;  %v1007_v26 = vrot.slane %v1006_v21, 1 }
 0x129   : > { %v1045_v27 = vrot.slane %v1044_v22, 1  ;;  %v1142_v28 = vadd.f32 %v1141_v23, %v1140_v19 }
 0x12a   : > { %v1067_v29 = vrot.slane %v1066_v24, 1  ;;  %v1105_v13 = vrot.slane %v1104_v25, 1  ;;  %v1008_v30 = vadd.f32 %v1007_v26, %v1006_v21 }
 0x12b   : > { %v1046_v31 = vadd.f32 %v1045_v27, %v1044_v22  ;;  %v1143_v14 = vrot.slane %v1142_v28, 1 }
 0x12c   : > { %v1068_v32 = vadd.f32 %v1067_v29, %v1066_v24  ;;  %v1106_v33 = vadd.f32 %v1105_v13, %v1104_v25  ;;  %1009 = vst [vmem:[%s354_s20] sm:$0x1] %v1008_v30 }
 0x12d   : > { %1047 = vst [vmem:[%s354_s20 + $0x1] sm:$0x1] %v1046_v31  ;;  %v1144_v34 = vadd.f32 %v1143_v14, %v1142_v28 }
 0x12e   : > { %1069 = vst [vmem:[%s354_s20 + $0x2] sm:$0x1] %v1068_v32  ;;  %1107 = vst [vmem:[%s354_s20 + $0x3] sm:$0x1] %v1106_v33 }
 0x12f   : > { %1145 = vst [vmem:[%s354_s20 + $0x4] sm:$0x1] %v1144_v34 }
 0x130 PF: > { %s19_s27 = sadd.s32 1, %s1652_s27  }
 0x131   : > { %p16_p5 = scmp.ge.s32.totalorder %s19_s27, 6  }
 0x133   :  { %18 = sbr.rel (!%p16_p5) target bundleno = 1 (0x1), region = 101 }

// kernel: residual_block_forward.5
= control target key start
LH: loop header
LB: loop body
LE: loop exit
PB: predicated region body
PF: predicated region fallthrough
CT: control target
= control target key end

     0   :  { %s3923_s18 = smov 0   ;;  %s4943_s0 = inlined_call_operand.vmem [shape: bf16[2,16,16,128], index: 0, kind: input, shape index: {}]   ;;  %s4944_s1 = inlined_call_operand.vmem [shape: bf16[1152,128], index: 1, kind: input, shape index: {}]   ;;  %s4945_s2 = inlined_call_operand.vmem [shape: f32[1,128], index: 2, kind: input, shape index: {}]   ;;  %s4946_s3 = inlined_call_operand.vmem [shape: f32[1,128], index: 3, kind: input, shape index: {}]   ;;  %s4947_s4 = inlined_call_operand.vmem [shape: bf16[2,16,16,128], index: 4, kind: output, shape index: {0}]   ;;  %s4948_s5 = inlined_call_operand.vmem [shape: f32[2,8,128], index: 5, kind: output, shape index: {1}]  }
   0x1 LB: > { %s2939_s19 = sadd.s32 4294967295, %s3889_s18   ;;  %p2943_p0 = scmp.ge.s32.totalorder %s3889_s18, 1  ;;  %s3889_s18 = sphi %s3923_s18, %s16_s18  }
   0x2   : > { %p190_p1 = scmp.lt.s32.totalorder %s3889_s18, 3 }
   0x4   : > { %p191_p2 = pnand %p2943_p0, %p190_p1 }
   0x5   : > { %v3810_v0 = vld [vmem:[%s4944_s1 + $0x40] sm:$0xff] (!%p191_p2)   ;;  %v3891_v2 = vmov (!%p191_p2), 0.0   ;;  %v3812_v3 = vld [vmem:[%s4944_s1 + $0x48] sm:$0xff] (!%p191_p2)   ;;  %p222_p3 = scmp.lt.s32.totalorder (!%p191_p2), %s2939_s19, 1  ;;  %v3814_v5 = vld [vmem:[%s4944_s1 + $0x50] sm:$0xff] (!%p191_p2)  }
   0x6   : > { %194 = sbr.rel (%p191_p2) target bundleno = 557 (0x22d), region = 36  ;;  %v3811_v1 = vld [vmem:[%s4944_s1] sm:$0xff] (!%p191_p2)   ;;  %411 = vst [vmem:[#allocation2] sm:$0xff] (!%p191_p2), %v3891_v2  ;;  %412 = vst [vmem:[#allocation2 + $0x8] sm:$0xff] (!%p191_p2), %v3891_v2  ;;  %3265 = vmatprep.subr.bf16.mxu0 (!%p191_p2), %v3810_v0  ;;  %3785 = vmatprep.subr.bf16.mxu1 (!%p191_p2), %v3810_v0  ;;  %v3813_v4 = vld [vmem:[%s4944_s1 + $0x8] sm:$0xff] (!%p191_p2)  }
   0x7   : > { %413 = vst [vmem:[#allocation2 + $0x10] sm:$0x3] (!%p191_p2), %v3891_v2  ;;  %415 = vst [vmem:[#allocation2 + $0x198] sm:$0xff] (!%p191_p2), %v3891_v2  ;;  %3266 = vmatpush3.bf16.msra.mxu0 (!%p191_p2), %v3811_v1  ;;  %3793 = vmatpush3.bf16.msra.mxu1 (!%p191_p2), %v3811_v1  ;;  %v3815_v6 = vld [vmem:[%s4944_s1 + $0x10] sm:$0xff] (!%p191_p2)   ;;  %v3816_v7 = vld [vmem:[%s4944_s1 + $0x58] sm:$0xff] (!%p191_p2)  }
   0x8   : > { %416 = vst [vmem:[#allocation2 + $0x1a0] sm:$0xff] (!%p191_p2), %v3891_v2  ;;  %417 = vst [vmem:[#allocation2 + $0x1a8] sm:$0x3] (!%p191_p2), %v3891_v2  ;;  %3267 = vmatprep.subr.bf16.mxu0 (!%p191_p2), %v3812_v3  ;;  %3786 = vmatprep.subr.bf16.mxu1 (!%p191_p2), %v3812_v3  ;;  %v3817_v8 = vld [vmem:[%s4944_s1 + $0x18] sm:$0xff] (!%p191_p2)   ;;  %v3818_v9 = vld [vmem:[%s4944_s1 + $0x60] sm:$0xff] (!%p191_p2)  }
   0x9   : > { %419 = vst [vmem:[#allocation2 + $0x18] sm:$0x1] (!%p191_p2), %v3891_v2  ;;  %420 = vst [vmem:[#allocation2 + $0x30] sm:$0x1] (!%p191_p2), %v3891_v2  ;;  %v3819_v10 = vld [vmem:[%s4944_s1 + $0x20] sm:$0xff] (!%p191_p2)   ;;  %v3820_v11 = vld [vmem:[%s4944_s1 + $0x68] sm:$0xff] (!%p191_p2)  }
   0xa   : > { %421 = vst [vmem:[#allocation2 + $0x48] sm:$0x1] (!%p191_p2), %v3891_v2  ;;  %422 = vst [vmem:[#allocation2 + $0x60] sm:$0x1] (!%p191_p2), %v3891_v2  ;;  %v3982_v18 = vld [vmem:[%s4945_s2] ss:$0 sm:$0xff] (!%p191_p2) }
   0xb   : > { %423 = vst [vmem:[#allocation2 + $0x78] sm:$0x1] (!%p191_p2), %v3891_v2  ;;  %424 = vst [vmem:[#allocation2 + $0x90] sm:$0x1] (!%p191_p2), %v3891_v2  ;;  %3268 = vmatpush3.bf16.msra.mxu0 (!%p191_p2), %v3813_v4  ;;  %3794 = vmatpush3.bf16.msra.mxu1 (!%p191_p2), %v3813_v4  ;;  %v3987_v19 = vld [vmem:[%s4946_s3] ss:$0 sm:$0xff] (!%p191_p2) }
   0xc   : > { %425 = vst [vmem:[#allocation2 + $0xa8] sm:$0x1] (!%p191_p2), %v3891_v2  ;;  %426 = vst [vmem:[#allocation2 + $0xc0] sm:$0x1] (!%p191_p2), %v3891_v2  ;;  %3269 = vmatprep.subr.bf16.mxu0 (!%p191_p2), %v3814_v5  ;;  %3787 = vmatprep.subr.bf16.mxu1 (!%p191_p2), %v3814_v5  ;;  %v3821_v20 = vld [vmem:[%s4944_s1 + $0x28] sm:$0xff] (!%p191_p2)   ;;  %v3822_v23 = vld [vmem:[%s4944_s1 + $0x70] sm:$0xff] (!%p191_p2)  }
   0xd   : > { %427 = vst [vmem:[#allocation2 + $0xd8] sm:$0x1] %v3891_v2  ;;  %428 = vst [vmem:[#allocation2 + $0xf0] sm:$0x1] %v3891_v2  ;;  %s4950_s19 = smov (!%p222_p3, %s2939_s19), 1  ;;  %v547_v12 = vld [vmem:[#allocation2 + $0x1] sm:$0xff] }
   0xe   : > { %429 = vst [vmem:[#allocation2 + $0x108] sm:$0x1] %v3891_v2  ;;  %430 = vst [vmem:[#allocation2 + $0x120] sm:$0x1] %v3891_v2  ;;  %s3057_s9 = sshll.u32 %s4950_s19, 7  ;;  %v548_v13 = vld [vmem:[#allocation2 + $0x9] sm:$0xff] }
   0xf   : > { %431 = vst [vmem:[#allocation2 + $0x138] sm:$0x1] %v3891_v2  ;;  %432 = vst [vmem:[#allocation2 + $0x150] sm:$0x1] %v3891_v2  ;;  %3270 = vmatpush3.bf16.msra.mxu0 %v3815_v6  ;;  %3795 = vmatpush3.bf16.msra.mxu1 %v3815_v6  ;;  %s3970_s16 = scalar_lea.vmem %s4943_s0, %s3057_s9  ;;  %v579_v15 = vpack.c.bf16 %v548_v13, %v547_v12  ;;  %v3823_v26 = vld [vmem:[%s4944_s1 + $0x30] sm:$0xff]   ;;  %v3824_v27 = vld [vmem:[%s4944_s1 + $0x78] sm:$0xff]   ;;  %s4871_s24 = scalar_lea.vmem %s4947_s4, %s3057_s9 }
  0x10   : > { %433 = vst [vmem:[#allocation2 + $0x168] sm:$0x1] %v3891_v2  ;;  %434 = vst [vmem:[#allocation2 + $0x180] sm:$0x1] %v3891_v2  ;;  %3271 = vmatprep.subr.bf16.mxu0 %v3816_v7  ;;  %3788 = vmatprep.subr.bf16.mxu1 %v3816_v7  ;;  %v3245_v14 = vld [vmem:[%s3970_s16 + $0x58] sm:$0xff]   ;;  %v3092_v30 = vld [vmem:[%s3970_s16] sm:$0xff]  }
  0x11   : > { %435 = vst [vmem:[#allocation2 + $0x29] sm:$0x1] %v3891_v2  ;;  %436 = vst [vmem:[#allocation2 + $0x41] sm:$0x1] %v3891_v2  ;;  %v3137_v16 = vunpack.c.l.bf16 %v3245_v14  ;;  %v3138_v17 = vunpack.c.h.bf16 %v3245_v14  ;;  %1812 = vmatprep.mubr.bf16.mxu0 %v579_v15  ;;  %v3093_v31 = vunpack.c.l.bf16 %v3092_v30  ;;  %v3094_v32 = vunpack.c.h.bf16 %v3092_v30  ;;  %v3246_v33 = vld [vmem:[%s3970_s16 + $0x60] sm:$0xff]   ;;  %v3825_v37 = vld [vmem:[%s4944_s1 + $0x38] sm:$0xff]  }
  0x12   : > { %437 = vst [vmem:[#allocation2 + $0x59] sm:$0x1] %v3891_v2  ;;  %438 = vst [vmem:[#allocation2 + $0x71] sm:$0x1] %v3891_v2  ;;  %v3141_v35 = vunpack.c.l.bf16 %v3246_v33  ;;  %v3142_v36 = vunpack.c.h.bf16 %v3246_v33  ;;  %v3826_v40 = vld [vmem:[%s4944_s1 + $0xc0] sm:$0xff]   ;;  %v3235_v51 = vld [vmem:[%s3970_s16 + $0x8] sm:$0xff]  }
  0x13   : > { %439 = vst [vmem:[#allocation2 + $0x89] sm:$0x1] %v3891_v2  ;;  %440 = vst [vmem:[#allocation2 + $0xa1] sm:$0x1] %v3891_v2  ;;  %3272 = vmatpush3.bf16.msra.mxu0 %v3817_v8  ;;  %3796 = vmatpush3.bf16.msra.mxu1 %v3817_v8  ;;  %v330_v21 = vmul.f32 %v3137_v16, %v3982_v18  ;;  %v331_v22 = vmul.f32 %v3138_v17, %v3982_v18  ;;  %v3827_v43 = vld [vmem:[%s4944_s1 + $0x140] sm:$0xff]   ;;  %v3247_v52 = vld [vmem:[%s3970_s16 + $0x68] sm:$0xff]   ;;  %v3097_v55 = vunpack.c.l.bf16 %v3235_v51 }
  0x14   : > { %441 = vst [vmem:[#allocation2 + $0xb9] sm:$0x1] %v3891_v2  ;;  %442 = vst [vmem:[#allocation2 + $0xd1] sm:$0x1] %v3891_v2  ;;  %3273 = vmatprep.subr.bf16.mxu0 %v3818_v9  ;;  %3789 = vmatprep.subr.bf16.mxu1 %v3818_v9  ;;  %v308_v38 = vmul.f32 %v3093_v31, %v3982_v18  ;;  %v309_v39 = vmul.f32 %v3094_v32, %v3982_v18  ;;  %v3829_v48 = vld [vmem:[%s4944_s1 + $0x100] sm:$0xff]   ;;  %v3098_v56 = vunpack.c.h.bf16 %v3235_v51  ;;  %v3830_v0 = vld [vmem:[%s4944_s1 + $0xc8] sm:$0xff]  }
  0x15   : > { %443 = vst [vmem:[#allocation2 + $0xe9] sm:$0x1] %v3891_v2  ;;  %444 = vst [vmem:[#allocation2 + $0x101] sm:$0x1] %v3891_v2  ;;  %v369_v24 = vadd.f32 %v3987_v19, %v330_v21  ;;  %v370_v25 = vadd.f32 %v3987_v19, %v331_v22  ;;  %v332_v41 = vmul.f32 %v3141_v35, %v3982_v18  ;;  %v3828_v59 = vld [vmem:[%s4944_s1 + $0x80] sm:$0xff]   ;;  %v3145_v61 = vunpack.c.l.bf16 %v3247_v52  ;;  %v3831_v5 = vld [vmem:[%s4944_s1 + $0x88] sm:$0xff]  }
  0x16   : > { %445 = vst [vmem:[#allocation2 + $0x119] sm:$0x1] %v3891_v2  ;;  %446 = vst [vmem:[#allocation2 + $0x131] sm:$0x1] %v3891_v2  ;;  %v333_v42 = vmul.f32 %v3142_v36, %v3982_v18  ;;  %v347_v44 = vadd.f32 %v3987_v19, %v308_v38  ;;  %v348_v45 = vadd.f32 %v3987_v19, %v309_v39  ;;  %v3146_v62 = vunpack.c.h.bf16 %v3247_v52  ;;  %v3835_v6 = vld [vmem:[%s4944_s1 + $0x148] sm:$0xff]   ;;  %v3236_v14 = vld [vmem:[%s3970_s16 + $0x10] sm:$0xff]  }
  0x17   : > { %447 = vst [vmem:[#allocation2 + $0x149] sm:$0x1] %v3891_v2  ;;  %448 = vst [vmem:[#allocation2 + $0x161] sm:$0x1] %v3891_v2  ;;  %3274 = vmatpush3.bf16.msra.mxu0 %v3819_v10  ;;  %3797 = vmatpush3.bf16.msra.mxu1 %v3819_v10  ;;  %v401_v28 = vmax.f32 %v369_v24, 0.0  ;;  %v402_v29 = vmax.f32 %v370_v25, 0.0  ;;  %v371_v46 = vadd.f32 %v3987_v19, %v332_v41  ;;  %v3101_v21 = vunpack.c.l.bf16 %v3236_v14 }
  0x18   : > { %449 = vst [vmem:[#allocation2 + $0x179] sm:$0x1] %v3891_v2  ;;  %450 = vst [vmem:[#allocation2 + $0x191] sm:$0x1] %v3891_v2  ;;  %3275 = vmatprep.subr.bf16.mxu0 %v3820_v11  ;;  %3790 = vmatprep.subr.bf16.mxu1 %v3820_v11  ;;  %v372_v47 = vadd.f32 %v3987_v19, %v333_v42  ;;  %v379_v49 = vmax.f32 %v347_v44, 0.0  ;;  %v380_v50 = vmax.f32 %v348_v45, 0.0  ;;  %v3102_v22 = vunpack.c.h.bf16 %v3236_v14 }
  0x19   : > { %473 = vst [vmem:[#allocation2 + $0x121] sm:$0xff] %v401_v28  ;;  %474 = vst [vmem:[#allocation2 + $0x129] sm:$0xff] %v402_v29  ;;  %v591_v34 = vpack.c.bf16 %v402_v29, %v401_v28  ;;  %v403_v53 = vmax.f32 %v371_v46, 0.0  ;;  %v310_v2 = vmul.f32 %v3097_v55, %v3982_v18  ;;  %v311_v3 = vmul.f32 %v3098_v56, %v3982_v18  ;;  %v3837_v9 = vld [vmem:[%s4944_s1 + $0x108] sm:$0xff]   ;;  %v3248_v15 = vld [vmem:[%s3970_s16 + $0x70] sm:$0xff]   ;;  %s2948_s9 = sshll.u32 %s4950_s19, 3 }
  0x1a   : > { %v404_v54 = vmax.f32 %v372_v47, 0.0  ;;  %451 = vst [vmem:[#allocation2 + $0x19] sm:$0xff] %v379_v49  ;;  %452 = vst [vmem:[#allocation2 + $0x21] sm:$0xff] %v380_v50  ;;  %v4032_v60 = vpack.c.bf16 %v380_v50, %v379_v49  ;;  %v3892_v4 = vmov 0.0|0.0   ;;  %v334_v7 = vmul.f32 %v3145_v61, %v3982_v18  ;;  %v3832_v16 = vld [vmem:[%s4944_s1 + $0xd0] sm:$0xff]   ;;  %v3834_v41 = vld [vmem:[%s4944_s1 + $0xd8] sm:$0xff]   ;;  %s235_s27 = scalar_lea.vmem %s4948_s5, %s2948_s9 }
  0x1b   : > { %3276 = vmatpush3.bf16.msra.mxu0 %v3821_v20  ;;  %3798 = vmatpush3.bf16.msra.mxu1 %v3821_v20  ;;  %475 = vst [vmem:[#allocation2 + $0x139] sm:$0xff] %v403_v53  ;;  %v335_v8 = vmul.f32 %v3146_v62, %v3982_v18  ;;  %v349_v10 = vadd.f32 %v3987_v19, %v310_v2  ;;  %v3833_v24 = vld [vmem:[%s4944_s1 + $0x90] sm:$0xff]   ;;  %v3150_v28 = vunpack.c.h.bf16 %v3248_v15  ;;  %v3836_v49 = vld [vmem:[%s4944_s1 + $0x98] sm:$0xff]   ;;  %v3239_v14 = vld [vmem:[%s3970_s16 + $0x28] sm:$0xff]  }
  0x1c   : > { %3277 = vmatprep.subr.bf16.mxu0 %v3822_v23  ;;  %3791 = vmatprep.subr.bf16.mxu1 %v3822_v23  ;;  %476 = vst [vmem:[#allocation2 + $0x141] sm:$0xff] %v404_v54  ;;  %v592_v1 = vpack.c.bf16 %v404_v54, %v403_v53  ;;  %v350_v11 = vadd.f32 %v3987_v19, %v311_v3  ;;  %v3843_v23 = vld [vmem:[%s4944_s1 + $0x150] sm:$0xff]   ;;  %v3237_v52 = vld [vmem:[%s3970_s16 + $0x18] sm:$0xff]   ;;  %v3838_v53 = vld [vmem:[%s4944_s1 + $0xe0] sm:$0xff]  }
  0x1d   : > { %1908 = vmatprep.mubr.bf16.mxu1 %v591_v34  ;;  %v373_v12 = vadd.f32 %v3987_v19, %v334_v7  ;;  %v374_v13 = vadd.f32 %v3987_v19, %v335_v8  ;;  %v381_v17 = vmax.f32 %v349_v10, 0.0  ;;  %v312_v32 = vmul.f32 %v3101_v21, %v3982_v18  ;;  %v3845_v46 = vld [vmem:[%s4944_s1 + $0x110] sm:$0xff]   ;;  %v3840_v3 = vld [vmem:[%s4944_s1 + $0xe8] sm:$0xff]   ;;  %v3850_v7 = vld [vmem:[%s4944_s1 + $0x158] sm:$0xff]  }
  0x1e   : > { %v382_v20 = vmax.f32 %v350_v11, 0.0  ;;  %v313_v33 = vmul.f32 %v3102_v22, %v3982_v18  ;;  %v337_v39 = vmul.f32 %v3150_v28, %v3982_v18  ;;  %v3105_v54 = vunpack.c.l.bf16 %v3237_v52  ;;  %v3851_v8 = vld [vmem:[%s4944_s1 + $0x118] sm:$0xff]  }
  0x1f   : > { %3278 = vmatpush3.bf16.msra.mxu0 %v3823_v26  ;;  %3799 = vmatpush3.bf16.msra.mxu1 %v3823_v26  ;;  %v405_v25 = vmax.f32 %v373_v12, 0.0  ;;  %v406_v26 = vmax.f32 %v374_v13, 0.0  ;;  %453 = vst [vmem:[#allocation2 + $0x31] sm:$0xff] %v381_v17  ;;  %v351_v42 = vadd.f32 %v3987_v19, %v312_v32  ;;  %v3106_v55 = vunpack.c.h.bf16 %v3237_v52 }
  0x20   : > { %3279 = vmatprep.subr.bf16.mxu0 %v3824_v27  ;;  %3792 = vmatprep.subr.bf16.mxu1 %v3824_v27  ;;  %v507_v57 = vld [vmem:[#allocation2 + $0x120] sm:$0xff]  ;;  %v508_v58 = vld [vmem:[#allocation2 + $0x128] sm:$0xff]  ;;  %v3149_v27 = vunpack.c.l.bf16 %v3248_v15  ;;  %454 = vst [vmem:[#allocation2 + $0x39] sm:$0xff] %v382_v20  ;;  %v4066_v31 = vpack.c.bf16 %v382_v20, %v381_v17  ;;  %v376_v45 = vadd.f32 %v3987_v19, %v337_v39  ;;  %v3113_v20 = vunpack.c.l.bf16 %v3239_v14 }
  0x21   : > { %v527_v63 = vpack.c.bf16 %v508_v58, %v507_v57  ;;  %v485_v29 = vld [vmem:[#allocation2 + $0x18] sm:$0xff]  ;;  %v486_v30 = vld [vmem:[#allocation2 + $0x20] sm:$0xff]  ;;  %477 = vst [vmem:[#allocation2 + $0x151] sm:$0xff] %v405_v25  ;;  %478 = vst [vmem:[#allocation2 + $0x159] sm:$0xff] %v406_v26  ;;  %v383_v47 = vmax.f32 %v351_v42, 0.0  ;;  %v3114_v21 = vunpack.c.h.bf16 %v3239_v14 }
  0x22   : > { %v4070_v34 = vpack.c.bf16 %v486_v30, %v485_v29  ;;  %v509_v35 = vld [vmem:[#allocation2 + $0x138] sm:$0xff]  ;;  %v336_v38 = vmul.f32 %v3149_v27, %v3982_v18  ;;  %v408_v51 = vmax.f32 %v376_v45, 0.0  ;;  %v3839_v58 = vld [vmem:[%s4944_s1 + $0xa0] sm:$0xff]   ;;  %v3841_v15 = vld [vmem:[%s4944_s1 + $0xa8] sm:$0xff]   ;;  %v318_v28 = vmul.f32 %v3113_v20, %v3982_v18 }
  0x23   : > { %3280 = vmatpush3.bf16.msra.mxu0 %v3825_v37  ;;  %3800 = vmatpush3.bf16.msra.mxu1 %v3825_v37  ;;  %v510_v36 = vld [vmem:[#allocation2 + $0x140] sm:$0xff]  ;;  %v593_v37 = vpack.c.bf16 %v406_v26, %v405_v25  ;;  %455 = vst [vmem:[#allocation2 + $0x49] sm:$0xff] %v383_v47  ;;  %v319_v29 = vmul.f32 %v3114_v21, %v3982_v18  ;;  %v612_v45 = vld [vmem:[#allocation2 + $0xa] sm:$0xff] }
  0x24   : > { %3377 = vmatprep.subr.bf16.mxu1 %v3826_v40  ;;  %3489 = vmatprep.subr.bf16.mxu0 %v3827_v43  ;;  %v528_v40 = vpack.c.bf16 %v510_v36, %v509_v35  ;;  %v352_v43 = vadd.f32 %v3987_v19, %v313_v33  ;;  %v375_v44 = vadd.f32 %v3987_v19, %v336_v38  ;;  %v3852_v30 = vld [vmem:[%s4944_s1 + $0x160] sm:$0xff]   ;;  %v3844_v33 = vld [vmem:[%s4944_s1 + $0xb0] sm:$0xff]  }
  0x25   : > { %480 = vst [vmem:[#allocation2 + $0x171] sm:$0xff] %v408_v51  ;;  %v4148_v39 = vadd.f32 %v3987_v19, %v318_v28  ;;  %v3854_v42 = vld [vmem:[%s4944_s1 + $0x120] sm:$0xff]  }
  0x26   : > { %1813 = vmatmul.mubr.bf16.vlgmr.msra.gmra.mrb[0].mxu0 %v3892_v4  ;;  %1909 = vmatmul.mubr.bf16.vlgmr.msra.gmra.mrb[0].mxu1 %v527_v63  ;;  %v407_v50 = vmax.f32 %v375_v44, 0.0  ;;  %v487_v56 = vld [vmem:[#allocation2 + $0x30] sm:$0xff]  ;;  %v611_v44 = vld [vmem:[#allocation2 + $0x2] sm:$0xff] }
  0x27   : > { %3490 = vmatpush3.bf16.msra.mxu0 %v3829_v48  ;;  %3378 = vmatpush3.bf16.msra.mxu1 %v3828_v59  ;;  %v384_v48 = vmax.f32 %v352_v43, 0.0  ;;  %v488_v57 = vld [vmem:[#allocation2 + $0x38] sm:$0xff] }
  0x28   : > { %1820 = vmatprep.mubr.bf16.mxu0 %v4032_v60  ;;  %3379 = vmatprep.subr.bf16.mxu1 %v3830_v0  ;;  %479 = vst [vmem:[#allocation2 + $0x169] sm:$0xff] %v407_v50  ;;  %v4096_v59 = vpack.c.bf16 %v488_v57, %v487_v56  ;;  %v511_v61 = vld [vmem:[#allocation2 + $0x150] sm:$0xff]  ;;  %v512_v62 = vld [vmem:[#allocation2 + $0x158] sm:$0xff]  ;;  %v314_v0 = vmul.f32 %v3105_v54, %v3982_v18 }
  0x29   : > { %1916 = vmatprep.mubr.bf16.mxu1 %v592_v1  ;;  %3491 = vmatprep.subr.bf16.mxu0 %v3835_v6  ;;  %456 = vst [vmem:[#allocation2 + $0x51] sm:$0xff] %v384_v48  ;;  %v4098_v63 = vpack.c.bf16 %v384_v48, %v383_v47  ;;  %v315_v1 = vmul.f32 %v3106_v55, %v3982_v18  ;;  %v3847_v43 = vld [vmem:[%s4944_s1 + $0xb8] sm:$0xff]   ;;  %v389_v47 = vmax.f32 %v4148_v39, 0.0 }
  0x2a   : > { %v4102_v2 = vpack.c.bf16 %v512_v62, %v511_v61  ;;  %v594_v4 = vpack.c.bf16 %v408_v51, %v407_v50  ;;  %v3848_v50 = vld [vmem:[%s4944_s1 + $0x1c0] sm:$0xff]  }
  0x2b   : > { %3492 = vmatpush3.bf16.msra.mxu0 %v3837_v9  ;;  %3380 = vmatpush3.bf16.msra.mxu1 %v3831_v5  ;;  %v353_v5 = vadd.f32 %v3987_v19, %v314_v0  ;;  %v354_v6 = vadd.f32 %v3987_v19, %v315_v1  ;;  %v3238_v9 = vld [vmem:[%s3970_s16 + $0x20] sm:$0xff]   ;;  %461 = vst [vmem:[#allocation2 + $0x91] sm:$0xff] %v389_v47 }
  0x2c   : > { %3381 = vmatprep.subr.bf16.mxu1 %v3832_v16  ;;  %3493 = vmatprep.subr.bf16.mxu0 %v3843_v23  ;;  %v3109_v12 = vunpack.c.l.bf16 %v3238_v9  ;;  %v3110_v13 = vunpack.c.h.bf16 %v3238_v9  ;;  %v489_v16 = vld [vmem:[#allocation2 + $0x48] sm:$0xff]  ;;  %v643_v1 = vpack.c.bf16 %v612_v45, %v611_v44  ;;  %v3859_v45 = vld [vmem:[%s4944_s1 + $0x190] sm:$0xff]  }
  0x2d   : > { %v385_v10 = vmax.f32 %v353_v5, 0.0  ;;  %v386_v11 = vmax.f32 %v354_v6, 0.0 }
  0x2e   : > { %1821 = vmatmul.mubr.bf16.gmra.mrb[4].mxu0 %v4070_v34  ;;  %1917 = vmatmul.mubr.bf16.gmra.mrb[4].mxu1 %v528_v40  ;;  %v316_v25 = vmul.f32 %v3109_v12, %v3982_v18  ;;  %v317_v27 = vmul.f32 %v3110_v13, %v3982_v18  ;;  %v4151_v40 = vadd.f32 %v3987_v19, %v319_v29 }
  0x2f   : > { %1828 = vmatprep.mubr.bf16.mxu0 %v4066_v31  ;;  %3382 = vmatpush3.bf16.msra.mxu1 %v3833_v24  ;;  %v513_v22 = vld [vmem:[#allocation2 + $0x168] sm:$0xff]  ;;  %v514_v23 = vld [vmem:[#allocation2 + $0x170] sm:$0xff]  ;;  %457 = vst [vmem:[#allocation2 + $0x61] sm:$0xff] %v385_v10  ;;  %458 = vst [vmem:[#allocation2 + $0x69] sm:$0xff] %v386_v11  ;;  %v4140_v35 = vpack.c.bf16 %v386_v11, %v385_v10 }
  0x30   : > { %1924 = vmatprep.mubr.bf16.mxu1 %v593_v37  ;;  %3383 = vmatprep.subr.bf16.mxu1 %v3834_v41  ;;  %v490_v17 = vld [vmem:[#allocation2 + $0x50] sm:$0xff]  ;;  %v4135_v32 = vpack.c.bf16 %v514_v23, %v513_v22  ;;  %v355_v36 = vadd.f32 %v3987_v19, %v316_v25  ;;  %v3846_v37 = vld [vmem:[%s4944_s1 + $0xf8] sm:$0xff]   ;;  %v356_v38 = vadd.f32 %v3987_v19, %v317_v27  ;;  %v390_v48 = vmax.f32 %v4151_v40, 0.0  ;;  %v3242_v10 = vld [vmem:[%s3970_s16 + $0x40] sm:$0xff]  }
  0x31   : > { %3494 = vmatpush3.bf16.msra.mxu0 %v3845_v46  ;;  %v3842_v24 = vld [vmem:[%s4944_s1 + $0xf0] sm:$0xff]   ;;  %v4127_v26 = vpack.c.bf16 %v490_v17, %v489_v16  ;;  %v3125_v13 = vunpack.c.l.bf16 %v3242_v10  ;;  %v3126_v14 = vunpack.c.h.bf16 %v3242_v10  ;;  %v613_v22 = vld [vmem:[#allocation2 + $0x1a] sm:$0xff]  ;;  %v614_v25 = vld [vmem:[#allocation2 + $0x22] sm:$0xff] }
  0x32   : > { %3495 = vmatprep.subr.bf16.mxu0 %v3850_v7  ;;  %v387_v41 = vmax.f32 %v355_v36, 0.0  ;;  %v388_v46 = vmax.f32 %v356_v38, 0.0  ;;  %462 = vst [vmem:[#allocation2 + $0x99] sm:$0xff] %v390_v48  ;;  %v3853_v7 = vld [vmem:[%s4944_s1 + $0x1c8] sm:$0xff]   ;;  %v3860_v17 = vld [vmem:[%s4944_s1 + $0x170] sm:$0xff]   ;;  %v4251_v44 = vpack.c.bf16 %v390_v48, %v389_v47  ;;  %v3864_v47 = vld [vmem:[%s4944_s1 + $0x178] sm:$0xff]  }
  0x33   : > { %3384 = vmatpush3.bf16.msra.mxu1 %v3836_v49  ;;  %v3240_v49 = vld [vmem:[%s3970_s16 + $0x30] sm:$0xff]   ;;  %v324_v23 = vmul.f32 %v3125_v13, %v3982_v18  ;;  %v3855_v27 = vld [vmem:[%s4944_s1 + $0x188] sm:$0xff]   ;;  %v4311_v13 = vld [vmem:[%s4944_s1 + $0x200] sm:$0xff]  }
  0x34   : > { %3385 = vmatprep.subr.bf16.mxu1 %v3838_v53  ;;  %459 = vst [vmem:[#allocation2 + $0x79] sm:$0xff] %v387_v41  ;;  %v3117_v51 = vunpack.c.l.bf16 %v3240_v49  ;;  %v3118_v52 = vunpack.c.h.bf16 %v3240_v49  ;;  %v3856_v53 = vld [vmem:[%s4944_s1 + $0x168] sm:$0xff]   ;;  %460 = vst [vmem:[#allocation2 + $0x81] sm:$0xff] %v388_v46  ;;  %v495_v48 = vld [vmem:[#allocation2 + $0x90] sm:$0xff] }
  0x35   : > { %3496 = vmatpush3.bf16.msra.mxu0 %v3851_v8 }
  0x36   : > { %1829 = vmatmul.mubr.bf16.gmra.mrb[8].mxu0 %v4096_v59  ;;  %1925 = vmatmul.mubr.bf16.gmra.mrb[8].mxu1 %v4102_v2  ;;  %v491_v54 = vld [vmem:[#allocation2 + $0x60] sm:$0xff]  ;;  %v492_v55 = vld [vmem:[#allocation2 + $0x68] sm:$0xff]  ;;  %v320_v56 = vmul.f32 %v3117_v51, %v3982_v18  ;;  %v321_v57 = vmul.f32 %v3118_v52, %v3982_v18  ;;  %v615_v51 = vld [vmem:[#allocation2 + $0x32] sm:$0xff] }
  0x37   : > { %1836 = vmatprep.mubr.bf16.mxu0 %v4098_v63  ;;  %3386 = vmatpush3.bf16.msra.mxu1 %v3839_v58  ;;  %v3241_v58 = vld [vmem:[%s3970_s16 + $0x38] sm:$0xff]   ;;  %v4182_v61 = vpack.c.bf16 %v492_v55, %v491_v54 }
  0x38   : > { %1932 = vmatprep.mubr.bf16.mxu1 %v594_v4  ;;  %3387 = vmatprep.subr.bf16.mxu1 %v3840_v3  ;;  %v3121_v62 = vunpack.c.l.bf16 %v3241_v58  ;;  %v3122_v0 = vunpack.c.h.bf16 %v3241_v58  ;;  %v3849_v3 = vld [vmem:[%s4944_s1 + $0x180] sm:$0xff]   ;;  %v4187_v4 = vpack.c.bf16 %v388_v46, %v387_v41  ;;  %v4190_v5 = vadd.f32 %v3987_v19, %v320_v56  ;;  %v3865_v55 = vld [vmem:[%s4944_s1 + $0x138] sm:$0xff]  }
  0x39   : > { %3497 = vmatprep.subr.bf16.mxu0 %v3852_v30  ;;  %v4193_v6 = vadd.f32 %v3987_v19, %v321_v57  ;;  %v3858_v30 = vld [vmem:[%s4944_s1 + $0x1d0] sm:$0xff]   ;;  %v616_v52 = vld [vmem:[#allocation2 + $0x3a] sm:$0xff] }
  0x3a   : > { %3498 = vmatpush3.bf16.msra.mxu0 %v3854_v42  ;;  %v322_v8 = vmul.f32 %v3121_v62, %v3982_v18  ;;  %v323_v9 = vmul.f32 %v3122_v0, %v3982_v18  ;;  %v391_v11 = vmax.f32 %v4190_v5, 0.0  ;;  %v496_v56 = vld [vmem:[#allocation2 + $0x98] sm:$0xff]  ;;  %v3868_v5 = vld [vmem:[%s4944_s1 + $0x1a0] sm:$0xff]  }
  0x3b   : > { %3388 = vmatpush3.bf16.msra.mxu1 %v3841_v15  ;;  %3499 = vmatprep.subr.bf16.mxu0 %v3856_v53  ;;  %v392_v12 = vmax.f32 %v4193_v6, 0.0  ;;  %v493_v20 = vld [vmem:[#allocation2 + $0x78] sm:$0xff]  ;;  %v494_v21 = vld [vmem:[#allocation2 + $0x80] sm:$0xff]  ;;  %v617_v6 = vld [vmem:[#allocation2 + $0x4a] sm:$0xff] }
  0x3c   : > { %3389 = vmatprep.subr.bf16.mxu1 %v3842_v24  ;;  %v4205_v15 = vadd.f32 %v3987_v19, %v322_v8  ;;  %v4208_v16 = vadd.f32 %v3987_v19, %v323_v9  ;;  %463 = vst [vmem:[#allocation2 + $0xa9] sm:$0xff] %v391_v11  ;;  %v325_v24 = vmul.f32 %v3126_v14, %v3982_v18  ;;  %v3863_v57 = vld [vmem:[%s4944_s1 + $0x198] sm:$0xff]   ;;  %v3866_v8 = vld [vmem:[%s4944_s1 + $0x1e0] sm:$0xff]  }
  0x3d   : > { %464 = vst [vmem:[#allocation2 + $0xb1] sm:$0xff] %v392_v12  ;;  %v4239_v38 = vpack.c.bf16 %v494_v21, %v493_v20  ;;  %v4300_v9 = vpack.c.bf16 %v616_v52, %v615_v51  ;;  %v4306_v10 = vpack.c.bf16 %v392_v12, %v391_v11 }
  0x3e   : > { %1837 = vmatmul.mubr.bf16.gmra.mrb[12].mxu0 %v4127_v26  ;;  %1933 = vmatmul.mubr.bf16.gmra.mrb[12].mxu1 %v4135_v32  ;;  %v393_v28 = vmax.f32 %v4205_v15, 0.0  ;;  %v394_v29 = vmax.f32 %v4208_v16, 0.0  ;;  %v4233_v36 = vadd.f32 %v3987_v19, %v325_v24  ;;  %v620_v15 = vld [vmem:[#allocation2 + $0x6a] sm:$0xff] }
  0x3f   : > { %1844 = vmatprep.mubr.bf16.mxu0 %v4140_v35  ;;  %3390 = vmatpush3.bf16.msra.mxu1 %v3844_v33  ;;  %v4230_v33 = vadd.f32 %v3987_v19, %v324_v23  ;;  %v618_v23 = vld [vmem:[#allocation2 + $0x52] sm:$0xff] }
  0x40   : > { %1973 = vmatprep.mubr.bf16.mxu1 %v4070_v34  ;;  %3391 = vmatprep.subr.bf16.mxu1 %v3846_v37  ;;  %v3857_v34 = vld [vmem:[%s4944_s1 + $0x128] sm:$0xff]   ;;  %465 = vst [vmem:[#allocation2 + $0xc1] sm:$0xff] %v393_v28  ;;  %466 = vst [vmem:[#allocation2 + $0xc9] sm:$0xff] %v394_v29  ;;  %v396_v49 = vmax.f32 %v4233_v36, 0.0  ;;  %v3874_v16 = vld [vmem:[%s4944_s1 + $0x1b0] sm:$0xff]  }
  0x41   : > { %3500 = vmatpush3.bf16.msra.mxu0 %v3857_v34  ;;  %v3243_v37 = vld [vmem:[%s3970_s16 + $0x48] sm:$0xff]   ;;  %v395_v46 = vmax.f32 %v4230_v33, 0.0  ;;  %v3244_v34 = vld [vmem:[%s3970_s16 + $0x50] sm:$0xff]  }
  0x42   : > { %3501 = vmatprep.subr.bf16.mxu0 %v3860_v17  ;;  %v3129_v41 = vunpack.c.l.bf16 %v3243_v37  ;;  %v3130_v42 = vunpack.c.h.bf16 %v3243_v37  ;;  %468 = vst [vmem:[#allocation2 + $0xe1] sm:$0xff] %v396_v49  ;;  %v3133_v0 = vunpack.c.l.bf16 %v3244_v34 }
  0x43   : > { %3392 = vmatpush3.bf16.msra.mxu1 %v3847_v43  ;;  %v4245_v43 = vpack.c.bf16 %v614_v25, %v613_v22  ;;  %467 = vst [vmem:[#allocation2 + $0xd9] sm:$0xff] %v395_v46  ;;  %v497_v20 = vld [vmem:[#allocation2 + $0xa8] sm:$0xff] }
  0x44   : > { %3601 = vmatprep.subr.bf16.mxu1 %v3848_v50  ;;  %v3862_v50 = vld [vmem:[%s4944_s1 + $0x1d8] sm:$0xff]   ;;  %v326_v39 = vmul.f32 %v3129_v41, %v3982_v18  ;;  %v327_v40 = vmul.f32 %v3130_v42, %v3982_v18  ;;  %v498_v21 = vld [vmem:[#allocation2 + $0xb0] sm:$0xff]  ;;  %v3869_v22 = vld [vmem:[%s4944_s1 + $0x1e8] sm:$0xff]  }
  0x45   : > { %v4336_v24 = vpack.c.bf16 %v498_v21, %v497_v20  ;;  %v3871_v25 = vld [vmem:[%s4944_s1 + $0x1a8] sm:$0xff]  }
  0x46   : > { %1845 = vmatmul.mubr.bf16.gmra.mrb[16].mxu0 %v4182_v61  ;;  %1974 = vmatmul.mubr.bf16.vlgmr.msra.gmra.mrb[16].mxu1 %v643_v1  ;;  %v4272_v53 = vadd.f32 %v3987_v19, %v326_v39  ;;  %v4275_v54 = vadd.f32 %v3987_v19, %v327_v40  ;;  %v3134_v1 = vunpack.c.h.bf16 %v3244_v34  ;;  %v619_v42 = vld [vmem:[#allocation2 + $0x62] sm:$0xff]  ;;  %v3877_v39 = vld [vmem:[%s4944_s1 + $0x1b8] sm:$0xff]   ;;  %v625_v21 = vld [vmem:[#allocation2 + $0xaa] sm:$0xff] }
  0x47   : > { %1852 = vmatprep.mubr.bf16.mxu0 %v4187_v4  ;;  %3602 = vmatpush3.bf16.msra.mxu1 %v3849_v3  ;;  %v4289_v3 = vpack.c.bf16 %v496_v56, %v495_v48  ;;  %v499_v37 = vld [vmem:[#allocation2 + $0xc0] sm:$0xff]  ;;  %v500_v41 = vld [vmem:[#allocation2 + $0xc8] sm:$0xff]  ;;  %v3249_v40 = vld [vmem:[%s3970_s16 + $0x78] sm:$0xff]  }
  0x48   : > { %1981 = vmatprep.mubr.bf16.mxu1 %v4096_v59  ;;  %3603 = vmatprep.subr.bf16.mxu1 %v3853_v7  ;;  %v3861_v59 = vld [vmem:[%s4944_s1 + $0x130] sm:$0xff]   ;;  %v397_v58 = vmax.f32 %v4272_v53, 0.0  ;;  %v398_v62 = vmax.f32 %v4275_v54, 0.0  ;;  %v329_v7 = vmul.f32 %v3134_v1, %v3982_v18  ;;  %v3154_v48 = vunpack.c.h.bf16 %v3249_v40  ;;  %v624_v53 = vld [vmem:[#allocation2 + $0x9a] sm:$0xff] }
  0x49   : > { %3502 = vmatpush3.bf16.msra.mxu0 %v3861_v59  ;;  %v3872_v59 = vld [vmem:[%s4944_s1 + $0x1f0] sm:$0xff]  }
  0x4a   : > { %3503 = vmatprep.subr.bf16.mxu0 %v3864_v47  ;;  %469 = vst [vmem:[#allocation2 + $0xf1] sm:$0xff] %v397_v58  ;;  %470 = vst [vmem:[#allocation2 + $0xf9] sm:$0xff] %v398_v62  ;;  %v4317_v17 = vadd.f32 %v3987_v19, %v329_v7  ;;  %v3153_v47 = vunpack.c.l.bf16 %v3249_v40  ;;  %v501_v33 = vld [vmem:[#allocation2 + $0xd8] sm:$0xff]  ;;  %v502_v36 = vld [vmem:[#allocation2 + $0xe0] sm:$0xff]  ;;  %v339_v52 = vmul.f32 %v3154_v48, %v3982_v18 }
  0x4b   : > { %3604 = vmatpush3.bf16.msra.mxu1 %v3855_v27  ;;  %v4341_v27 = vpack.c.bf16 %v618_v23, %v617_v6  ;;  %v623_v7 = vld [vmem:[#allocation2 + $0x92] sm:$0xff]  ;;  %v3870_v23 = vld [vmem:[%s4944_s1 + $0x208] sm:$0xff]  }
  0x4c   : > { %3605 = vmatprep.subr.bf16.mxu1 %v3858_v30  ;;  %v400_v12 = vmax.f32 %v4317_v17, 0.0  ;;  %v4347_v30 = vpack.c.bf16 %v394_v29, %v393_v28  ;;  %v4359_v28 = vpack.c.bf16 %v500_v41, %v499_v37  ;;  %v4361_v29 = vpack.c.bf16 %v620_v15, %v619_v42  ;;  %v627_v17 = vld [vmem:[#allocation2 + $0xc2] sm:$0xff]  ;;  %v699_v40 = vld [vmem:[#allocation2 + $0x138] sm:$0xff]  ;;  %v3880_v48 = vld [vmem:[%s4944_s1 + $0x230] sm:$0xff]  }
  0x4d   : > { %3504 = vmatpush3.bf16.msra.mxu0 %v3865_v55  ;;  %v338_v51 = vmul.f32 %v3153_v47, %v3982_v18  ;;  %v4382_v55 = vpack.c.bf16 %v502_v36, %v501_v33  ;;  %v4400_v54 = vpack.c.bf16 %v624_v53, %v623_v7  ;;  %v697_v41 = vld [vmem:[#allocation2 + $0x120] sm:$0xff]  ;;  %v698_v42 = vld [vmem:[#allocation2 + $0x128] sm:$0xff] }
  0x4e   : > { %1853 = vmatmul.mubr.bf16.gmra.mrb[20].mxu0 %v4239_v38  ;;  %1982 = vmatmul.mubr.bf16.gmra.mrb[20].mxu1 %v4245_v43  ;;  %472 = vst [vmem:[#allocation2 + $0x111] sm:$0xff] %v400_v12  ;;  %v3878_v15 = vld [vmem:[%s4944_s1 + $0x220] sm:$0xff]  }
  0x4f   : > { %1860 = vmatprep.mubr.bf16.mxu0 %v4251_v44  ;;  %1989 = vmatprep.mubr.bf16.mxu1 %v4127_v26  ;;  %v328_v26 = vmul.f32 %v3133_v0, %v3982_v18  ;;  %v377_v56 = vadd.f32 %v3987_v19, %v338_v51  ;;  %v4392_v0 = vpack.c.bf16 %v398_v62, %v397_v58  ;;  %v700_v47 = vld [vmem:[#allocation2 + $0x140] sm:$0xff] }
  0x50   : > { %3606 = vmatpush3.bf16.msra.mxu1 %v3859_v45  ;;  %3737 = vmatprep.subr.bf16.mxu0 %v4311_v13  ;;  %v4367_v45 = vpack.c.bf16 %v396_v49, %v395_v46  ;;  %v621_v46 = vld [vmem:[#allocation2 + $0x7a] sm:$0xff]  ;;  %v622_v49 = vld [vmem:[#allocation2 + $0x82] sm:$0xff]  ;;  %v4463_v36 = vpack.c.bf16 %v700_v47, %v699_v40 }
  0x51   : > { %3607 = vmatprep.subr.bf16.mxu1 %v3862_v50  ;;  %v4314_v14 = vadd.f32 %v3987_v19, %v328_v26  ;;  %v3875_v50 = vld [vmem:[%s4944_s1 + $0x1f8] sm:$0xff]   ;;  %v4386_v34 = vpack.c.bf16 %v622_v49, %v621_v46  ;;  %v409_v1 = vmax.f32 %v377_v56, 0.0  ;;  %v503_v18 = vld [vmem:[#allocation2 + $0xf0] sm:$0xff]  ;;  %v635_v46 = vld [vmem:[#allocation2 + $0x122] sm:$0xff] }
  0x52   : > { %v636_v49 = vld [vmem:[#allocation2 + $0x12a] sm:$0xff]  ;;  %v638_v56 = vld [vmem:[#allocation2 + $0x142] sm:$0xff] }
  0x53   : > { %v399_v11 = vmax.f32 %v4314_v14, 0.0  ;;  %481 = vst [vmem:[#allocation2 + $0x181] sm:$0xff] %v409_v1  ;;  %v4472_v51 = vpack.c.bf16 %v636_v49, %v635_v46 }
  0x54   : > { %3608 = vmatpush3.bf16.msra.mxu1 %v3863_v57  ;;  %v378_v57 = vadd.f32 %v3987_v19, %v339_v52  ;;  %v504_v19 = vld [vmem:[#allocation2 + $0xf8] sm:$0xff] }
  0x55   : > { %3609 = vmatprep.subr.bf16.mxu1 %v3866_v8  ;;  %471 = vst [vmem:[#allocation2 + $0x109] sm:$0xff] %v399_v11  ;;  %v4398_v8 = vpack.c.bf16 %v504_v19, %v503_v18  ;;  %v4406_v58 = vpack.c.bf16 %v400_v12, %v399_v11  ;;  %v628_v11 = vld [vmem:[#allocation2 + $0xca] sm:$0xff]  ;;  %v637_v52 = vld [vmem:[#allocation2 + $0x13a] sm:$0xff] }
  0x56   : > { %1861 = vmatmul.mubr.bf16.gmra.mrb[24].mxu0 %v4289_v3  ;;  %1990 = vmatmul.mubr.bf16.gmra.mrb[24].mxu1 %v4300_v9  ;;  %v410_v26 = vmax.f32 %v378_v57, 0.0  ;;  %v4422_v12 = vpack.c.bf16 %v628_v11, %v627_v17  ;;  %v4478_v57 = vpack.c.bf16 %v638_v56, %v637_v52  ;;  %v868_v17 = vld [vmem:[#allocation2 + $0x30] sm:$0xff]  ;;  %v869_v11 = vld [vmem:[#allocation2 + $0x38] sm:$0xff] }
  0x57   : > { %1868 = vmatprep.mubr.bf16.mxu0 %v4306_v10  ;;  %1997 = vmatprep.mubr.bf16.mxu1 %v4182_v61 }
  0x58   : > { %3610 = vmatpush3.bf16.msra.mxu1 %v3868_v5  ;;  %482 = vst [vmem:[#allocation2 + $0x189] sm:$0xff] %v410_v26  ;;  %v626_v5 = vld [vmem:[#allocation2 + $0xb2] sm:$0xff]  ;;  %v4416_v14 = vpack.c.bf16 %v410_v26, %v409_v1  ;;  %v640_v26 = vld [vmem:[#allocation2 + $0x15a] sm:$0xff] }
  0x59   : > { %3611 = vmatprep.subr.bf16.mxu1 %v3869_v22  ;;  %v4414_v22 = vpack.c.bf16 %v626_v5, %v625_v21  ;;  %v639_v1 = vld [vmem:[#allocation2 + $0x152] sm:$0xff] }
  0x5a   : > { %v705_v18 = vld [vmem:[#allocation2 + $0x180] sm:$0xff]  ;;  %v4484_v7 = vpack.c.bf16 %v640_v26, %v639_v1 }
  0x5c   : > { %3612 = vmatpush3.bf16.msra.mxu1 %v3871_v25  ;;  %v505_v62 = vld [vmem:[#allocation2 + $0x108] sm:$0xff]  ;;  %v506_v20 = vld [vmem:[#allocation2 + $0x110] sm:$0xff] }
  0x5d   : > { %3613 = vmatprep.subr.bf16.mxu1 %v3872_v59  ;;  %v4412_v6 = vpack.c.bf16 %v506_v20, %v505_v62  ;;  %v630_v25 = vld [vmem:[#allocation2 + $0xe2] sm:$0xff]  ;;  %v3873_v59 = vld [vmem:[%s4944_s1 + $0x210] sm:$0xff]  }
  0x5e   : > { %1869 = vmatmul.mubr.bf16.gmra.mrb[28].mxu0 %v4336_v24  ;;  %1998 = vmatmul.mubr.bf16.gmra.mrb[28].mxu1 %v4341_v27  ;;  %v642_v62 = vld [vmem:[#allocation2 + $0x172] sm:$0xff] }
  0x5f   : > { %1876 = vmatprep.mubr.bf16.mxu0 %v4347_v30  ;;  %2005 = vmatprep.mubr.bf16.mxu1 %v4239_v38  ;;  %v706_v19 = vld [vmem:[#allocation2 + $0x188] sm:$0xff]  ;;  %v932_v20 = vld [vmem:[#allocation2 + $0x31] sm:$0xff] }
  0x60   : > { %3614 = vmatpush3.bf16.msra.mxu1 %v3874_v16  ;;  %v4486_v53 = vpack.c.bf16 %v706_v19, %v705_v18  ;;  %v833_v40 = vld [vmem:[#allocation2 + $0x182] sm:$0xff] }
  0x61   : > { %3615 = vmatprep.subr.bf16.mxu1 %v3875_v50  ;;  %v4449_v50 = vpack.c.bf16 %v698_v42, %v697_v41  ;;  %v761_v41 = vld [vmem:[#allocation2 + $0x121] sm:$0xff]  ;;  %v762_v42 = vld [vmem:[#allocation2 + $0x129] sm:$0xff] }
  0x64   : > { %3616 = vmatpush3.bf16.msra.mxu1 %v3877_v39  ;;  %v634_v39 = vld [vmem:[#allocation2 + $0x112] sm:$0xff] }
  0x66   : > { %1877 = vmatmul.mubr.bf16.gmra.mrb[32].mxu0 %v4359_v28  ;;  %2006 = vmatmul.mubr.bf16.gmra.mrb[32].mxu1 %v4361_v29 }
  0x67   : > { %1884 = vmatprep.mubr.bf16.mxu0 %v4367_v45  ;;  %2013 = vmatprep.mubr.bf16.mxu1 %v4289_v3 }
  0x6e   : > { %1885 = vmatmul.mubr.bf16.gmra.mrb[36].mxu0 %v4382_v55  ;;  %2014 = vmatmul.mubr.bf16.gmra.mrb[36].mxu1 %v4386_v34 }
  0x6f   : > { %1892 = vmatprep.mubr.bf16.mxu0 %v4392_v0  ;;  %2021 = vmatprep.mubr.bf16.mxu1 %v4336_v24 }
  0x76   : > { %1893 = vmatmul.mubr.bf16.gmra.mrb[40].mxu0 %v4398_v8  ;;  %2022 = vmatmul.mubr.bf16.gmra.mrb[40].mxu1 %v4400_v54 }
  0x77   : > { %1900 = vmatprep.mubr.bf16.mxu0 %v4406_v58  ;;  %2029 = vmatprep.mubr.bf16.mxu1 %v4359_v28 }
  0x7e   : > { %1901 = vmatmul.mubr.bf16.gmra.mrb[44].mxu0 %v4412_v6  ;;  %2030 = vmatmul.mubr.bf16.gmra.mrb[44].mxu1 %v4414_v22 }
  0x7f   : > { %2134 = vmatprep.mubr.bf16.mxu0 %v4245_v43  ;;  %2037 = vmatprep.mubr.bf16.mxu1 %v4382_v55  ;;  %v629_v43 = vld [vmem:[#allocation2 + $0xda] sm:$0xff] }
  0x80   : > { %v4435_v37 = vpack.c.bf16 %v630_v25, %v629_v43  ;;  %v935_v43 = vld [vmem:[#allocation2 + $0x51] sm:$0xff]  ;;  %v900_v25 = vpack.c.bf16 %v869_v11, %v868_v17 }
  0x86   : > { %2135 = vmatmul.mubr.bf16.vlgmr.msra.gmra.mrb[48].mxu0 %v4032_v60  ;;  %2038 = vmatmul.mubr.bf16.gmra.mrb[48].mxu1 %v4422_v12  ;;  %v3876_v60 = vld [vmem:[%s4944_s1 + $0x218] sm:$0xff]  }
  0x87   : > { %3738 = vmatpush3.bf16.msra.mxu0 %v4311_v13  ;;  %2045 = vmatprep.mubr.bf16.mxu1 %v4398_v8  ;;  %v632_v13 = vld [vmem:[#allocation2 + $0xfa] sm:$0xff] }
  0x88   : > { %2142 = vmatprep.mubr.bf16.mxu0 %v4300_v9  ;;  %3739 = vmatprep.subr.bf16.mxu0 %v3870_v23  ;;  %v631_v9 = vld [vmem:[#allocation2 + $0xf2] sm:$0xff] }
  0x89   : > { %v4447_v16 = vpack.c.bf16 %v632_v13, %v631_v9  ;;  %v871_v9 = vld [vmem:[#allocation2 + $0x50] sm:$0xff] }
  0x8b   : > { %3740 = vmatpush3.bf16.msra.mxu0 %v3870_v23  ;;  %v934_v23 = vld [vmem:[#allocation2 + $0x49] sm:$0xff] }
  0x8c   : > { %3741 = vmatprep.subr.bf16.mxu0 %v3873_v59 }
  0x8e   : > { %2143 = vmatmul.mubr.bf16.gmra.mrb[52].mxu0 %v4066_v31  ;;  %2046 = vmatmul.mubr.bf16.gmra.mrb[52].mxu1 %v4435_v37  ;;  %v3879_v31 = vld [vmem:[%s4944_s1 + $0x228] sm:$0xff]  }
  0x8f   : > { %2150 = vmatprep.mubr.bf16.mxu0 %v4341_v27  ;;  %2053 = vmatprep.mubr.bf16.mxu1 %v4412_v6  ;;  %v633_v27 = vld [vmem:[#allocation2 + $0x10a] sm:$0xff] }
  0x90   : > { %3742 = vmatpush3.bf16.msra.mxu0 %v3873_v59  ;;  %v4461_v33 = vpack.c.bf16 %v634_v39, %v633_v27  ;;  %v965_v59 = vpack.c.bf16 %v935_v43, %v934_v23 }
  0x91   : > { %3743 = vmatprep.subr.bf16.mxu0 %v3876_v60 }
  0x94   : > { %3744 = vmatpush3.bf16.msra.mxu0 %v3876_v60  ;;  %v870_v60 = vld [vmem:[#allocation2 + $0x48] sm:$0xff] }
  0x95   : > { %3745 = vmatprep.subr.bf16.mxu0 %v3878_v15  ;;  %v901_v13 = vpack.c.bf16 %v871_v9, %v870_v60 }
  0x96   : > { %2151 = vmatmul.mubr.bf16.gmra.mrb[56].mxu0 %v4098_v63  ;;  %2054 = vmatmul.mubr.bf16.gmra.mrb[56].mxu1 %v4447_v16  ;;  %v3881_v63 = vld [vmem:[%s4944_s1 + $0x238] sm:$0xff]  }
  0x97   : > { %2158 = vmatprep.mubr.bf16.mxu0 %v4361_v29  ;;  %2061 = vmatprep.mubr.bf16.mxu1 %v4449_v50 }
  0x98   : > { %3746 = vmatpush3.bf16.msra.mxu0 %v3878_v15  ;;  %v4506_v15 = vpack.c.bf16 %v762_v42, %v761_v41 }
  0x99   : > { %3747 = vmatprep.subr.bf16.mxu0 %v3879_v31 }
  0x9c   : > { %3748 = vmatpush3.bf16.msra.mxu0 %v3879_v31  ;;  %v763_v31 = vld [vmem:[#allocation2 + $0x139] sm:$0xff] }
  0x9d   : > { %3749 = vmatprep.subr.bf16.mxu0 %v3880_v48 }
  0x9e   : > { %2159 = vmatmul.mubr.bf16.gmra.mrb[60].mxu0 %v4140_v35  ;;  %2062 = vmatmul.mubr.bf16.gmra.mrb[60].mxu1 %v4461_v33 }
  0x9f   : > { %2166 = vmatprep.mubr.bf16.mxu0 %v4386_v34  ;;  %2069 = vmatprep.mubr.bf16.mxu1 %v4463_v36 }
  0xa0   : > { %3750 = vmatpush3.bf16.msra.mxu0 %v3880_v48 }
  0xa1   : > { %3751 = vmatprep.subr.bf16.mxu0 %v3881_v63 }
  0xa4   : > { %3752 = vmatpush3.bf16.msra.mxu0 %v3881_v63 }
  0xa6   : > { %2167 = vmatmul.mubr.bf16.gmra.mrb[64].mxu0 %v4187_v4  ;;  %2070 = vmatmul.mubr.bf16.gmra.mrb[64].mxu1 %v4472_v51 }
  0xa7   : > { %2174 = vmatprep.mubr.bf16.mxu0 %v4400_v54  ;;  %2077 = vmatprep.mubr.bf16.mxu1 %v4102_v2  ;;  %v641_v2 = vld [vmem:[#allocation2 + $0x16a] sm:$0xff] }
  0xa8   : > { %v4492_v21 = vpack.c.bf16 %v642_v62, %v641_v2 }
  0xae   : > { %2175 = vmatmul.mubr.bf16.gmra.mrb[68].mxu0 %v4251_v44  ;;  %2078 = vmatmul.mubr.bf16.gmra.mrb[68].mxu1 %v4478_v57 }
  0xaf   : > { %2182 = vmatprep.mubr.bf16.mxu0 %v4414_v22  ;;  %2085 = vmatprep.mubr.bf16.mxu1 %v4135_v32  ;;  %v933_v32 = vld [vmem:[#allocation2 + $0x39] sm:$0xff] }
  0xb0   : > { %v964_v5 = vpack.c.bf16 %v933_v32, %v932_v20  ;;  %v999_v20 = vld [vmem:[#allocation2 + $0x52] sm:$0xff] }
  0xb6   : > { %2183 = vmatmul.mubr.bf16.gmra.mrb[72].mxu0 %v4306_v10  ;;  %2086 = vmatmul.mubr.bf16.gmra.mrb[72].mxu1 %v4484_v7 }
  0xb7   : > { %2190 = vmatprep.mubr.bf16.mxu0 %v4422_v12  ;;  %2093 = vmatprep.mubr.bf16.mxu1 %v4486_v53 }
  0xbe   : > { %2191 = vmatmul.mubr.bf16.gmra.mrb[76].mxu0 %v4347_v30  ;;  %2094 = vmatmul.mubr.bf16.gmra.mrb[76].mxu1 %v4492_v21 }
  0xbf   : > { %2198 = vmatprep.mubr.bf16.mxu0 %v4435_v37  ;;  %2295 = vmatprep.mubr.bf16.mxu1 %v964_v5 }
  0xc6   : > { %2199 = vmatmul.mubr.bf16.gmra.mrb[80].mxu0 %v4367_v45  ;;  %2296 = vmatmul.mubr.bf16.vlgmr.msra.gmra.mrb[80].mxu1 %v900_v25 }
  0xc7   : > { %2206 = vmatprep.mubr.bf16.mxu0 %v4447_v16  ;;  %2303 = vmatprep.mubr.bf16.mxu1 %v965_v59 }
  0xce   : > { %2207 = vmatmul.mubr.bf16.gmra.mrb[84].mxu0 %v4392_v0  ;;  %2304 = vmatmul.mubr.bf16.gmra.mrb[84].mxu1 %v901_v13 }
  0xcf   : > { %2214 = vmatprep.mubr.bf16.mxu0 %v4461_v33  ;;  %2311 = vmatprep.mubr.bf16.mxu1 %v4140_v35  ;;  %v764_v35 = vld [vmem:[#allocation2 + $0x141] sm:$0xff] }
  0xd0   : > { %v4512_v27 = vpack.c.bf16 %v764_v35, %v763_v31 }
  0xd6   : > { %2215 = vmatmul.mubr.bf16.gmra.mrb[88].mxu0 %v4406_v58  ;;  %2312 = vmatmul.mubr.bf16.gmra.mrb[88].mxu1 %v4182_v61  ;;  %v765_v61 = vld [vmem:[#allocation2 + $0x151] sm:$0xff] }
  0xd7   : > { %2222 = vmatprep.mubr.bf16.mxu0 %v4472_v51  ;;  %2319 = vmatprep.mubr.bf16.mxu1 %v4187_v4  ;;  %v766_v4 = vld [vmem:[#allocation2 + $0x159] sm:$0xff] }
  0xd8   : > { %v4518_v39 = vpack.c.bf16 %v766_v4, %v765_v61 }
  0xde   : > { %2223 = vmatmul.mubr.bf16.gmra.mrb[92].mxu0 %v4506_v15  ;;  %2320 = vmatmul.mubr.bf16.gmra.mrb[92].mxu1 %v4239_v38  ;;  %v767_v38 = vld [vmem:[#allocation2 + $0x169] sm:$0xff] }
  0xdf   : > { %2230 = vmatprep.mubr.bf16.mxu0 %v4478_v57  ;;  %2327 = vmatprep.mubr.bf16.mxu1 %v4251_v44  ;;  %v768_v44 = vld [vmem:[#allocation2 + $0x171] sm:$0xff] }
  0xe0   : > { %v4524_v47 = vpack.c.bf16 %v768_v44, %v767_v38 }
  0xe6   : > { %2231 = vmatmul.mubr.bf16.gmra.mrb[96].mxu0 %v4512_v27  ;;  %2328 = vmatmul.mubr.bf16.gmra.mrb[96].mxu1 %v4289_v3  ;;  %v834_v3 = vld [vmem:[#allocation2 + $0x18a] sm:$0xff] }
  0xe7   : > { %2238 = vmatprep.mubr.bf16.mxu0 %v4484_v7  ;;  %2335 = vmatprep.mubr.bf16.mxu1 %v4306_v10  ;;  %v4526_v48 = vpack.c.bf16 %v834_v3, %v833_v40  ;;  %v996_v10 = vld [vmem:[#allocation2 + $0x32] sm:$0xff] }
  0xee   : > { %2239 = vmatmul.mubr.bf16.gmra.mrb[100].mxu0 %v4518_v39  ;;  %2336 = vmatmul.mubr.bf16.gmra.mrb[100].mxu1 %v4336_v24  ;;  %v997_v24 = vld [vmem:[#allocation2 + $0x3a] sm:$0xff] }
  0xef   : > { %2246 = vmatprep.mubr.bf16.mxu0 %v4492_v21  ;;  %2343 = vmatprep.mubr.bf16.mxu1 %v4347_v30  ;;  %v1028_v1 = vpack.c.bf16 %v997_v24, %v996_v10 }
  0xf6   : > { %2247 = vmatmul.mubr.bf16.gmra.mrb[104].mxu0 %v4524_v47  ;;  %2344 = vmatmul.mubr.bf16.gmra.mrb[104].mxu1 %v4359_v28 }
  0xf7   : > { %2254 = vmatprep.mubr.bf16.mxu0 %v4526_v48  ;;  %2351 = vmatprep.mubr.bf16.mxu1 %v4367_v45  ;;  %v998_v45 = vld [vmem:[#allocation2 + $0x4a] sm:$0xff] }
  0xf8   : > { %v1029_v11 = vpack.c.bf16 %v999_v20, %v998_v45 }
  0xf9   : > { %v3281_v63 = vpop.f32.mrb[0].mxu0  ;;  %v3353_v46 = vpop.f32.mrb[0].mxu1 }
  0xfa   : > { %v3282_v49 = vpop.f32.mrb[1].mxu0  ;;  %v3354_v52 = vpop.f32.mrb[1].mxu1 }
  0xfb   : > { %v4532_v30 = vadd.f32 %v3282_v49, %v3281_v63  ;;  %v3284_v56 = vpop.f32.mrb[2].mxu0  ;;  %v4534_v26 = vadd.f32 %v3354_v52, %v3353_v46  ;;  %v3356_v18 = vpop.f32.mrb[2].mxu1 }
  0xfc   : > { %v3285_v19 = vpop.f32.mrb[3].mxu0  ;;  %v3357_v28 = vpop.f32.mrb[3].mxu1 }
  0xfd   : > { %v4536_v2 = vadd.f32 %v3285_v19, %v3284_v56  ;;  %v4538_v62 = vadd.f32 %v3357_v28, %v3356_v18 }
  0xfe   : > { %2255 = vmatmul.mubr.bf16.gmra.mrb[108].mxu0 %v4416_v14  ;;  %2352 = vmatmul.mubr.bf16.gmra.mrb[108].mxu1 %v4382_v55 }
  0xff   : > { %3753 = vmatprep.mubr.bf16.mxu0 %v1028_v1  ;;  %2359 = vmatprep.mubr.bf16.mxu1 %v4392_v0 }
 0x101   : > { %v3287_v32 = vpop.f32.mrb[4].mxu0  ;;  %v3359_v5 = vpop.f32.mrb[4].mxu1 }
 0x102   : > { %v3288_v17 = vpop.f32.mrb[5].mxu0  ;;  %v3360_v43 = vpop.f32.mrb[5].mxu1 }
 0x103   : > { %v4543_v23 = vadd.f32 %v3288_v17, %v3287_v32  ;;  %v3290_v25 = vpop.f32.mrb[6].mxu0  ;;  %v4545_v59 = vadd.f32 %v3360_v43, %v3359_v5  ;;  %v3362_v60 = vpop.f32.mrb[6].mxu1 }
 0x104   : > { %v3291_v9 = vpop.f32.mrb[7].mxu0  ;;  %v3363_v55 = vpop.f32.mrb[7].mxu1 }
 0x105   : > { %v4547_v13 = vadd.f32 %v3291_v9, %v3290_v25  ;;  %v4549_v41 = vadd.f32 %v3363_v55, %v3362_v60  ;;  %v893_v25 = vld [vmem:[#allocation2 + $0x158] sm:$0xff] }
 0x106   : > { %3754 = vmatmul.mubr.bf16.vlgmr.msra.gmra.mrb[112].mxu0 %v1029_v11  ;;  %2360 = vmatmul.mubr.bf16.gmra.mrb[112].mxu1 %v4398_v8 }
 0x107   : > { %3757 = vmatprep.mubr.bf16.mxu0 %v4361_v29  ;;  %2367 = vmatprep.mubr.bf16.mxu1 %v4406_v58 }
 0x109   : > { %v3293_v0 = vpop.f32.mrb[8].mxu0  ;;  %v3365_v42 = vpop.f32.mrb[8].mxu1 }
 0x10a   : > { %v3294_v31 = vpop.f32.mrb[9].mxu0  ;;  %v3366_v61 = vpop.f32.mrb[9].mxu1 }
 0x10b   : > { %v4554_v35 = vadd.f32 %v3294_v31, %v3293_v0  ;;  %v3296_v4 = vpop.f32.mrb[10].mxu0  ;;  %v4556_v38 = vadd.f32 %v3366_v61, %v3365_v42  ;;  %v3368_v44 = vpop.f32.mrb[10].mxu1 }
 0x10c   : > { %v3297_v40 = vpop.f32.mrb[11].mxu0  ;;  %v3369_v10 = vpop.f32.mrb[11].mxu1 }
 0x10d   : > { %v4558_v3 = vadd.f32 %v3297_v40, %v3296_v4  ;;  %v4560_v24 = vadd.f32 %v3369_v10, %v3368_v44  ;;  %v894_v40 = vld [vmem:[#allocation2 + $0x168] sm:$0xff]  ;;  %v895_v10 = vld [vmem:[#allocation2 + $0x170] sm:$0xff] }
 0x10e   : > { %3758 = vmatmul.mubr.bf16.gmra.mrb[116].mxu0 %v4386_v34  ;;  %2368 = vmatmul.mubr.bf16.gmra.mrb[116].mxu1 %v4412_v6 }
 0x10f   : > { %3761 = vmatprep.mubr.bf16.mxu0 %v4400_v54  ;;  %2375 = vmatprep.mubr.bf16.mxu1 %v4506_v15 }
 0x111   : > { %v3299_v29 = vpop.f32.mrb[12].mxu0  ;;  %v3371_v8 = vpop.f32.mrb[12].mxu1 }
 0x112   : > { %v3300_v58 = vpop.f32.mrb[13].mxu0  ;;  %v3372_v46 = vpop.f32.mrb[13].mxu1 }
 0x113   : > { %v4566_v63 = vadd.f32 %v3300_v58, %v3299_v29  ;;  %v3302_v49 = vpop.f32.mrb[14].mxu0  ;;  %v4568_v52 = vadd.f32 %v3372_v46, %v3371_v8  ;;  %v3374_v56 = vpop.f32.mrb[14].mxu1 }
 0x114   : > { %v3303_v1 = vpop.f32.mrb[15].mxu0  ;;  %v3375_v34 = vpop.f32.mrb[15].mxu1 }
 0x115   : > { %v4570_v18 = vadd.f32 %v3303_v1, %v3302_v49  ;;  %v4572_v19 = vadd.f32 %v3375_v34, %v3374_v56  ;;  %v913_v56 = vpack.c.bf16 %v895_v10, %v894_v40 }
 0x116   : > { %3762 = vmatmul.mubr.bf16.gmra.mrb[120].mxu0 %v4414_v22  ;;  %2376 = vmatmul.mubr.bf16.gmra.mrb[120].mxu1 %v4449_v50 }
 0x117   : > { %3765 = vmatprep.mubr.bf16.mxu0 %v4422_v12  ;;  %2383 = vmatprep.mubr.bf16.mxu1 %v4512_v27  ;;  %v892_v27 = vld [vmem:[#allocation2 + $0x150] sm:$0xff] }
 0x118   : > { %v912_v31 = vpack.c.bf16 %v893_v25, %v892_v27 }
 0x119   : > { %v3305_v54 = vpop.f32.mrb[16].mxu0  ;;  %v3393_v6 = vpop.f32.mrb[16].mxu1 }
 0x11a   : > { %v3306_v15 = vpop.f32.mrb[17].mxu0  ;;  %v3394_v45 = vpop.f32.mrb[17].mxu1 }
 0x11b   : > { %v4578_v28 = vadd.f32 %v3306_v15, %v3305_v54  ;;  %v3308_v20 = vpop.f32.mrb[18].mxu0  ;;  %v3395_v32 = vadd.f32 %v3394_v45, %v3393_v6  ;;  %v3396_v5 = vpop.f32.mrb[18].mxu1  ;;  %v962_v45 = vld [vmem:[#allocation2 + $0x199] sm:$0xff] }
 0x11c   : > { %v3309_v17 = vpop.f32.mrb[19].mxu0  ;;  %v3397_v43 = vpop.f32.mrb[19].mxu1 }
 0x11d   : > { %v4580_v11 = vadd.f32 %v3309_v17, %v3308_v20  ;;  %v4583_v22 = vadd.f32 %v3395_v32, %v4532_v30  ;;  %v3398_v50 = vadd.f32 %v3397_v43, %v3396_v5  ;;  %v963_v20 = vld [vmem:[#allocation2 + $0x1a1] sm:$0xff] }
 0x11e   : > { %3766 = vmatmul.mubr.bf16.gmra.mrb[124].mxu0 %v4435_v37  ;;  %2384 = vmatmul.mubr.bf16.gmra.mrb[124].mxu1 %v4463_v36  ;;  %v979_v25 = vpack.c.bf16 %v963_v20, %v962_v45 }
 0x11f   : > { %3769 = vmatprep.mubr.bf16.mxu0 %v4447_v16  ;;  %v4589_v12 = vadd.f32 %v3398_v50, %v4536_v2  ;;  %2391 = vmatprep.mubr.bf16.mxu1 %v4518_v39 }
 0x121   : > { %v3311_v60 = vpop.f32.mrb[20].mxu0  ;;  %v3399_v9 = vpop.f32.mrb[20].mxu1 }
 0x122   : > { %v3312_v55 = vpop.f32.mrb[21].mxu0  ;;  %v3400_v30 = vpop.f32.mrb[21].mxu1 }
 0x123   : > { %v4592_v0 = vadd.f32 %v3312_v55, %v3311_v60  ;;  %v3314_v42 = vpop.f32.mrb[22].mxu0  ;;  %v3401_v37 = vadd.f32 %v3400_v30, %v3399_v9  ;;  %v3402_v61 = vpop.f32.mrb[22].mxu1  ;;  %v1026_v9 = vld [vmem:[#allocation2 + $0x19a] sm:$0xff]  ;;  %v1027_v55 = vld [vmem:[#allocation2 + $0x1a2] sm:$0xff] }
 0x124   : > { %v3315_v36 = vpop.f32.mrb[23].mxu0  ;;  %v3403_v16 = vpop.f32.mrb[23].mxu1 }
 0x125   : > { %v4594_v4 = vadd.f32 %v3315_v36, %v3314_v42  ;;  %v4597_v2 = vadd.f32 %v3401_v37, %v4543_v23  ;;  %v3404_v39 = vadd.f32 %v3403_v16, %v3402_v61  ;;  %v1043_v61 = vpack.c.bf16 %v1027_v55, %v1026_v9 }
 0x126   : > { %3770 = vmatmul.mubr.bf16.gmra.mrb[128].mxu0 %v4461_v33  ;;  %2392 = vmatmul.mubr.bf16.gmra.mrb[128].mxu1 %v912_v31 }
 0x127   : > { %3773 = vmatprep.mubr.bf16.mxu0 %v4472_v51  ;;  %v4602_v44 = vadd.f32 %v3404_v39, %v4547_v13  ;;  %2399 = vmatprep.mubr.bf16.mxu1 %v4524_v47  ;;  %v3882_v39 = vld [vmem:[#allocation2] sm:$0xff] }
 0x129   : > { %v3317_v29 = vpop.f32.mrb[24].mxu0  ;;  %v3405_v8 = vpop.f32.mrb[24].mxu1 }
 0x12a   : > { %v3318_v58 = vpop.f32.mrb[25].mxu0  ;;  %v3406_v23 = vpop.f32.mrb[25].mxu1 }
 0x12b   : > { %v4605_v46 = vadd.f32 %v3318_v58, %v3317_v29  ;;  %v3320_v49 = vpop.f32.mrb[26].mxu0  ;;  %v3407_v1 = vadd.f32 %v3406_v23, %v3405_v8  ;;  %v3408_v33 = vpop.f32.mrb[26].mxu1 }
 0x12c   : > { %v3321_v34 = vpop.f32.mrb[27].mxu0  ;;  %v3409_v51 = vpop.f32.mrb[27].mxu1 }
 0x12d   : > { %v4607_v54 = vadd.f32 %v3321_v34, %v3320_v49  ;;  %v4610_v13 = vadd.f32 %v3407_v1, %v4554_v35  ;;  %v3410_v47 = vadd.f32 %v3409_v51, %v3408_v33 }
 0x12e   : > { %3774 = vmatmul.mubr.bf16.gmra.mrb[132].mxu0 %v4478_v57  ;;  %2400 = vmatmul.mubr.bf16.gmra.mrb[132].mxu1 %v913_v56 }
 0x12f   : > { %3777 = vmatprep.mubr.bf16.mxu0 %v4484_v7  ;;  %v4615_v6 = vadd.f32 %v3410_v47, %v4558_v3  ;;  %2407 = vmatprep.mubr.bf16.mxu1 %v4416_v14 }
 0x131   : > { %v3323_v15 = vpop.f32.mrb[28].mxu0  ;;  %v3411_v32 = vpop.f32.mrb[28].mxu1 }
 0x132   : > { %v3324_v5 = vpop.f32.mrb[29].mxu0  ;;  %v3412_v35 = vpop.f32.mrb[29].mxu1 }
 0x133   : > { %v4618_v17 = vadd.f32 %v3324_v5, %v3323_v15  ;;  %v3326_v43 = vpop.f32.mrb[30].mxu0  ;;  %v3413_v50 = vadd.f32 %v3412_v35, %v3411_v32  ;;  %v3414_v27 = vpop.f32.mrb[30].mxu1 }
 0x134   : > { %v3327_v57 = vpop.f32.mrb[31].mxu0  ;;  %v3415_v7 = vpop.f32.mrb[31].mxu1 }
 0x135   : > { %v4620_v60 = vadd.f32 %v3327_v57, %v3326_v43  ;;  %v4623_v3 = vadd.f32 %v3413_v50, %v4566_v63  ;;  %v3416_v14 = vadd.f32 %v3415_v7, %v3414_v27 }
 0x136   : > { %3778 = vmatmul.mubr.bf16.gmra.mrb[136].mxu0 %v4492_v21  ;;  %2408 = vmatmul.mubr.bf16.gmra.mrb[136].mxu1 %v4486_v53  ;;  %v915_v21 = vpack.c.bf16 %v3882_v39, %v3882_v39 }
 0x137   : > { %3781 = vmatprep.mubr.bf16.mxu0 %v4526_v48  ;;  %v4629_v30 = vadd.f32 %v3416_v14, %v4570_v18  ;;  %2415 = vmatprep.mubr.bf16.mxu1 %v979_v25 }
 0x139   : > { %v3329_v42 = vpop.f32.mrb[32].mxu0  ;;  %v3417_v31 = vpop.f32.mrb[32].mxu1 }
 0x13a   : > { %v3330_v37 = vpop.f32.mrb[33].mxu0  ;;  %v3418_v63 = vpop.f32.mrb[33].mxu1 }
 0x13b   : > { %v4631_v36 = vadd.f32 %v3330_v37, %v3329_v42  ;;  %v3332_v16 = vpop.f32.mrb[34].mxu0  ;;  %v3419_v40 = vadd.f32 %v3418_v63, %v3417_v31  ;;  %v3420_v53 = vpop.f32.mrb[34].mxu1 }
 0x13c   : > { %v3333_v10 = vpop.f32.mrb[35].mxu0  ;;  %v3421_v29 = vpop.f32.mrb[35].mxu1 }
 0x13d   : > { %v4633_v48 = vadd.f32 %v3333_v10, %v3332_v16  ;;  %v4636_v18 = vadd.f32 %v3419_v40, %v4578_v28  ;;  %v3422_v8 = vadd.f32 %v3421_v29, %v3420_v53 }
 0x13e   : > { %3782 = vmatmul.mubr.bf16.gmra.mrb[140].mxu0 %v1043_v61  ;;  %2416 = vmatmul.mubr.bf16.gmra.mrb[140].mxu1 %v915_v21 }
 0x13f   : > { %v4639_v58 = vadd.f32 %v3422_v8, %v4580_v11 }
 0x141   : > { %v3335_v23 = vpop.f32.mrb[36].mxu0  ;;  %v3423_v49 = vpop.f32.mrb[36].mxu1 }
 0x142   : > { %v3336_v56 = vpop.f32.mrb[37].mxu0  ;;  %v3424_v33 = vpop.f32.mrb[37].mxu1 }
 0x143   : > { %v4641_v1 = vadd.f32 %v3336_v56, %v3335_v23  ;;  %v3338_v34 = vpop.f32.mrb[38].mxu0  ;;  %v3425_v51 = vadd.f32 %v3424_v33, %v3423_v49  ;;  %v3426_v47 = vpop.f32.mrb[38].mxu1 }
 0x144   : > { %v3339_v15 = vpop.f32.mrb[39].mxu0  ;;  %v3427_v28 = vpop.f32.mrb[39].mxu1 }
 0x145   : > { %v4643_v45 = vadd.f32 %v3339_v15, %v3338_v34  ;;  %v4646_v20 = vadd.f32 %v3425_v51, %v4592_v0  ;;  %v3428_v32 = vadd.f32 %v3427_v28, %v3426_v47 }
 0x147   : > { %v4649_v11 = vadd.f32 %v3428_v32, %v4594_v4 }
 0x149   : > { %v3341_v5 = vpop.f32.mrb[40].mxu0  ;;  %v3429_v35 = vpop.f32.mrb[40].mxu1 }
 0x14a   : > { %v3342_v43 = vpop.f32.mrb[41].mxu0  ;;  %v3430_v27 = vpop.f32.mrb[41].mxu1 }
 0x14b   : > { %v4651_v50 = vadd.f32 %v3342_v43, %v3341_v5  ;;  %v3344_v57 = vpop.f32.mrb[42].mxu0  ;;  %v3431_v25 = vadd.f32 %v3430_v27, %v3429_v35  ;;  %v3432_v7 = vpop.f32.mrb[42].mxu1 }
 0x14c   : > { %v3345_v14 = vpop.f32.mrb[43].mxu0  ;;  %v3433_v55 = vpop.f32.mrb[43].mxu1 }
 0x14d   : > { %v4653_v9 = vadd.f32 %v3345_v14, %v3344_v57  ;;  %v4656_v0 = vadd.f32 %v3431_v25, %v4605_v46  ;;  %v3434_v42 = vadd.f32 %v3433_v55, %v3432_v7 }
 0x14f   : > { %v4659_v4 = vadd.f32 %v3434_v42, %v4607_v54 }
 0x151   : > { %v3347_v31 = vpop.f32.mrb[44].mxu0  ;;  %v3435_v37 = vpop.f32.mrb[44].mxu1 }
 0x152   : > { %v3348_v61 = vpop.f32.mrb[45].mxu0  ;;  %v3436_v16 = vpop.f32.mrb[45].mxu1 }
 0x153   : > { %v4661_v63 = vadd.f32 %v3348_v61, %v3347_v31  ;;  %v3350_v39 = vpop.f32.mrb[46].mxu0  ;;  %v3437_v21 = vadd.f32 %v3436_v16, %v3435_v37  ;;  %v3438_v40 = vpop.f32.mrb[46].mxu1 }
 0x154   : > { %v3351_v53 = vpop.f32.mrb[47].mxu0  ;;  %v3439_v29 = vpop.f32.mrb[47].mxu1 }
 0x155   : > { %v4663_v10 = vadd.f32 %v3351_v53, %v3350_v39  ;;  %v4666_v46 = vadd.f32 %v3437_v21, %v4618_v17  ;;  %v3440_v8 = vadd.f32 %v3439_v29, %v3438_v40 }
 0x157   : > { %v4669_v54 = vadd.f32 %v3440_v8, %v4620_v60 }
 0x159   : > { %v3505_v23 = vpop.f32.mrb[48].mxu0  ;;  %v3441_v49 = vpop.f32.mrb[48].mxu1 }
 0x15a   : > { %v3506_v56 = vpop.f32.mrb[49].mxu0  ;;  %v3442_v33 = vpop.f32.mrb[49].mxu1 }
 0x15b   : > { %v3507_v34 = vadd.f32 %v3506_v56, %v3505_v23  ;;  %v3508_v51 = vpop.f32.mrb[50].mxu0  ;;  %v3443_v47 = vadd.f32 %v3442_v33, %v3441_v49  ;;  %v3444_v15 = vpop.f32.mrb[50].mxu1 }
 0x15c   : > { %v3509_v28 = vpop.f32.mrb[51].mxu0  ;;  %v3445_v5 = vpop.f32.mrb[51].mxu1 }
 0x15d   : > { %v4672_v32 = vadd.f32 %v3507_v34, %v4583_v22  ;;  %v3510_v35 = vadd.f32 %v3509_v28, %v3508_v51  ;;  %v4675_v17 = vadd.f32 %v3443_v47, %v4631_v36  ;;  %v3446_v43 = vadd.f32 %v3445_v5, %v3444_v15 }
 0x15f   : > { %v4678_v60 = vadd.f32 %v3510_v35, %v4589_v12  ;;  %v4681_v27 = vadd.f32 %v3446_v43, %v4633_v48 }
 0x161   : > { %v3511_v57 = vpop.f32.mrb[52].mxu0  ;;  %v3447_v25 = vpop.f32.mrb[52].mxu1 }
 0x162   : > { %v3512_v7 = vpop.f32.mrb[53].mxu0  ;;  %v3448_v14 = vpop.f32.mrb[53].mxu1 }
 0x163   : > { %v3513_v55 = vadd.f32 %v3512_v7, %v3511_v57  ;;  %v3514_v42 = vpop.f32.mrb[54].mxu0  ;;  %v3449_v22 = vadd.f32 %v3448_v14, %v3447_v25  ;;  %v3450_v31 = vpop.f32.mrb[54].mxu1 }
 0x164   : > { %v3515_v37 = vpop.f32.mrb[55].mxu0  ;;  %v3451_v36 = vpop.f32.mrb[55].mxu1 }
 0x165   : > { %v4684_v61 = vadd.f32 %v3513_v55, %v4597_v2  ;;  %v3516_v16 = vadd.f32 %v3515_v37, %v3514_v42  ;;  %v4687_v12 = vadd.f32 %v3449_v22, %v4641_v1  ;;  %v3452_v39 = vadd.f32 %v3451_v36, %v3450_v31 }
 0x167   : > { %v4690_v48 = vadd.f32 %v3516_v16, %v4602_v44  ;;  %v4693_v21 = vadd.f32 %v3452_v39, %v4643_v45 }
 0x169   : > { %v3517_v40 = vpop.f32.mrb[56].mxu0  ;;  %v3453_v53 = vpop.f32.mrb[56].mxu1 }
 0x16a   : > { %v3518_v29 = vpop.f32.mrb[57].mxu0  ;;  %v3454_v8 = vpop.f32.mrb[57].mxu1 }
 0x16b   : > { %v3519_v23 = vadd.f32 %v3518_v29, %v3517_v40  ;;  %v3520_v49 = vpop.f32.mrb[58].mxu0  ;;  %v3455_v2 = vadd.f32 %v3454_v8, %v3453_v53  ;;  %v3456_v56 = vpop.f32.mrb[58].mxu1 }
 0x16c   : > { %v3521_v33 = vpop.f32.mrb[59].mxu0  ;;  %v3457_v1 = vpop.f32.mrb[59].mxu1 }
 0x16d   : > { %v4696_v34 = vadd.f32 %v3519_v23, %v4610_v13  ;;  %v3522_v51 = vadd.f32 %v3521_v33, %v3520_v49  ;;  %v4699_v44 = vadd.f32 %v3455_v2, %v4651_v50  ;;  %v3458_v47 = vadd.f32 %v3457_v1, %v3456_v56 }
 0x16f   : > { %v4702_v45 = vadd.f32 %v3522_v51, %v4615_v6  ;;  %v4705_v15 = vadd.f32 %v3458_v47, %v4653_v9 }
 0x171   : > { %v3523_v28 = vpop.f32.mrb[60].mxu0  ;;  %v3459_v5 = vpop.f32.mrb[60].mxu1 }
 0x172   : > { %v3524_v35 = vpop.f32.mrb[61].mxu0  ;;  %v3460_v43 = vpop.f32.mrb[61].mxu1 }
 0x173   : > { %v3525_v57 = vadd.f32 %v3524_v35, %v3523_v28  ;;  %v3526_v25 = vpop.f32.mrb[62].mxu0  ;;  %v3461_v13 = vadd.f32 %v3460_v43, %v3459_v5  ;;  %v3462_v7 = vpop.f32.mrb[62].mxu1 }
 0x174   : > { %v3527_v14 = vpop.f32.mrb[63].mxu0  ;;  %v3463_v50 = vpop.f32.mrb[63].mxu1 }
 0x175   : > { %v4708_v55 = vadd.f32 %v3525_v57, %v4623_v3  ;;  %v3528_v42 = vadd.f32 %v3527_v14, %v3526_v25  ;;  %v4711_v6 = vadd.f32 %v3461_v13, %v4661_v63  ;;  %v3464_v22 = vadd.f32 %v3463_v50, %v3462_v7 }
 0x177   : > { %v4714_v9 = vadd.f32 %v3528_v42, %v4629_v30  ;;  %v4717_v31 = vadd.f32 %v3464_v22, %v4663_v10 }
 0x179   : > { %v3529_v37 = vpop.f32.mrb[64].mxu0  ;;  %v3465_v36 = vpop.f32.mrb[64].mxu1 }
 0x17a   : > { %v3530_v16 = vpop.f32.mrb[65].mxu0  ;;  %v3466_v39 = vpop.f32.mrb[65].mxu1 }
 0x17b   : > { %v3531_v40 = vadd.f32 %v3530_v16, %v3529_v37  ;;  %v3532_v53 = vpop.f32.mrb[66].mxu0  ;;  %v3467_v3 = vadd.f32 %v3466_v39, %v3465_v36  ;;  %v3468_v29 = vpop.f32.mrb[66].mxu1 }
 0x17c   : > { %v3533_v8 = vpop.f32.mrb[67].mxu0  ;;  %v3469_v63 = vpop.f32.mrb[67].mxu1 }
 0x17d   : > { %v4720_v23 = vadd.f32 %v3531_v40, %v4636_v18  ;;  %v3534_v49 = vadd.f32 %v3533_v8, %v3532_v53  ;;  %v4723_v30 = vadd.f32 %v3467_v3, %v4534_v26  ;;  %v3470_v2 = vadd.f32 %v3469_v63, %v3468_v29 }
 0x17f   : > { %v4726_v10 = vadd.f32 %v3534_v49, %v4639_v58  ;;  %v4729_v56 = vadd.f32 %v3470_v2, %v4538_v62 }
 0x181   : > { %v3535_v33 = vpop.f32.mrb[68].mxu0  ;;  %v3471_v1 = vpop.f32.mrb[68].mxu1 }
 0x182   : > { %v3536_v51 = vpop.f32.mrb[69].mxu0  ;;  %v3472_v47 = vpop.f32.mrb[69].mxu1 }
 0x183   : > { %v3537_v28 = vadd.f32 %v3536_v51, %v3535_v33  ;;  %v3538_v5 = vpop.f32.mrb[70].mxu0  ;;  %v3473_v18 = vadd.f32 %v3472_v47, %v3471_v1  ;;  %v3474_v35 = vpop.f32.mrb[70].mxu1 }
 0x184   : > { %v3539_v43 = vpop.f32.mrb[71].mxu0  ;;  %v3475_v26 = vpop.f32.mrb[71].mxu1 }
 0x185   : > { %v4732_v57 = vadd.f32 %v3537_v28, %v4646_v20  ;;  %v3540_v25 = vadd.f32 %v3539_v43, %v3538_v5  ;;  %v4735_v58 = vadd.f32 %v3473_v18, %v4545_v59  ;;  %v3476_v13 = vadd.f32 %v3475_v26, %v3474_v35 }
 0x187   : > { %v4738_v62 = vadd.f32 %v3540_v25, %v4649_v11  ;;  %v4741_v7 = vadd.f32 %v3476_v13, %v4549_v41 }
 0x189   : > { %v3541_v14 = vpop.f32.mrb[72].mxu0  ;;  %v3477_v50 = vpop.f32.mrb[72].mxu1 }
 0x18a   : > { %v3542_v42 = vpop.f32.mrb[73].mxu0  ;;  %v3478_v22 = vpop.f32.mrb[73].mxu1 }
 0x18b   : > { %v3543_v37 = vadd.f32 %v3542_v42, %v3541_v14  ;;  %v3544_v36 = vpop.f32.mrb[74].mxu0  ;;  %v3479_v20 = vadd.f32 %v3478_v22, %v3477_v50  ;;  %v3480_v16 = vpop.f32.mrb[74].mxu1 }
 0x18c   : > { %v3545_v39 = vpop.f32.mrb[75].mxu0  ;;  %v3481_v59 = vpop.f32.mrb[75].mxu1 }
 0x18d   : > { %v4744_v40 = vadd.f32 %v3543_v37, %v4656_v0  ;;  %v3546_v53 = vadd.f32 %v3545_v39, %v3544_v36  ;;  %v4747_v11 = vadd.f32 %v3479_v20, %v4556_v38  ;;  %v3482_v3 = vadd.f32 %v3481_v59, %v3480_v16 }
 0x18f   : > { %v4750_v41 = vadd.f32 %v3546_v53, %v4659_v4  ;;  %v4753_v29 = vadd.f32 %v3482_v3, %v4560_v24 }
 0x191   : > { %v3547_v8 = vpop.f32.mrb[76].mxu0  ;;  %v3483_v63 = vpop.f32.mrb[76].mxu1 }
 0x192   : > { %v3548_v49 = vpop.f32.mrb[77].mxu0  ;;  %v3484_v2 = vpop.f32.mrb[77].mxu1 }
 0x193   : > { %v3549_v33 = vadd.f32 %v3548_v49, %v3547_v8  ;;  %v3550_v1 = vpop.f32.mrb[78].mxu0  ;;  %v3485_v0 = vadd.f32 %v3484_v2, %v3483_v63  ;;  %v3486_v51 = vpop.f32.mrb[78].mxu1 }
 0x194   : > { %v3551_v47 = vpop.f32.mrb[79].mxu0  ;;  %v3487_v38 = vpop.f32.mrb[79].mxu1 }
 0x195   : > { %v4756_v28 = vadd.f32 %v3549_v33, %v4666_v46  ;;  %v3552_v5 = vadd.f32 %v3551_v47, %v3550_v1  ;;  %v4759_v4 = vadd.f32 %v3485_v0, %v4568_v52  ;;  %v3488_v18 = vadd.f32 %v3487_v38, %v3486_v51 }
 0x197   : > { %v4762_v24 = vadd.f32 %v3552_v5, %v4669_v54  ;;  %v4765_v35 = vadd.f32 %v3488_v18, %v4572_v19 }
 0x199   : > { %v3553_v43 = vpop.f32.mrb[80].mxu0  ;;  %v3617_v26 = vpop.f32.mrb[80].mxu1 }
 0x19a   : > { %v3554_v25 = vpop.f32.mrb[81].mxu0  ;;  %v3618_v14 = vpop.f32.mrb[81].mxu1 }
 0x19b   : > { %v3555_v13 = vadd.f32 %v3554_v25, %v3553_v43  ;;  %v3556_v50 = vpop.f32.mrb[82].mxu0  ;;  %v3619_v46 = vadd.f32 %v3618_v14, %v3617_v26  ;;  %v3620_v42 = vpop.f32.mrb[82].mxu1 }
 0x19c   : > { %v3557_v22 = vpop.f32.mrb[83].mxu0  ;;  %v3621_v36 = vpop.f32.mrb[83].mxu1 }
 0x19d   : > { %v4768_v37 = vadd.f32 %v3555_v13, %v4675_v17  ;;  %v3558_v52 = vadd.f32 %v3557_v22, %v3556_v50  ;;  %v3622_v20 = vadd.f32 %v3621_v36, %v3620_v42  ;;  %v4771_v54 = vadd.f32 %v3619_v46, %v4672_v32 }
 0x19f   : > { %v4774_v19 = vadd.f32 %v3558_v52, %v4681_v27  ;;  %v4777_v16 = vadd.f32 %v3622_v20, %v4678_v60 }
 0x1a1   : > { %v3559_v39 = vpop.f32.mrb[84].mxu0  ;;  %v3623_v59 = vpop.f32.mrb[84].mxu1 }
 0x1a2   : > { %v3560_v53 = vpop.f32.mrb[85].mxu0  ;;  %v3624_v8 = vpop.f32.mrb[85].mxu1 }
 0x1a3   : > { %v3561_v3 = vadd.f32 %v3560_v53, %v3559_v39  ;;  %v3562_v63 = vpop.f32.mrb[86].mxu0  ;;  %v3625_v17 = vadd.f32 %v3624_v8, %v3623_v59  ;;  %v3626_v49 = vpop.f32.mrb[86].mxu1 }
 0x1a4   : > { %v3563_v2 = vpop.f32.mrb[87].mxu0  ;;  %v3627_v1 = vpop.f32.mrb[87].mxu1 }
 0x1a5   : > { %v4780_v33 = vadd.f32 %v3561_v3, %v4687_v12  ;;  %v3564_v32 = vadd.f32 %v3563_v2, %v3562_v63  ;;  %v3628_v0 = vadd.f32 %v3627_v1, %v3626_v49  ;;  %v4783_v27 = vadd.f32 %v3625_v17, %v4684_v61 }
 0x1a7   : > { %v4786_v60 = vadd.f32 %v3564_v32, %v4693_v21  ;;  %v4789_v51 = vadd.f32 %v3628_v0, %v4690_v48 }
 0x1a9   : > { %v3565_v47 = vpop.f32.mrb[88].mxu0  ;;  %v3629_v38 = vpop.f32.mrb[88].mxu1 }
 0x1aa   : > { %v3566_v5 = vpop.f32.mrb[89].mxu0  ;;  %v3630_v43 = vpop.f32.mrb[89].mxu1 }
 0x1ab   : > { %v3567_v18 = vadd.f32 %v3566_v5, %v3565_v47  ;;  %v3568_v26 = vpop.f32.mrb[90].mxu0  ;;  %v3631_v12 = vadd.f32 %v3630_v43, %v3629_v38  ;;  %v3632_v25 = vpop.f32.mrb[90].mxu1 }
 0x1ac   : > { %v3569_v13 = vpop.f32.mrb[91].mxu0  ;;  %v3633_v50 = vpop.f32.mrb[91].mxu1 }
 0x1ad   : > { %v4792_v14 = vadd.f32 %v3567_v18, %v4699_v44  ;;  %v3570_v61 = vadd.f32 %v3569_v13, %v3568_v26  ;;  %v3634_v46 = vadd.f32 %v3633_v50, %v3632_v25  ;;  %v4795_v21 = vadd.f32 %v3631_v12, %v4696_v34 }
 0x1af   : > { %v4798_v48 = vadd.f32 %v3570_v61, %v4705_v15  ;;  %v4801_v42 = vadd.f32 %v3634_v46, %v4702_v45 }
 0x1b1   : > { %v3571_v22 = vpop.f32.mrb[92].mxu0  ;;  %v3635_v52 = vpop.f32.mrb[92].mxu1 }
 0x1b2   : > { %v3572_v36 = vpop.f32.mrb[93].mxu0  ;;  %v3636_v39 = vpop.f32.mrb[93].mxu1 }
 0x1b3   : > { %v3573_v20 = vadd.f32 %v3572_v36, %v3571_v22  ;;  %v3574_v59 = vpop.f32.mrb[94].mxu0  ;;  %v3637_v44 = vadd.f32 %v3636_v39, %v3635_v52  ;;  %v3638_v53 = vpop.f32.mrb[94].mxu1 }
 0x1b4   : > { %v3575_v3 = vpop.f32.mrb[95].mxu0  ;;  %v3639_v63 = vpop.f32.mrb[95].mxu1 }
 0x1b5   : > { %v4804_v8 = vadd.f32 %v3573_v20, %v4711_v6  ;;  %v3576_v34 = vadd.f32 %v3575_v3, %v3574_v59  ;;  %v3640_v17 = vadd.f32 %v3639_v63, %v3638_v53  ;;  %v4807_v15 = vadd.f32 %v3637_v44, %v4708_v55 }
 0x1b7   : > { %v4810_v45 = vadd.f32 %v3576_v34, %v4717_v31  ;;  %v4813_v49 = vadd.f32 %v3640_v17, %v4714_v9 }
 0x1b9   : > { %v3577_v2 = vpop.f32.mrb[96].mxu0  ;;  %v3641_v32 = vpop.f32.mrb[96].mxu1 }
 0x1ba   : > { %v3578_v1 = vpop.f32.mrb[97].mxu0  ;;  %v3642_v47 = vpop.f32.mrb[97].mxu1 }
 0x1bb   : > { %v3579_v0 = vadd.f32 %v3578_v1, %v3577_v2  ;;  %v3580_v38 = vpop.f32.mrb[98].mxu0  ;;  %v3643_v6 = vadd.f32 %v3642_v47, %v3641_v32  ;;  %v3644_v5 = vpop.f32.mrb[98].mxu1 }
 0x1bc   : > { %v3581_v18 = vpop.f32.mrb[99].mxu0  ;;  %v3645_v26 = vpop.f32.mrb[99].mxu1 }
 0x1bd   : > { %v4816_v43 = vadd.f32 %v3579_v0, %v4723_v30  ;;  %v3582_v55 = vadd.f32 %v3581_v18, %v3580_v38  ;;  %v3646_v12 = vadd.f32 %v3645_v26, %v3644_v5  ;;  %v4819_v31 = vadd.f32 %v3643_v6, %v4720_v23 }
 0x1bf   : > { %v4822_v9 = vadd.f32 %v3582_v55, %v4729_v56  ;;  %v4825_v25 = vadd.f32 %v3646_v12, %v4726_v10 }
 0x1c1   : > { %v3583_v13 = vpop.f32.mrb[100].mxu0  ;;  %v3647_v61 = vpop.f32.mrb[100].mxu1 }
 0x1c2   : > { %v3584_v50 = vpop.f32.mrb[101].mxu0  ;;  %v3648_v22 = vpop.f32.mrb[101].mxu1 }
 0x1c3   : > { %v3585_v46 = vadd.f32 %v3584_v50, %v3583_v13  ;;  %v3586_v52 = vpop.f32.mrb[102].mxu0  ;;  %v3649_v30 = vadd.f32 %v3648_v22, %v3647_v61  ;;  %v3650_v36 = vpop.f32.mrb[102].mxu1 }
 0x1c4   : > { %v3587_v20 = vpop.f32.mrb[103].mxu0  ;;  %v3651_v59 = vpop.f32.mrb[103].mxu1 }
 0x1c5   : > { %v4828_v39 = vadd.f32 %v3585_v46, %v4735_v58  ;;  %v3588_v23 = vadd.f32 %v3587_v20, %v3586_v52  ;;  %v3652_v44 = vadd.f32 %v3651_v59, %v3650_v36  ;;  %v4831_v56 = vadd.f32 %v3649_v30, %v4732_v57 }
 0x1c7   : > { %v4834_v10 = vadd.f32 %v3588_v23, %v4741_v7  ;;  %v4837_v53 = vadd.f32 %v3652_v44, %v4738_v62 }
 0x1c9   : > { %v3589_v3 = vpop.f32.mrb[104].mxu0  ;;  %v3653_v34 = vpop.f32.mrb[104].mxu1 }
 0x1ca   : > { %v3590_v63 = vpop.f32.mrb[105].mxu0  ;;  %v3654_v2 = vpop.f32.mrb[105].mxu1 }
 0x1cb   : > { %v3591_v17 = vadd.f32 %v3590_v63, %v3589_v3  ;;  %v3592_v32 = vpop.f32.mrb[106].mxu0  ;;  %v3655_v58 = vadd.f32 %v3654_v2, %v3653_v34  ;;  %v3656_v1 = vpop.f32.mrb[106].mxu1 }
 0x1cc   : > { %v3593_v0 = vpop.f32.mrb[107].mxu0  ;;  %v3657_v38 = vpop.f32.mrb[107].mxu1 }
 0x1cd   : > { %v4840_v47 = vadd.f32 %v3591_v17, %v4747_v11  ;;  %v3594_v57 = vadd.f32 %v3593_v0, %v3592_v32  ;;  %v3658_v6 = vadd.f32 %v3657_v38, %v3656_v1  ;;  %v4843_v7 = vadd.f32 %v3655_v58, %v4744_v40 }
 0x1cf   : > { %v4846_v62 = vadd.f32 %v3594_v57, %v4753_v29  ;;  %v4849_v5 = vadd.f32 %v3658_v6, %v4750_v41 }
 0x1d1   : > { %v3595_v18 = vpop.f32.mrb[108].mxu0  ;;  %v3659_v55 = vpop.f32.mrb[108].mxu1 }
 0x1d2   : > { %v3596_v26 = vpop.f32.mrb[109].mxu0  ;;  %v3660_v13 = vpop.f32.mrb[109].mxu1 }
 0x1d3   : > { %v3597_v12 = vadd.f32 %v3596_v26, %v3595_v18  ;;  %v3598_v61 = vpop.f32.mrb[110].mxu0  ;;  %v3661_v11 = vadd.f32 %v3660_v13, %v3659_v55  ;;  %v3662_v50 = vpop.f32.mrb[110].mxu1 }
 0x1d4   : > { %v3599_v46 = vpop.f32.mrb[111].mxu0  ;;  %v3663_v52 = vpop.f32.mrb[111].mxu1 }
 0x1d5   : > { %v4852_v22 = vadd.f32 %v3597_v12, %v4759_v4  ;;  %v3600_v40 = vadd.f32 %v3599_v46, %v3598_v61  ;;  %v3664_v29 = vadd.f32 %v3663_v52, %v3662_v50  ;;  %v4855_v30 = vadd.f32 %v3661_v11, %v4756_v28 }
 0x1d7   : > { %v4858_v41 = vadd.f32 %v3600_v40, %v4765_v35  ;;  %v4861_v36 = vadd.f32 %v3664_v29, %v4762_v24 }
 0x1d9   : > { %v3755_v20 = vpop.f32.mrb[112].mxu0  ;;  %v3665_v23 = vpop.f32.mrb[112].mxu1 }
 0x1da   : > { %v2467_v59 = vadd.f32 %v3755_v20, %v4783_v27  ;;  %v2458_v44 = vpop.f32.mrb[113].mxu0  ;;  %v3666_v4 = vpop.f32.mrb[113].mxu1 }
 0x1db   : > { %v2459_v3 = vadd.f32 %v2458_v44, %v4771_v54  ;;  %v3756_v34 = vpop.f32.mrb[114].mxu0  ;;  %v3667_v63 = vadd.f32 %v3666_v4, %v3665_v23  ;;  %v3668_v17 = vpop.f32.mrb[114].mxu1 }
 0x1dc   : > { %v2470_v28 = vadd.f32 %v3756_v34, %v4789_v51  ;;  %v2461_v2 = vpop.f32.mrb[115].mxu0  ;;  %v3669_v24 = vpop.f32.mrb[115].mxu1  ;;  %v2785_v38 = vmul.f32 %v2467_v59, %v2467_v59 }
 0x1dd   : > { %v2462_v35 = vadd.f32 %v2461_v2, %v4777_v16  ;;  %v3670_v32 = vadd.f32 %v3669_v24, %v3668_v17  ;;  %v4875_v54 = vadd.f32 %v3667_v63, %v4768_v37  ;;  %v2783_v58 = vmul.f32 %v2459_v3, %v2459_v3 }
 0x1de   : > { %v3163_v27 = vpack.c.bf16 %v2470_v28, %v2467_v59  ;;  %v2786_v13 = vmul.f32 %v2470_v28, %v2470_v28 }
 0x1df   : > { %v3158_v1 = vpack.c.bf16 %v2462_v35, %v2459_v3  ;;  %v2745_v51 = vadd.f32 %v2462_v35, %v2459_v3  ;;  %v2784_v0 = vmul.f32 %v2462_v35, %v2462_v35  ;;  %v4879_v57 = vadd.f32 %v3670_v32, %v4774_v19 }
 0x1e0   : > { %3250 = vst [vmem:[%s4871_s24 + $0x8] sm:$0xff] %v3163_v27  }
 0x1e1   : > { %3159 = vst [vmem:[%s4871_s24] sm:$0xff] %v3158_v1   ;;  %v2746_v6 = vadd.f32 %v2745_v51, %v2467_v59  ;;  %v2815_v18 = vadd.f32 %v2784_v0, %v2783_v58  ;;  %v3759_v55 = vpop.f32.mrb[116].mxu0  ;;  %v3671_v26 = vpop.f32.mrb[116].mxu1 }
 0x1e2   : > { %v2483_v16 = vadd.f32 %v3759_v55, %v4807_v15  ;;  %v2474_v12 = vpop.f32.mrb[117].mxu0  ;;  %v3672_v61 = vpop.f32.mrb[117].mxu1 }
 0x1e3   : > { %v2816_v37 = vadd.f32 %v2815_v18, %v2785_v38  ;;  %v2475_v11 = vadd.f32 %v2474_v12, %v4795_v21  ;;  %v2747_v50 = vadd.f32 %v2746_v6, %v2470_v28  ;;  %v3760_v46 = vpop.f32.mrb[118].mxu0  ;;  %v3673_v40 = vadd.f32 %v3672_v61, %v3671_v26  ;;  %v3674_v19 = vpop.f32.mrb[118].mxu1 }
 0x1e4   : > { %v2486_v52 = vadd.f32 %v3760_v46, %v4813_v49  ;;  %v2477_v29 = vpop.f32.mrb[119].mxu0  ;;  %v3675_v44 = vpop.f32.mrb[119].mxu1  ;;  %v2789_v2 = vmul.f32 %v2483_v16, %v2483_v16 }
 0x1e5   : > { %v2748_v20 = vadd.f32 %v2747_v50, %v2475_v11  ;;  %v2787_v23 = vmul.f32 %v2475_v11, %v2475_v11  ;;  %v2817_v59 = vadd.f32 %v2816_v37, %v2786_v13  ;;  %v2478_v15 = vadd.f32 %v2477_v29, %v4801_v42 }
 0x1e6   : > { %v3173_v4 = vpack.c.bf16 %v2486_v52, %v2483_v16  ;;  %v3676_v3 = vadd.f32 %v3675_v44, %v3674_v19  ;;  %v4887_v34 = vadd.f32 %v3673_v40, %v4780_v33  ;;  %v2790_v1 = vmul.f32 %v2486_v52, %v2486_v52 }
 0x1e7   : > { %v2818_v21 = vadd.f32 %v2817_v59, %v2787_v23  ;;  %v3168_v63 = vpack.c.bf16 %v2478_v15, %v2475_v11  ;;  %v2749_v17 = vadd.f32 %v2748_v20, %v2478_v15  ;;  %v2788_v28 = vmul.f32 %v2478_v15, %v2478_v15 }
 0x1e8   : > { %3252 = vst [vmem:[%s4871_s24 + $0x18] sm:$0xff] %v3173_v4   ;;  %v4891_v49 = vadd.f32 %v3676_v3, %v4786_v60 }
 0x1e9   : > { %3251 = vst [vmem:[%s4871_s24 + $0x10] sm:$0xff] %v3168_v63   ;;  %v2750_v24 = vadd.f32 %v2749_v17, %v2483_v16  ;;  %v2819_v35 = vadd.f32 %v2818_v21, %v2788_v28  ;;  %v3763_v27 = vpop.f32.mrb[120].mxu0  ;;  %v3677_v32 = vpop.f32.mrb[120].mxu1 }
 0x1ea   : > { %v2499_v42 = vadd.f32 %v3763_v27, %v4831_v56  ;;  %v2490_v58 = vpop.f32.mrb[121].mxu0  ;;  %v3678_v51 = vpop.f32.mrb[121].mxu1 }
 0x1eb   : > { %v2820_v33 = vadd.f32 %v2819_v35, %v2789_v2  ;;  %v2491_v0 = vadd.f32 %v2490_v58, %v4819_v31  ;;  %v2751_v38 = vadd.f32 %v2750_v24, %v2486_v52  ;;  %v3764_v6 = vpop.f32.mrb[122].mxu0  ;;  %v3679_v18 = vadd.f32 %v3678_v51, %v3677_v32  ;;  %v3680_v60 = vpop.f32.mrb[122].mxu1 }
 0x1ec   : > { %v2502_v55 = vadd.f32 %v3764_v6, %v4837_v53  ;;  %v2493_v26 = vpop.f32.mrb[123].mxu0  ;;  %v3681_v37 = vpop.f32.mrb[123].mxu1  ;;  %v2793_v52 = vmul.f32 %v2499_v42, %v2499_v42 }
 0x1ed   : > { %v2752_v16 = vadd.f32 %v2751_v38, %v2491_v0  ;;  %v2791_v12 = vmul.f32 %v2491_v0, %v2491_v0  ;;  %v2821_v13 = vadd.f32 %v2820_v33, %v2790_v1  ;;  %v2494_v56 = vadd.f32 %v2493_v26, %v4825_v25 }
 0x1ee   : > { %v3183_v61 = vpack.c.bf16 %v2502_v55, %v2499_v42  ;;  %v3682_v11 = vadd.f32 %v3681_v37, %v3680_v60  ;;  %v4899_v50 = vadd.f32 %v3679_v18, %v4792_v14  ;;  %v2794_v15 = vmul.f32 %v2502_v55, %v2502_v55 }
 0x1ef   : > { %v2822_v31 = vadd.f32 %v2821_v13, %v2791_v12  ;;  %v3178_v46 = vpack.c.bf16 %v2494_v56, %v2491_v0  ;;  %v2753_v40 = vadd.f32 %v2752_v16, %v2494_v56  ;;  %v2792_v19 = vmul.f32 %v2494_v56, %v2494_v56 }
 0x1f0   : > { %3254 = vst [vmem:[%s4871_s24 + $0x28] sm:$0xff] %v3183_v61   ;;  %v4903_v53 = vadd.f32 %v3682_v11, %v4798_v48 }
 0x1f1   : > { %3253 = vst [vmem:[%s4871_s24 + $0x20] sm:$0xff] %v3178_v46   ;;  %v2754_v29 = vadd.f32 %v2753_v40, %v2499_v42  ;;  %v2823_v20 = vadd.f32 %v2822_v31, %v2792_v19  ;;  %v3767_v23 = vpop.f32.mrb[124].mxu0  ;;  %v3683_v59 = vpop.f32.mrb[124].mxu1 }
 0x1f2   : > { %v2515_v25 = vadd.f32 %v3767_v23, %v4855_v30  ;;  %v2506_v44 = vpop.f32.mrb[125].mxu0  ;;  %v3684_v4 = vpop.f32.mrb[125].mxu1 }
 0x1f3   : > { %v2824_v14 = vadd.f32 %v2823_v20, %v2793_v52  ;;  %v2507_v3 = vadd.f32 %v2506_v44, %v4843_v7  ;;  %v2755_v21 = vadd.f32 %v2754_v29, %v2502_v55  ;;  %v3768_v63 = vpop.f32.mrb[126].mxu0  ;;  %v3685_v17 = vadd.f32 %v3684_v4, %v3683_v59  ;;  %v3686_v48 = vpop.f32.mrb[126].mxu1 }
 0x1f4   : > { %v2518_v28 = vadd.f32 %v3768_v63, %v4861_v36  ;;  %v2509_v2 = vpop.f32.mrb[127].mxu0  ;;  %v3687_v32 = vpop.f32.mrb[127].mxu1  ;;  %v2797_v36 = vmul.f32 %v2515_v25, %v2515_v25 }
 0x1f5   : > { %v2756_v24 = vadd.f32 %v2755_v21, %v2507_v3  ;;  %v2795_v35 = vmul.f32 %v2507_v3, %v2507_v3  ;;  %v2825_v27 = vadd.f32 %v2824_v14, %v2794_v15  ;;  %v2510_v30 = vadd.f32 %v2509_v2, %v4849_v5 }
 0x1f6   : > { %v3193_v42 = vpack.c.bf16 %v2518_v28, %v2515_v25  ;;  %v3688_v58 = vadd.f32 %v3687_v32, %v3686_v48  ;;  %v2386_v1 = vadd.f32 %v3685_v17, %v4804_v8  ;;  %v2798_v16 = vmul.f32 %v2518_v28, %v2518_v28 }
 0x1f7   : > { %v2826_v7 = vadd.f32 %v2825_v27, %v2795_v35  ;;  %v3188_v33 = vpack.c.bf16 %v2510_v30, %v2507_v3  ;;  %v2757_v51 = vadd.f32 %v2756_v24, %v2510_v30  ;;  %v2796_v0 = vmul.f32 %v2510_v30, %v2510_v30 }
 0x1f8   : > { %3256 = vst [vmem:[%s4871_s24 + $0x38] sm:$0xff] %v3193_v42   ;;  %v2389_v38 = vadd.f32 %v3688_v58, %v4810_v45 }
 0x1f9   : > { %3255 = vst [vmem:[%s4871_s24 + $0x30] sm:$0xff] %v3188_v33   ;;  %v2758_v6 = vadd.f32 %v2757_v51, %v2515_v25  ;;  %v2827_v18 = vadd.f32 %v2826_v7, %v2796_v0  ;;  %v3771_v60 = vpop.f32.mrb[128].mxu0  ;;  %v3689_v55 = vpop.f32.mrb[128].mxu1 }
 0x1fa   : > { %v2531_v26 = vadd.f32 %v3771_v60, %v4887_v34  ;;  %v2522_v5 = vpop.f32.mrb[129].mxu0  ;;  %v3690_v13 = vpop.f32.mrb[129].mxu1 }
 0x1fb   : > { %v2828_v12 = vadd.f32 %v2827_v18, %v2797_v36  ;;  %v2523_v8 = vadd.f32 %v2522_v5, %v4875_v54  ;;  %v2759_v37 = vadd.f32 %v2758_v6, %v2518_v28  ;;  %v3772_v56 = vpop.f32.mrb[130].mxu0  ;;  %v3691_v61 = vadd.f32 %v3690_v13, %v3689_v55  ;;  %v3692_v11 = vpop.f32.mrb[130].mxu1 }
 0x1fc   : > { %v2534_v45 = vadd.f32 %v3772_v56, %v4891_v49  ;;  %v2525_v31 = vpop.f32.mrb[131].mxu0  ;;  %v3693_v52 = vpop.f32.mrb[131].mxu1  ;;  %v2801_v49 = vmul.f32 %v2531_v26, %v2531_v26 }
 0x1fd   : > { %v2760_v46 = vadd.f32 %v2759_v37, %v2523_v8  ;;  %v2799_v40 = vmul.f32 %v2523_v8, %v2523_v8  ;;  %v2829_v19 = vadd.f32 %v2828_v12, %v2798_v16  ;;  %v2526_v34 = vadd.f32 %v2525_v31, %v4879_v57 }
 0x1fe   : > { %v3203_v29 = vpack.c.bf16 %v2534_v45, %v2531_v26  ;;  %v3694_v20 = vadd.f32 %v3693_v52, %v3692_v11  ;;  %v2394_v23 = vadd.f32 %v3691_v61, %v4816_v43  ;;  %v2802_v57 = vmul.f32 %v2534_v45, %v2534_v45 }
 0x1ff   : > { %v2830_v54 = vadd.f32 %v2829_v19, %v2799_v40  ;;  %v3198_v59 = vpack.c.bf16 %v2526_v34, %v2523_v8  ;;  %v2761_v25 = vadd.f32 %v2760_v46, %v2526_v34  ;;  %v2800_v44 = vmul.f32 %v2526_v34, %v2526_v34 }
 0x200   : > { %3258 = vst [vmem:[%s4871_s24 + $0x48] sm:$0xff] %v3203_v29   ;;  %v2397_v15 = vadd.f32 %v3694_v20, %v4822_v9 }
 0x201   : > { %3257 = vst [vmem:[%s4871_s24 + $0x40] sm:$0xff] %v3198_v59   ;;  %v2762_v14 = vadd.f32 %v2761_v25, %v2531_v26  ;;  %v2831_v4 = vadd.f32 %v2830_v54, %v2800_v44  ;;  %v3775_v3 = vpop.f32.mrb[132].mxu0  ;;  %v3695_v21 = vpop.f32.mrb[132].mxu1 }
 0x202   : > { %v2547_v63 = vadd.f32 %v3775_v3, %v2386_v1  ;;  %v2538_v17 = vpop.f32.mrb[133].mxu0  ;;  %v3696_v28 = vpop.f32.mrb[133].mxu1 }
 0x203   : > { %v2832_v48 = vadd.f32 %v2831_v4, %v2801_v49  ;;  %v2539_v43 = vadd.f32 %v2538_v17, %v4899_v50  ;;  %v2763_v2 = vadd.f32 %v2762_v14, %v2534_v45  ;;  %v3776_v24 = vpop.f32.mrb[134].mxu0  ;;  %v3697_v35 = vadd.f32 %v3696_v28, %v3695_v21  ;;  %v3698_v27 = vpop.f32.mrb[134].mxu1 }
 0x204   : > { %v2550_v32 = vadd.f32 %v3776_v24, %v2389_v38  ;;  %v2541_v9 = vpop.f32.mrb[135].mxu0  ;;  %v3699_v7 = vpop.f32.mrb[135].mxu1  ;;  %v2805_v38 = vmul.f32 %v2547_v63, %v2547_v63 }
 0x205   : > { %v2764_v30 = vadd.f32 %v2763_v2, %v2539_v43  ;;  %v2803_v42 = vmul.f32 %v2539_v43, %v2539_v43  ;;  %v2833_v58 = vadd.f32 %v2832_v48, %v2802_v57  ;;  %v2542_v1 = vadd.f32 %v2541_v9, %v4903_v53 }
 0x206   : > { %v3213_v33 = vpack.c.bf16 %v2550_v32, %v2547_v63  ;;  %v3700_v51 = vadd.f32 %v3699_v7, %v3698_v27  ;;  %v2402_v0 = vadd.f32 %v3697_v35, %v4828_v39  ;;  %v2806_v53 = vmul.f32 %v2550_v32, %v2550_v32 }
 0x207   : > { %v2834_v36 = vadd.f32 %v2833_v58, %v2803_v42  ;;  %v3208_v50 = vpack.c.bf16 %v2542_v1, %v2539_v43  ;;  %v2765_v6 = vadd.f32 %v2764_v30, %v2542_v1  ;;  %v2804_v18 = vmul.f32 %v2542_v1, %v2542_v1 }
 0x208   : > { %3260 = vst [vmem:[%s4871_s24 + $0x58] sm:$0xff] %v3213_v33   ;;  %v2405_v60 = vadd.f32 %v3700_v51, %v4834_v10 }
 0x209   : > { %3259 = vst [vmem:[%s4871_s24 + $0x50] sm:$0xff] %v3208_v50   ;;  %v2766_v55 = vadd.f32 %v2765_v6, %v2547_v63  ;;  %v2835_v26 = vadd.f32 %v2834_v36, %v2804_v18  ;;  %v3779_v5 = vpop.f32.mrb[136].mxu0  ;;  %v3701_v16 = vpop.f32.mrb[136].mxu1 }
 0x20a   : > { %v2563_v12 = vadd.f32 %v3779_v5, %v2402_v0  ;;  %v2554_v13 = vpop.f32.mrb[137].mxu0  ;;  %v3702_v37 = vpop.f32.mrb[137].mxu1 }
 0x20b   : > { %v2836_v8 = vadd.f32 %v2835_v26, %v2805_v38  ;;  %v2555_v56 = vadd.f32 %v2554_v13, %v2394_v23  ;;  %v2767_v39 = vadd.f32 %v2766_v55, %v2550_v32  ;;  %v3780_v61 = vpop.f32.mrb[138].mxu0  ;;  %v3703_v11 = vadd.f32 %v3702_v37, %v3701_v16  ;;  %v3704_v45 = vpop.f32.mrb[138].mxu1 }
 0x20c   : > { %v2566_v31 = vadd.f32 %v3780_v61, %v2405_v60  ;;  %v2557_v46 = vpop.f32.mrb[139].mxu0  ;;  %v3705_v52 = vpop.f32.mrb[139].mxu1  ;;  %v2809_v14 = vmul.f32 %v2563_v12, %v2563_v12 }
 0x20d   : > { %v2768_v10 = vadd.f32 %v2767_v39, %v2555_v56  ;;  %v2807_v40 = vmul.f32 %v2555_v56, %v2555_v56  ;;  %v2837_v19 = vadd.f32 %v2836_v8, %v2806_v53  ;;  %v2558_v34 = vadd.f32 %v2557_v46, %v2397_v15 }
 0x20e   : > { %v3223_v29 = vpack.c.bf16 %v2566_v31, %v2563_v12  ;;  %v3706_v20 = vadd.f32 %v3705_v52, %v3704_v45  ;;  %v2410_v54 = vadd.f32 %v3703_v11, %v4840_v47  ;;  %v2810_v57 = vmul.f32 %v2566_v31, %v2566_v31 }
 0x20f   : > { %v2838_v59 = vadd.f32 %v2837_v19, %v2807_v40  ;;  %v3218_v25 = vpack.c.bf16 %v2558_v34, %v2555_v56  ;;  %v2769_v23 = vadd.f32 %v2768_v10, %v2558_v34  ;;  %v2808_v44 = vmul.f32 %v2558_v34, %v2558_v34 }
 0x210   : > { %3262 = vst [vmem:[%s4871_s24 + $0x68] sm:$0xff] %v3223_v29   ;;  %v2413_v49 = vadd.f32 %v3706_v20, %v4846_v62 }
 0x211   : > { %3261 = vst [vmem:[%s4871_s24 + $0x60] sm:$0xff] %v3218_v25   ;;  %v2770_v4 = vadd.f32 %v2769_v23, %v2563_v12  ;;  %v2839_v3 = vadd.f32 %v2838_v59, %v2808_v44  ;;  %v3783_v21 = vpop.f32.mrb[140].mxu0  ;;  %v3707_v63 = vpop.f32.mrb[140].mxu1 }
 0x212   : > { %v2570_v17 = vpop.f32.mrb[141].mxu0  ;;  %v3708_v48 = vpop.f32.mrb[141].mxu1 }
 0x213   : > { %v2840_v15 = vadd.f32 %v2839_v3, %v2809_v14  ;;  %v2571_v28 = vadd.f32 %v2570_v17, %v2410_v54  ;;  %v2771_v43 = vadd.f32 %v2770_v4, %v2566_v31  ;;  %v3784_v47 = vpop.f32.mrb[142].mxu0  ;;  %v3709_v2 = vadd.f32 %v3708_v48, %v3707_v63  ;;  %v3710_v24 = vpop.f32.mrb[142].mxu1 }
 0x214   : > { %v2573_v35 = vpop.f32.mrb[143].mxu0  ;;  %v3711_v9 = vpop.f32.mrb[143].mxu1 }
 0x215   : > { %v2772_v27 = vadd.f32 %v2771_v43, %v2571_v28  ;;  %v2811_v32 = vmul.f32 %v2571_v28, %v2571_v28  ;;  %v2841_v62 = vadd.f32 %v2840_v15, %v2810_v57  ;;  %v2574_v30 = vadd.f32 %v2573_v35, %v2413_v49 }
 0x216   : > { %v2418_v42 = vadd.f32 %v3709_v2, %v4852_v22  ;;  %v3712_v58 = vadd.f32 %v3711_v9, %v3710_v24 }
 0x217   : > { %v2842_v7 = vadd.f32 %v2841_v62, %v2811_v32  ;;  %v3228_v1 = vpack.c.bf16 %v2574_v30, %v2571_v28  ;;  %v2773_v33 = vadd.f32 %v2772_v27, %v2574_v30  ;;  %v2812_v51 = vmul.f32 %v2574_v30, %v2574_v30 }
 0x218   : > { %v2579_v0 = vadd.f32 %v3783_v21, %v2418_v42  ;;  %v2421_v36 = vadd.f32 %v3712_v58, %v4858_v41 }
 0x219   : > { %3263 = vst [vmem:[%s4871_s24 + $0x70] sm:$0xff] %v3228_v1   ;;  %v2843_v50 = vadd.f32 %v2842_v7, %v2812_v51 }
 0x21a   : > { %v2813_v6 = vmul.f32 %v2579_v0, %v2579_v0  ;;  %v2582_v18 = vadd.f32 %v3784_v47, %v2421_v36  ;;  %v2774_v60 = vadd.f32 %v2773_v33, %v2579_v0 }
 0x21c   : > { %v3233_v38 = vpack.c.bf16 %v2582_v18, %v2579_v0  ;;  %v2814_v55 = vmul.f32 %v2582_v18, %v2582_v18  ;;  %v2775_v26 = vadd.f32 %v2774_v60, %v2582_v18  ;;  %v2844_v5 = vadd.f32 %v2843_v50, %v2813_v6 }
 0x21e   : > { %3264 = vst [vmem:[%s4871_s24 + $0x78] sm:$0xff] %v3233_v38   ;;  %v2776_v22 = vrot.slane %v2775_v26, 4  ;;  %v2845_v16 = vadd.f32 %v2844_v5, %v2814_v55 }
 0x220   : > { %v2777_v12 = vadd.f32 %v2776_v22, %v2775_v26  ;;  %v2846_v13 = vrot.slane %v2845_v16, 4 }
 0x222   : > { %v2778_v53 = vrot.slane %v2777_v12, 2  ;;  %v2847_v8 = vadd.f32 %v2846_v13, %v2845_v16 }
 0x224   : > { %v2779_v37 = vadd.f32 %v2778_v53, %v2777_v12  ;;  %v2848_v41 = vrot.slane %v2847_v8, 2 }
 0x226   : > { %v2780_v56 = vrot.slane %v2779_v37, 1  ;;  %v2849_v39 = vadd.f32 %v2848_v41, %v2847_v8 }
 0x228   : > { %v2781_v61 = vadd.f32 %v2780_v56, %v2779_v37  ;;  %v2850_v11 = vrot.slane %v2849_v39, 1 }
 0x22a   : > { %2782 = vst [vmem:[%s235_s27] sm:$0x1] %v2781_v61  ;;  %v2851_v45 = vadd.f32 %v2850_v11, %v2849_v39 }
 0x22c   : > { %2852 = vst [vmem:[%s235_s27 + $0x1] sm:$0x1] %v2851_v45 }
 0x22d PF: > { %s16_s18 = sadd.s32 1, %s3889_s18  }
 0x22e   : > { %p13_p4 = scmp.ge.s32.totalorder %s16_s18, 4  }
 0x230   :  { %15 = sbr.rel (!%p13_p4) target bundleno = 1 (0x1), region = 81 }

</bundles_post_ra>
